<compile_context>
chip_gen: v7x
topology: tpu7x:2x2x1
jax: 0.10.0
libtpu: 0.0.40
codegen_flags: <defaults>
</compile_context>

<pallas_src>
import jax
import jax.numpy as jnp
from jax.experimental import pallas as pl
from jax.experimental.pallas import tpu as pltpu

LANE = 128  # TPU lane width


def _round_up(v, m):
    return (v + m - 1) // m * m


def _gcrn_kernel(x_ref, s_ref, wxa_ref, ba_ref, whzr_ref, whh_ref,
                 wl_ref, bl_ref, o_ref, hall_scr):
    T, N, _F = x_ref.shape
    CP = whh_ref.shape[-1]                      # lane-padded hidden channels

    S = s_ref[...]                              # (N, N)        bf16
    Wxa = wxa_ref[...]                          # (2F, 3*CP)    bf16
    Whzr = whzr_ref[...]                        # (2*CP, 2*CP)  bf16
    Whh = whh_ref[...]                          # (2*CP, CP)    bf16
    # biases (x-path + h-path pre-added per gate), broadcast hoisted out of the loop
    b_all = jnp.broadcast_to(ba_ref[...], (N, 3 * CP))          # f32

    def step(t, H):
        # ---- x path: both Chebyshev terms and all three gates in one MXU call
        Xt = x_ref[t]                                            # (N, F) bf16
        SX = jnp.dot(S, Xt, preferred_element_type=jnp.float32)
        XX = jnp.concatenate([Xt, SX.astype(jnp.bfloat16)], axis=-1)
        Gx = jnp.dot(XX, Wxa, preferred_element_type=jnp.float32) + b_all   # (N, 3CP)

        # ---- h path for update/reset gates, fused
        Hb = H.astype(jnp.bfloat16)
        SH = jnp.dot(S, Hb, preferred_element_type=jnp.float32)
        HH = jnp.concatenate([Hb, SH.astype(jnp.bfloat16)], axis=-1)
        Gzr = jnp.dot(HH, Whzr, preferred_element_type=jnp.float32)         # (N, 2CP)

        Z = jax.nn.sigmoid(Gx[:, :CP] + Gzr[:, :CP])             # update gate (f32)
        R = jax.nn.sigmoid(Gx[:, CP:2 * CP] + Gzr[:, CP:])       # reset gate  (f32)

        # ---- candidate state (uses H*R, so its h path stays separate)
        HR = (H * R).astype(jnp.bfloat16)
        SHR = jnp.dot(S, HR, preferred_element_type=jnp.float32)
        HHR = jnp.concatenate([HR, SHR.astype(jnp.bfloat16)], axis=-1)
        Gh = jnp.dot(HHR, Whh, preferred_element_type=jnp.float32)          # (N, CP)

        Ht = jnp.tanh(Gx[:, 2 * CP:] + Gh)
        Hn = Z * H + (1.0 - Z) * Ht                               # f32 recurrent state

        # Store the ReLU'd bf16 copy for the head (relu commutes with the bf16
        # round, so this is numerically identical to relu+cast after the loop,
        # but halves scratch traffic and feeds the head matmul MXU-ready data).
        hall_scr[pl.ds(t * N, N), :] = jnp.maximum(Hn, 0.0).astype(jnp.bfloat16)
        return Hn

    # T is a static compile-time constant: a Python loop is a fully-unrolled
    # recurrence (equivalent to lax.fori_loop(..., unroll=True)).
    H = jnp.zeros((N, CP), jnp.float32)
    for t in range(T):
        H = step(t, H)

    # ---- batched head: Linear over all T*N rows, one matmul, one lane-dense store.
    Y = jnp.dot(hall_scr[...], wl_ref[...],
                preferred_element_type=jnp.float32) + bl_ref[...]
    o_ref[...] = Y.astype(o_ref.dtype)


def gcrn_forward(x, S, wx0, wx1, bx, wh0, wh1, bh, wl, bl):
    """GConvGRU(K=2, sym) over time + ReLU + Linear head in a single pallas_call."""
    T, N, Fin = x.shape
    C = wh0.shape[-1]
    OUT = wl.shape[-1]
    CP = _round_up(C, LANE)       # lane-pad hidden channels (zero pads are exact no-ops)
    OUTP = _round_up(OUT, LANE)   # lane-pad head output → unmasked full-lane stores

    bf16 = jnp.bfloat16
    padc = lambda w: jnp.pad(w, [(0, 0)] * (w.ndim - 1) + [(0, CP - C)])
    padcc = lambda w: jnp.pad(w, [(0, CP - C), (0, CP - C)])

    # Fused Chebyshev (T0|T1) and gate (z|r|h) weights → one matmul per path.
    wx_all = jnp.concatenate(
        [padc(jnp.concatenate([wx0[g], wx1[g]], axis=0)) for g in range(3)], axis=1)
    wh_zr = jnp.concatenate(
        [jnp.concatenate([padcc(wh0[g]), padcc(wh1[g])], axis=0) for g in (0, 1)],
        axis=1)
    wh_h = jnp.concatenate([padcc(wh0[2]), padcc(wh1[2])], axis=0)
    b_all = jnp.concatenate([padc(bx[g] + bh[g]) for g in range(3)], axis=1)  # f32
    wl_p = jnp.pad(wl, [(0, CP - C), (0, OUTP - OUT)])
    bl_p = jnp.pad(bl, [(0, 0), (0, OUTP - OUT)])

    out = pl.pallas_call(
        _gcrn_kernel,
        out_shape=jax.ShapeDtypeStruct((T * N, OUTP), jnp.float32),
        scratch_shapes=[pltpu.VMEM((T * N, CP), jnp.bfloat16)],   # stacked relu(H_t), bf16
    )(x.astype(bf16), S.astype(bf16),
      wx_all.astype(bf16), b_all.astype(jnp.float32),
      wh_zr.astype(bf16), wh_h.astype(bf16),
      wl_p.astype(bf16), bl_p.astype(jnp.float32))
    # drop the lane padding of the head output (layout plumbing only)
    return out[:, :OUT].reshape(T, N, OUT)


def gcrn_reference(x, S, wx0, wx1, bx, wh0, wh1, bh, wl, bl):
    """Pure-JAX reference (unfused, unpadded) mirroring the kernel's numerics:
    bf16 matmul operands, f32 accumulation, f32-carried hidden state."""
    T, N, _ = x.shape
    C = wh0.shape[-1]
    bf = lambda a: a.astype(jnp.bfloat16)
    mm = lambda a, b: jnp.dot(bf(a), bf(b), preferred_element_type=jnp.float32)

    def cheb(Xin, W0, W1, b):
        return mm(Xin, W0) + mm(mm(S, Xin), W1) + b

    H = jnp.zeros((N, C), jnp.float32)
    outs = []
    for t in range(T):
        X = x[t]
        Z = jax.nn.sigmoid(cheb(X, wx0[0], wx1[0], bx[0]) + cheb(H, wh0[0], wh1[0], bh[0]))
        R = jax.nn.sigmoid(cheb(X, wx0[1], wx1[1], bx[1]) + cheb(H, wh0[1], wh1[1], bh[1]))
        Ht = jnp.tanh(cheb(X, wx0[2], wx1[2], bx[2]) + cheb(H * R, wh0[2], wh1[2], bh[2]))
        H = Z * H + (1.0 - Z) * Ht
        outs.append(mm(jnp.maximum(H, 0.0), wl) + bl)
    return jnp.stack(outs, 0)


def build_norm_matrix(edge_index, edge_weight, num_nodes):
    """S = -D^{-1/2} A D^{-1/2} (ChebConv sym normalization, lambda_max=2, zero diag)."""
    src, dst = edge_index[0], edge_index[1]
    deg = jnp.zeros((num_nodes,), jnp.float32).at[src].add(edge_weight)
    dis = jnp.where(deg > 0, jax.lax.rsqrt(deg), 0.0)
    vals = -dis[src] * edge_weight * dis[dst]
    S = jnp.zeros((num_nodes, num_nodes), jnp.float32).at[dst, src].add(vals)
    return S


if __name__ == "__main__":
    T, N, F_IN, C_OUT, OUT = 8, 16, 4, 32, 1   # regression head (out=1)

    key = jax.random.PRNGKey(0)
    ks = jax.random.split(key, 10)

    x = jax.random.normal(ks[0], (T, N, F_IN), jnp.float32)

    # bidirectional ring graph, unit edge weights
    idx = jnp.arange(N)
    src = jnp.concatenate([idx, (idx + 1) % N])
    dst = jnp.concatenate([(idx + 1) % N, idx])
    edge_index = jnp.stack([src, dst], axis=0)          # (2, 2N)
    edge_weight = jnp.ones((2 * N,), jnp.float32)
    S = build_norm_matrix(edge_index, edge_weight, N)

    # deterministic parameter init (synthetic weights; order along dim 0 is [z, r, h])
    wx0 = 0.2 * jax.random.normal(ks[1], (3, F_IN, C_OUT), jnp.float32)
    wx1 = 0.2 * jax.random.normal(ks[2], (3, F_IN, C_OUT), jnp.float32)
    bx = 0.1 * jax.random.normal(ks[3], (3, 1, C_OUT), jnp.float32)
    wh0 = 0.2 * jax.random.normal(ks[4], (3, C_OUT, C_OUT), jnp.float32)
    wh1 = 0.2 * jax.random.normal(ks[5], (3, C_OUT, C_OUT), jnp.float32)
    bh = 0.1 * jax.random.normal(ks[6], (3, 1, C_OUT), jnp.float32)
    wl = 0.2 * jax.random.normal(ks[7], (C_OUT, OUT), jnp.float32)
    bl = 0.1 * jax.random.normal(ks[8], (1, OUT), jnp.float32)

    out = jax.jit(gcrn_forward)(x, S, wx0, wx1, bx, wh0, wh1, bh, wl, bl)
    out = jax.block_until_ready(out)

    ref = gcrn_reference(x, S, wx0, wx1, bx, wh0, wh1, bh, wl, bl)
    assert out.shape == (T, N, OUT), out.shape
    # kernel uses fused (but mathematically identical) weights and f32 accumulation;
    # remaining deltas vs. the mirrored reference are accumulation-order-level.
    err = float(jnp.max(jnp.abs(out - ref)))
    assert jnp.allclose(out, ref, rtol=2e-3, atol=2e-3), err

    print("KERNEL_OK")
</pallas_src>

<mosaic_0001>
module attributes {stable_mosaic.version = 11 : i64} {
  func.func @_gcrn_kernel(%arg0: memref<8x16x4xbf16, #tpu.memory_space<vmem>>, %arg1: memref<16x16xbf16, #tpu.memory_space<vmem>>, %arg2: memref<8x384xbf16, #tpu.memory_space<vmem>>, %arg3: memref<1x384xf32, #tpu.memory_space<vmem>>, %arg4: memref<256x256xbf16, #tpu.memory_space<vmem>>, %arg5: memref<256x128xbf16, #tpu.memory_space<vmem>>, %arg6: memref<128x128xbf16, #tpu.memory_space<vmem>>, %arg7: memref<1x128xf32, #tpu.memory_space<vmem>>, %arg8: memref<128x128xf32, #tpu.memory_space<vmem>>, %arg9: memref<128x128xbf16, #tpu.memory_space<vmem>>) attributes {dimension_semantics = [], scalar_prefetch = 0 : i64, scratch_operands = 1 : i64, tpu.core_type = #tpu.core_type<tc>} {
    %c0 = arith.constant 0 : index
    %c0_0 = arith.constant 0 : index
    %0 = vector.load %arg1[%c0, %c0_0] : memref<16x16xbf16, #tpu.memory_space<vmem>>, vector<16x16xbf16>
    %c0_1 = arith.constant 0 : index
    %c0_2 = arith.constant 0 : index
    %1 = vector.load %arg2[%c0_1, %c0_2] : memref<8x384xbf16, #tpu.memory_space<vmem>>, vector<8x384xbf16>
    %c0_3 = arith.constant 0 : index
    %c0_4 = arith.constant 0 : index
    %2 = vector.load %arg4[%c0_3, %c0_4] : memref<256x256xbf16, #tpu.memory_space<vmem>>, vector<256x256xbf16>
    %c0_5 = arith.constant 0 : index
    %c0_6 = arith.constant 0 : index
    %3 = vector.load %arg5[%c0_5, %c0_6] : memref<256x128xbf16, #tpu.memory_space<vmem>>, vector<256x128xbf16>
    %c0_7 = arith.constant 0 : index
    %c0_8 = arith.constant 0 : index
    %4 = vector.load %arg3[%c0_7, %c0_8] : memref<1x384xf32, #tpu.memory_space<vmem>>, vector<1x384xf32>
    %5 = vector.shape_cast %4 : vector<1x384xf32> to vector<1x384xf32>
    %6 = vector.broadcast %5 : vector<1x384xf32> to vector<16x384xf32>
    %cst = arith.constant 0.000000e+00 : f32
    %7 = vector.broadcast %cst : f32 to vector<16x128xf32>
    %c0_9 = arith.constant 0 : index
    %c0_10 = arith.constant 0 : index
    %c0_11 = arith.constant 0 : index
    %8 = vector.load %arg0[%c0_9, %c0_10, %c0_11] : memref<8x16x4xbf16, #tpu.memory_space<vmem>>, vector<1x16x4xbf16>
    %9 = vector.shape_cast %8 : vector<1x16x4xbf16> to vector<16x4xbf16>
    %cst_12 = arith.constant dense<0.000000e+00> : vector<16x4xf32>
    %10 = tpu.matmul %0, %9, %cst_12 {dimension_numbers = #tpu.dot_dimension_numbers<[1], [0], [0], [1], [0, 0, 1, 1], [], []>} : vector<16x16xbf16>, vector<16x4xbf16>, vector<16x4xf32> -> vector<16x4xf32>
    %11 = arith.truncf %10 : vector<16x4xf32> to vector<16x4xbf16>
    %12 = tpu.concatenate %9, %11 in 1 : vector<16x4xbf16>, vector<16x4xbf16> -> vector<16x8xbf16>
    %cst_13 = arith.constant dense<0.000000e+00> : vector<16x384xf32>
    %13 = tpu.matmul %12, %1, %cst_13 {dimension_numbers = #tpu.dot_dimension_numbers<[1], [0], [0], [1], [0, 0, 1, 1], [], []>} : vector<16x8xbf16>, vector<8x384xbf16>, vector<16x384xf32> -> vector<16x384xf32>
    %14 = arith.addf %13, %6 : vector<16x384xf32>
    %15 = arith.truncf %7 : vector<16x128xf32> to vector<16x128xbf16>
    %cst_14 = arith.constant dense<0.000000e+00> : vector<16x128xf32>
    %16 = tpu.matmul %0, %15, %cst_14 {dimension_numbers = #tpu.dot_dimension_numbers<[1], [0], [0], [1], [0, 0, 1, 1], [], []>} : vector<16x16xbf16>, vector<16x128xbf16>, vector<16x128xf32> -> vector<16x128xf32>
    %17 = arith.truncf %16 : vector<16x128xf32> to vector<16x128xbf16>
    %18 = tpu.concatenate %15, %17 in 1 : vector<16x128xbf16>, vector<16x128xbf16> -> vector<16x256xbf16>
    %cst_15 = arith.constant dense<0.000000e+00> : vector<16x256xf32>
    %19 = tpu.matmul %18, %2, %cst_15 {dimension_numbers = #tpu.dot_dimension_numbers<[1], [0], [0], [1], [0, 0, 1, 1], [], []>} : vector<16x256xbf16>, vector<256x256xbf16>, vector<16x256xf32> -> vector<16x256xf32>
    %20 = vector.extract_strided_slice %14 {offsets = [0, 0], sizes = [16, 128], strides = [1, 1]} : vector<16x384xf32> to vector<16x128xf32>
    %21 = vector.extract_strided_slice %19 {offsets = [0, 0], sizes = [16, 128], strides = [1, 1]} : vector<16x256xf32> to vector<16x128xf32>
    %22 = arith.addf %20, %21 : vector<16x128xf32>
    %23 = arith.negf %22 : vector<16x128xf32>
    %24 = math.exp %23 : vector<16x128xf32>
    %cst_16 = arith.constant 1.000000e+00 : f32
    %25 = vector.broadcast %cst_16 : f32 to vector<16x128xf32>
    %26 = arith.addf %25, %24 : vector<16x128xf32>
    %27 = arith.divf %25, %26 : vector<16x128xf32>
    %28 = vector.extract_strided_slice %14 {offsets = [0, 128], sizes = [16, 128], strides = [1, 1]} : vector<16x384xf32> to vector<16x128xf32>
    %29 = vector.extract_strided_slice %19 {offsets = [0, 128], sizes = [16, 128], strides = [1, 1]} : vector<16x256xf32> to vector<16x128xf32>
    %30 = arith.addf %28, %29 : vector<16x128xf32>
    %31 = arith.negf %30 : vector<16x128xf32>
    %32 = math.exp %31 : vector<16x128xf32>
    %cst_17 = arith.constant 1.000000e+00 : f32
    %33 = vector.broadcast %cst_17 : f32 to vector<16x128xf32>
    %34 = arith.addf %33, %32 : vector<16x128xf32>
    %35 = arith.divf %33, %34 : vector<16x128xf32>
    %36 = arith.mulf %7, %35 : vector<16x128xf32>
    %37 = arith.truncf %36 : vector<16x128xf32> to vector<16x128xbf16>
    %cst_18 = arith.constant dense<0.000000e+00> : vector<16x128xf32>
    %38 = tpu.matmul %0, %37, %cst_18 {dimension_numbers = #tpu.dot_dimension_numbers<[1], [0], [0], [1], [0, 0, 1, 1], [], []>} : vector<16x16xbf16>, vector<16x128xbf16>, vector<16x128xf32> -> vector<16x128xf32>
    %39 = arith.truncf %38 : vector<16x128xf32> to vector<16x128xbf16>
    %40 = tpu.concatenate %37, %39 in 1 : vector<16x128xbf16>, vector<16x128xbf16> -> vector<16x256xbf16>
    %cst_19 = arith.constant dense<0.000000e+00> : vector<16x128xf32>
    %41 = tpu.matmul %40, %3, %cst_19 {dimension_numbers = #tpu.dot_dimension_numbers<[1], [0], [0], [1], [0, 0, 1, 1], [], []>} : vector<16x256xbf16>, vector<256x128xbf16>, vector<16x128xf32> -> vector<16x128xf32>
    %42 = vector.extract_strided_slice %14 {offsets = [0, 256], sizes = [16, 128], strides = [1, 1]} : vector<16x384xf32> to vector<16x128xf32>
    %43 = arith.addf %42, %41 : vector<16x128xf32>
    %44 = math.tanh %43 : vector<16x128xf32>
    %45 = arith.mulf %27, %7 : vector<16x128xf32>
    %cst_20 = arith.constant 1.000000e+00 : f32
    %46 = vector.broadcast %cst_20 : f32 to vector<16x128xf32>
    %47 = arith.subf %46, %27 : vector<16x128xf32>
    %48 = arith.mulf %47, %44 : vector<16x128xf32>
    %49 = arith.addf %45, %48 : vector<16x128xf32>
    %cst_21 = arith.constant 0.000000e+00 : f32
    %50 = vector.broadcast %cst_21 : f32 to vector<16x128xf32>
    %51 = arith.maximumf %49, %50 : vector<16x128xf32>
    %52 = arith.truncf %51 : vector<16x128xf32> to vector<16x128xbf16>
    %c0_22 = arith.constant 0 : index
    %c0_23 = arith.constant 0 : index
    %53 = vector.load %arg9[%c0_22, %c0_23] : memref<128x128xbf16, #tpu.memory_space<vmem>>, vector<16x128xbf16>
    tpu.vector_store %arg9[%c0_22, %c0_23], %52 {strides = array<i32>} : memref<128x128xbf16, #tpu.memory_space<vmem>>, vector<16x128xbf16>,
    %c1 = arith.constant 1 : index
    %c0_24 = arith.constant 0 : index
    %c0_25 = arith.constant 0 : index
    %54 = vector.load %arg0[%c1, %c0_24, %c0_25] : memref<8x16x4xbf16, #tpu.memory_space<vmem>>, vector<1x16x4xbf16>
    %55 = vector.shape_cast %54 : vector<1x16x4xbf16> to vector<16x4xbf16>
    %cst_26 = arith.constant dense<0.000000e+00> : vector<16x4xf32>
    %56 = tpu.matmul %0, %55, %cst_26 {dimension_numbers = #tpu.dot_dimension_numbers<[1], [0], [0], [1], [0, 0, 1, 1], [], []>} : vector<16x16xbf16>, vector<16x4xbf16>, vector<16x4xf32> -> vector<16x4xf32>
    %57 = arith.truncf %56 : vector<16x4xf32> to vector<16x4xbf16>
    %58 = tpu.concatenate %55, %57 in 1 : vector<16x4xbf16>, vector<16x4xbf16> -> vector<16x8xbf16>
    %cst_27 = arith.constant dense<0.000000e+00> : vector<16x384xf32>
    %59 = tpu.matmul %58, %1, %cst_27 {dimension_numbers = #tpu.dot_dimension_numbers<[1], [0], [0], [1], [0, 0, 1, 1], [], []>} : vector<16x8xbf16>, vector<8x384xbf16>, vector<16x384xf32> -> vector<16x384xf32>
    %60 = arith.addf %59, %6 : vector<16x384xf32>
    %61 = arith.truncf %49 : vector<16x128xf32> to vector<16x128xbf16>
    %cst_28 = arith.constant dense<0.000000e+00> : vector<16x128xf32>
    %62 = tpu.matmul %0, %61, %cst_28 {dimension_numbers = #tpu.dot_dimension_numbers<[1], [0], [0], [1], [0, 0, 1, 1], [], []>} : vector<16x16xbf16>, vector<16x128xbf16>, vector<16x128xf32> -> vector<16x128xf32>
    %63 = arith.truncf %62 : vector<16x128xf32> to vector<16x128xbf16>
    %64 = tpu.concatenate %61, %63 in 1 : vector<16x128xbf16>, vector<16x128xbf16> -> vector<16x256xbf16>
    %cst_29 = arith.constant dense<0.000000e+00> : vector<16x256xf32>
    %65 = tpu.matmul %64, %2, %cst_29 {dimension_numbers = #tpu.dot_dimension_numbers<[1], [0], [0], [1], [0, 0, 1, 1], [], []>} : vector<16x256xbf16>, vector<256x256xbf16>, vector<16x256xf32> -> vector<16x256xf32>
    %66 = vector.extract_strided_slice %60 {offsets = [0, 0], sizes = [16, 128], strides = [1, 1]} : vector<16x384xf32> to vector<16x128xf32>
    %67 = vector.extract_strided_slice %65 {offsets = [0, 0], sizes = [16, 128], strides = [1, 1]} : vector<16x256xf32> to vector<16x128xf32>
    %68 = arith.addf %66, %67 : vector<16x128xf32>
    %69 = arith.negf %68 : vector<16x128xf32>
    %70 = math.exp %69 : vector<16x128xf32>
    %cst_30 = arith.constant 1.000000e+00 : f32
    %71 = vector.broadcast %cst_30 : f32 to vector<16x128xf32>
    %72 = arith.addf %71, %70 : vector<16x128xf32>
    %73 = arith.divf %71, %72 : vector<16x128xf32>
    %74 = vector.extract_strided_slice %60 {offsets = [0, 128], sizes = [16, 128], strides = [1, 1]} : vector<16x384xf32> to vector<16x128xf32>
    %75 = vector.extract_strided_slice %65 {offsets = [0, 128], sizes = [16, 128], strides = [1, 1]} : vector<16x256xf32> to vector<16x128xf32>
    %76 = arith.addf %74, %75 : vector<16x128xf32>
    %77 = arith.negf %76 : vector<16x128xf32>
    %78 = math.exp %77 : vector<16x128xf32>
    %cst_31 = arith.constant 1.000000e+00 : f32
    %79 = vector.broadcast %cst_31 : f32 to vector<16x128xf32>
    %80 = arith.addf %79, %78 : vector<16x128xf32>
    %81 = arith.divf %79, %80 : vector<16x128xf32>
    %82 = arith.mulf %49, %81 : vector<16x128xf32>
    %83 = arith.truncf %82 : vector<16x128xf32> to vector<16x128xbf16>
    %cst_32 = arith.constant dense<0.000000e+00> : vector<16x128xf32>
    %84 = tpu.matmul %0, %83, %cst_32 {dimension_numbers = #tpu.dot_dimension_numbers<[1], [0], [0], [1], [0, 0, 1, 1], [], []>} : vector<16x16xbf16>, vector<16x128xbf16>, vector<16x128xf32> -> vector<16x128xf32>
    %85 = arith.truncf %84 : vector<16x128xf32> to vector<16x128xbf16>
    %86 = tpu.concatenate %83, %85 in 1 : vector<16x128xbf16>, vector<16x128xbf16> -> vector<16x256xbf16>
    %cst_33 = arith.constant dense<0.000000e+00> : vector<16x128xf32>
    %87 = tpu.matmul %86, %3, %cst_33 {dimension_numbers = #tpu.dot_dimension_numbers<[1], [0], [0], [1], [0, 0, 1, 1], [], []>} : vector<16x256xbf16>, vector<256x128xbf16>, vector<16x128xf32> -> vector<16x128xf32>
    %88 = vector.extract_strided_slice %60 {offsets = [0, 256], sizes = [16, 128], strides = [1, 1]} : vector<16x384xf32> to vector<16x128xf32>
    %89 = arith.addf %88, %87 : vector<16x128xf32>
    %90 = math.tanh %89 : vector<16x128xf32>
    %91 = arith.mulf %73, %49 : vector<16x128xf32>
    %cst_34 = arith.constant 1.000000e+00 : f32
    %92 = vector.broadcast %cst_34 : f32 to vector<16x128xf32>
    %93 = arith.subf %92, %73 : vector<16x128xf32>
    %94 = arith.mulf %93, %90 : vector<16x128xf32>
    %95 = arith.addf %91, %94 : vector<16x128xf32>
    %cst_35 = arith.constant 0.000000e+00 : f32
    %96 = vector.broadcast %cst_35 : f32 to vector<16x128xf32>
    %97 = arith.maximumf %95, %96 : vector<16x128xf32>
    %98 = arith.truncf %97 : vector<16x128xf32> to vector<16x128xbf16>
    %c16 = arith.constant 16 : index
    %c0_36 = arith.constant 0 : index
    %99 = vector.load %arg9[%c16, %c0_36] : memref<128x128xbf16, #tpu.memory_space<vmem>>, vector<16x128xbf16>
    tpu.vector_store %arg9[%c16, %c0_36], %98 {strides = array<i32>} : memref<128x128xbf16, #tpu.memory_space<vmem>>, vector<16x128xbf16>,
    %c2 = arith.constant 2 : index
    %c0_37 = arith.constant 0 : index
    %c0_38 = arith.constant 0 : index
    %100 = vector.load %arg0[%c2, %c0_37, %c0_38] : memref<8x16x4xbf16, #tpu.memory_space<vmem>>, vector<1x16x4xbf16>
    %101 = vector.shape_cast %100 : vector<1x16x4xbf16> to vector<16x4xbf16>
    %cst_39 = arith.constant dense<0.000000e+00> : vector<16x4xf32>
    %102 = tpu.matmul %0, %101, %cst_39 {dimension_numbers = #tpu.dot_dimension_numbers<[1], [0], [0], [1], [0, 0, 1, 1], [], []>} : vector<16x16xbf16>, vector<16x4xbf16>, vector<16x4xf32> -> vector<16x4xf32>
    %103 = arith.truncf %102 : vector<16x4xf32> to vector<16x4xbf16>
    %104 = tpu.concatenate %101, %103 in 1 : vector<16x4xbf16>, vector<16x4xbf16> -> vector<16x8xbf16>
    %cst_40 = arith.constant dense<0.000000e+00> : vector<16x384xf32>
    %105 = tpu.matmul %104, %1, %cst_40 {dimension_numbers = #tpu.dot_dimension_numbers<[1], [0], [0], [1], [0, 0, 1, 1], [], []>} : vector<16x8xbf16>, vector<8x384xbf16>, vector<16x384xf32> -> vector<16x384xf32>
    %106 = arith.addf %105, %6 : vector<16x384xf32>
    %107 = arith.truncf %95 : vector<16x128xf32> to vector<16x128xbf16>
    %cst_41 = arith.constant dense<0.000000e+00> : vector<16x128xf32>
    %108 = tpu.matmul %0, %107, %cst_41 {dimension_numbers = #tpu.dot_dimension_numbers<[1], [0], [0], [1], [0, 0, 1, 1], [], []>} : vector<16x16xbf16>, vector<16x128xbf16>, vector<16x128xf32> -> vector<16x128xf32>
    %109 = arith.truncf %108 : vector<16x128xf32> to vector<16x128xbf16>
    %110 = tpu.concatenate %107, %109 in 1 : vector<16x128xbf16>, vector<16x128xbf16> -> vector<16x256xbf16>
    %cst_42 = arith.constant dense<0.000000e+00> : vector<16x256xf32>
    %111 = tpu.matmul %110, %2, %cst_42 {dimension_numbers = #tpu.dot_dimension_numbers<[1], [0], [0], [1], [0, 0, 1, 1], [], []>} : vector<16x256xbf16>, vector<256x256xbf16>, vector<16x256xf32> -> vector<16x256xf32>
    %112 = vector.extract_strided_slice %106 {offsets = [0, 0], sizes = [16, 128], strides = [1, 1]} : vector<16x384xf32> to vector<16x128xf32>
    %113 = vector.extract_strided_slice %111 {offsets = [0, 0], sizes = [16, 128], strides = [1, 1]} : vector<16x256xf32> to vector<16x128xf32>
    %114 = arith.addf %112, %113 : vector<16x128xf32>
    %115 = arith.negf %114 : vector<16x128xf32>
    %116 = math.exp %115 : vector<16x128xf32>
    %cst_43 = arith.constant 1.000000e+00 : f32
    %117 = vector.broadcast %cst_43 : f32 to vector<16x128xf32>
    %118 = arith.addf %117, %116 : vector<16x128xf32>
    %119 = arith.divf %117, %118 : vector<16x128xf32>
    %120 = vector.extract_strided_slice %106 {offsets = [0, 128], sizes = [16, 128], strides = [1, 1]} : vector<16x384xf32> to vector<16x128xf32>
    %121 = vector.extract_strided_slice %111 {offsets = [0, 128], sizes = [16, 128], strides = [1, 1]} : vector<16x256xf32> to vector<16x128xf32>
    %122 = arith.addf %120, %121 : vector<16x128xf32>
    %123 = arith.negf %122 : vector<16x128xf32>
    %124 = math.exp %123 : vector<16x128xf32>
    %cst_44 = arith.constant 1.000000e+00 : f32
    %125 = vector.broadcast %cst_44 : f32 to vector<16x128xf32>
    %126 = arith.addf %125, %124 : vector<16x128xf32>
    %127 = arith.divf %125, %126 : vector<16x128xf32>
    %128 = arith.mulf %95, %127 : vector<16x128xf32>
    %129 = arith.truncf %128 : vector<16x128xf32> to vector<16x128xbf16>
    %cst_45 = arith.constant dense<0.000000e+00> : vector<16x128xf32>
    %130 = tpu.matmul %0, %129, %cst_45 {dimension_numbers = #tpu.dot_dimension_numbers<[1], [0], [0], [1], [0, 0, 1, 1], [], []>} : vector<16x16xbf16>, vector<16x128xbf16>, vector<16x128xf32> -> vector<16x128xf32>
    %131 = arith.truncf %130 : vector<16x128xf32> to vector<16x128xbf16>
    %132 = tpu.concatenate %129, %131 in 1 : vector<16x128xbf16>, vector<16x128xbf16> -> vector<16x256xbf16>
    %cst_46 = arith.constant dense<0.000000e+00> : vector<16x128xf32>
    %133 = tpu.matmul %132, %3, %cst_46 {dimension_numbers = #tpu.dot_dimension_numbers<[1], [0], [0], [1], [0, 0, 1, 1], [], []>} : vector<16x256xbf16>, vector<256x128xbf16>, vector<16x128xf32> -> vector<16x128xf32>
    %134 = vector.extract_strided_slice %106 {offsets = [0, 256], sizes = [16, 128], strides = [1, 1]} : vector<16x384xf32> to vector<16x128xf32>
    %135 = arith.addf %134, %133 : vector<16x128xf32>
    %136 = math.tanh %135 : vector<16x128xf32>
    %137 = arith.mulf %119, %95 : vector<16x128xf32>
    %cst_47 = arith.constant 1.000000e+00 : f32
    %138 = vector.broadcast %cst_47 : f32 to vector<16x128xf32>
    %139 = arith.subf %138, %119 : vector<16x128xf32>
    %140 = arith.mulf %139, %136 : vector<16x128xf32>
    %141 = arith.addf %137, %140 : vector<16x128xf32>
    %cst_48 = arith.constant 0.000000e+00 : f32
    %142 = vector.broadcast %cst_48 : f32 to vector<16x128xf32>
    %143 = arith.maximumf %141, %142 : vector<16x128xf32>
    %144 = arith.truncf %143 : vector<16x128xf32> to vector<16x128xbf16>
    %c32 = arith.constant 32 : index
    %c0_49 = arith.constant 0 : index
    %145 = vector.load %arg9[%c32, %c0_49] : memref<128x128xbf16, #tpu.memory_space<vmem>>, vector<16x128xbf16>
    tpu.vector_store %arg9[%c32, %c0_49], %144 {strides = array<i32>} : memref<128x128xbf16, #tpu.memory_space<vmem>>, vector<16x128xbf16>,
    %c3 = arith.constant 3 : index
    %c0_50 = arith.constant 0 : index
    %c0_51 = arith.constant 0 : index
    %146 = vector.load %arg0[%c3, %c0_50, %c0_51] : memref<8x16x4xbf16, #tpu.memory_space<vmem>>, vector<1x16x4xbf16>
    %147 = vector.shape_cast %146 : vector<1x16x4xbf16> to vector<16x4xbf16>
    %cst_52 = arith.constant dense<0.000000e+00> : vector<16x4xf32>
    %148 = tpu.matmul %0, %147, %cst_52 {dimension_numbers = #tpu.dot_dimension_numbers<[1], [0], [0], [1], [0, 0, 1, 1], [], []>} : vector<16x16xbf16>, vector<16x4xbf16>, vector<16x4xf32> -> vector<16x4xf32>
    %149 = arith.truncf %148 : vector<16x4xf32> to vector<16x4xbf16>
    %150 = tpu.concatenate %147, %149 in 1 : vector<16x4xbf16>, vector<16x4xbf16> -> vector<16x8xbf16>
    %cst_53 = arith.constant dense<0.000000e+00> : vector<16x384xf32>
    %151 = tpu.matmul %150, %1, %cst_53 {dimension_numbers = #tpu.dot_dimension_numbers<[1], [0], [0], [1], [0, 0, 1, 1], [], []>} : vector<16x8xbf16>, vector<8x384xbf16>, vector<16x384xf32> -> vector<16x384xf32>
    %152 = arith.addf %151, %6 : vector<16x384xf32>
    %153 = arith.truncf %141 : vector<16x128xf32> to vector<16x128xbf16>
    %cst_54 = arith.constant dense<0.000000e+00> : vector<16x128xf32>
    %154 = tpu.matmul %0, %153, %cst_54 {dimension_numbers = #tpu.dot_dimension_numbers<[1], [0], [0], [1], [0, 0, 1, 1], [], []>} : vector<16x16xbf16>, vector<16x128xbf16>, vector<16x128xf32> -> vector<16x128xf32>
    %155 = arith.truncf %154 : vector<16x128xf32> to vector<16x128xbf16>
    %156 = tpu.concatenate %153, %155 in 1 : vector<16x128xbf16>, vector<16x128xbf16> -> vector<16x256xbf16>
    %cst_55 = arith.constant dense<0.000000e+00> : vector<16x256xf32>
    %157 = tpu.matmul %156, %2, %cst_55 {dimension_numbers = #tpu.dot_dimension_numbers<[1], [0], [0], [1], [0, 0, 1, 1], [], []>} : vector<16x256xbf16>, vector<256x256xbf16>, vector<16x256xf32> -> vector<16x256xf32>
    %158 = vector.extract_strided_slice %152 {offsets = [0, 0], sizes = [16, 128], strides = [1, 1]} : vector<16x384xf32> to vector<16x128xf32>
    %159 = vector.extract_strided_slice %157 {offsets = [0, 0], sizes = [16, 128], strides = [1, 1]} : vector<16x256xf32> to vector<16x128xf32>
    %160 = arith.addf %158, %159 : vector<16x128xf32>
    %161 = arith.negf %160 : vector<16x128xf32>
    %162 = math.exp %161 : vector<16x128xf32>
    %cst_56 = arith.constant 1.000000e+00 : f32
    %163 = vector.broadcast %cst_56 : f32 to vector<16x128xf32>
    %164 = arith.addf %163, %162 : vector<16x128xf32>
    %165 = arith.divf %163, %164 : vector<16x128xf32>
    %166 = vector.extract_strided_slice %152 {offsets = [0, 128], sizes = [16, 128], strides = [1, 1]} : vector<16x384xf32> to vector<16x128xf32>
    %167 = vector.extract_strided_slice %157 {offsets = [0, 128], sizes = [16, 128], strides = [1, 1]} : vector<16x256xf32> to vector<16x128xf32>
    %168 = arith.addf %166, %167 : vector<16x128xf32>
    %169 = arith.negf %168 : vector<16x128xf32>
    %170 = math.exp %169 : vector<16x128xf32>
    %cst_57 = arith.constant 1.000000e+00 : f32
    %171 = vector.broadcast %cst_57 : f32 to vector<16x128xf32>
    %172 = arith.addf %171, %170 : vector<16x128xf32>
    %173 = arith.divf %171, %172 : vector<16x128xf32>
    %174 = arith.mulf %141, %173 : vector<16x128xf32>
    %175 = arith.truncf %174 : vector<16x128xf32> to vector<16x128xbf16>
    %cst_58 = arith.constant dense<0.000000e+00> : vector<16x128xf32>
    %176 = tpu.matmul %0, %175, %cst_58 {dimension_numbers = #tpu.dot_dimension_numbers<[1], [0], [0], [1], [0, 0, 1, 1], [], []>} : vector<16x16xbf16>, vector<16x128xbf16>, vector<16x128xf32> -> vector<16x128xf32>
    %177 = arith.truncf %176 : vector<16x128xf32> to vector<16x128xbf16>
    %178 = tpu.concatenate %175, %177 in 1 : vector<16x128xbf16>, vector<16x128xbf16> -> vector<16x256xbf16>
    %cst_59 = arith.constant dense<0.000000e+00> : vector<16x128xf32>
    %179 = tpu.matmul %178, %3, %cst_59 {dimension_numbers = #tpu.dot_dimension_numbers<[1], [0], [0], [1], [0, 0, 1, 1], [], []>} : vector<16x256xbf16>, vector<256x128xbf16>, vector<16x128xf32> -> vector<16x128xf32>
    %180 = vector.extract_strided_slice %152 {offsets = [0, 256], sizes = [16, 128], strides = [1, 1]} : vector<16x384xf32> to vector<16x128xf32>
    %181 = arith.addf %180, %179 : vector<16x128xf32>
    %182 = math.tanh %181 : vector<16x128xf32>
    %183 = arith.mulf %165, %141 : vector<16x128xf32>
    %cst_60 = arith.constant 1.000000e+00 : f32
    %184 = vector.broadcast %cst_60 : f32 to vector<16x128xf32>
    %185 = arith.subf %184, %165 : vector<16x128xf32>
    %186 = arith.mulf %185, %182 : vector<16x128xf32>
    %187 = arith.addf %183, %186 : vector<16x128xf32>
    %cst_61 = arith.constant 0.000000e+00 : f32
    %188 = vector.broadcast %cst_61 : f32 to vector<16x128xf32>
    %189 = arith.maximumf %187, %188 : vector<16x128xf32>
    %190 = arith.truncf %189 : vector<16x128xf32> to vector<16x128xbf16>
    %c48 = arith.constant 48 : index
    %c0_62 = arith.constant 0 : index
    %191 = vector.load %arg9[%c48, %c0_62] : memref<128x128xbf16, #tpu.memory_space<vmem>>, vector<16x128xbf16>
    tpu.vector_store %arg9[%c48, %c0_62], %190 {strides = array<i32>} : memref<128x128xbf16, #tpu.memory_space<vmem>>, vector<16x128xbf16>,
    %c4 = arith.constant 4 : index
    %c0_63 = arith.constant 0 : index
    %c0_64 = arith.constant 0 : index
    %192 = vector.load %arg0[%c4, %c0_63, %c0_64] : memref<8x16x4xbf16, #tpu.memory_space<vmem>>, vector<1x16x4xbf16>
    %193 = vector.shape_cast %192 : vector<1x16x4xbf16> to vector<16x4xbf16>
    %cst_65 = arith.constant dense<0.000000e+00> : vector<16x4xf32>
    %194 = tpu.matmul %0, %193, %cst_65 {dimension_numbers = #tpu.dot_dimension_numbers<[1], [0], [0], [1], [0, 0, 1, 1], [], []>} : vector<16x16xbf16>, vector<16x4xbf16>, vector<16x4xf32> -> vector<16x4xf32>
    %195 = arith.truncf %194 : vector<16x4xf32> to vector<16x4xbf16>
    %196 = tpu.concatenate %193, %195 in 1 : vector<16x4xbf16>, vector<16x4xbf16> -> vector<16x8xbf16>
    %cst_66 = arith.constant dense<0.000000e+00> : vector<16x384xf32>
    %197 = tpu.matmul %196, %1, %cst_66 {dimension_numbers = #tpu.dot_dimension_numbers<[1], [0], [0], [1], [0, 0, 1, 1], [], []>} : vector<16x8xbf16>, vector<8x384xbf16>, vector<16x384xf32> -> vector<16x384xf32>
    %198 = arith.addf %197, %6 : vector<16x384xf32>
    %199 = arith.truncf %187 : vector<16x128xf32> to vector<16x128xbf16>
    %cst_67 = arith.constant dense<0.000000e+00> : vector<16x128xf32>
    %200 = tpu.matmul %0, %199, %cst_67 {dimension_numbers = #tpu.dot_dimension_numbers<[1], [0], [0], [1], [0, 0, 1, 1], [], []>} : vector<16x16xbf16>, vector<16x128xbf16>, vector<16x128xf32> -> vector<16x128xf32>
    %201 = arith.truncf %200 : vector<16x128xf32> to vector<16x128xbf16>
    %202 = tpu.concatenate %199, %201 in 1 : vector<16x128xbf16>, vector<16x128xbf16> -> vector<16x256xbf16>
    %cst_68 = arith.constant dense<0.000000e+00> : vector<16x256xf32>
    %203 = tpu.matmul %202, %2, %cst_68 {dimension_numbers = #tpu.dot_dimension_numbers<[1], [0], [0], [1], [0, 0, 1, 1], [], []>} : vector<16x256xbf16>, vector<256x256xbf16>, vector<16x256xf32> -> vector<16x256xf32>
    %204 = vector.extract_strided_slice %198 {offsets = [0, 0], sizes = [16, 128], strides = [1, 1]} : vector<16x384xf32> to vector<16x128xf32>
    %205 = vector.extract_strided_slice %203 {offsets = [0, 0], sizes = [16, 128], strides = [1, 1]} : vector<16x256xf32> to vector<16x128xf32>
    %206 = arith.addf %204, %205 : vector<16x128xf32>
    %207 = arith.negf %206 : vector<16x128xf32>
    %208 = math.exp %207 : vector<16x128xf32>
    %cst_69 = arith.constant 1.000000e+00 : f32
    %209 = vector.broadcast %cst_69 : f32 to vector<16x128xf32>
    %210 = arith.addf %209, %208 : vector<16x128xf32>
    %211 = arith.divf %209, %210 : vector<16x128xf32>
    %212 = vector.extract_strided_slice %198 {offsets = [0, 128], sizes = [16, 128], strides = [1, 1]} : vector<16x384xf32> to vector<16x128xf32>
    %213 = vector.extract_strided_slice %203 {offsets = [0, 128], sizes = [16, 128], strides = [1, 1]} : vector<16x256xf32> to vector<16x128xf32>
    %214 = arith.addf %212, %213 : vector<16x128xf32>
    %215 = arith.negf %214 : vector<16x128xf32>
    %216 = math.exp %215 : vector<16x128xf32>
    %cst_70 = arith.constant 1.000000e+00 : f32
    %217 = vector.broadcast %cst_70 : f32 to vector<16x128xf32>
    %218 = arith.addf %217, %216 : vector<16x128xf32>
    %219 = arith.divf %217, %218 : vector<16x128xf32>
    %220 = arith.mulf %187, %219 : vector<16x128xf32>
    %221 = arith.truncf %220 : vector<16x128xf32> to vector<16x128xbf16>
    %cst_71 = arith.constant dense<0.000000e+00> : vector<16x128xf32>
    %222 = tpu.matmul %0, %221, %cst_71 {dimension_numbers = #tpu.dot_dimension_numbers<[1], [0], [0], [1], [0, 0, 1, 1], [], []>} : vector<16x16xbf16>, vector<16x128xbf16>, vector<16x128xf32> -> vector<16x128xf32>
    %223 = arith.truncf %222 : vector<16x128xf32> to vector<16x128xbf16>
    %224 = tpu.concatenate %221, %223 in 1 : vector<16x128xbf16>, vector<16x128xbf16> -> vector<16x256xbf16>
    %cst_72 = arith.constant dense<0.000000e+00> : vector<16x128xf32>
    %225 = tpu.matmul %224, %3, %cst_72 {dimension_numbers = #tpu.dot_dimension_numbers<[1], [0], [0], [1], [0, 0, 1, 1], [], []>} : vector<16x256xbf16>, vector<256x128xbf16>, vector<16x128xf32> -> vector<16x128xf32>
    %226 = vector.extract_strided_slice %198 {offsets = [0, 256], sizes = [16, 128], strides = [1, 1]} : vector<16x384xf32> to vector<16x128xf32>
    %227 = arith.addf %226, %225 : vector<16x128xf32>
    %228 = math.tanh %227 : vector<16x128xf32>
    %229 = arith.mulf %211, %187 : vector<16x128xf32>
    %cst_73 = arith.constant 1.000000e+00 : f32
    %230 = vector.broadcast %cst_73 : f32 to vector<16x128xf32>
    %231 = arith.subf %230, %211 : vector<16x128xf32>
    %232 = arith.mulf %231, %228 : vector<16x128xf32>
    %233 = arith.addf %229, %232 : vector<16x128xf32>
    %cst_74 = arith.constant 0.000000e+00 : f32
    %234 = vector.broadcast %cst_74 : f32 to vector<16x128xf32>
    %235 = arith.maximumf %233, %234 : vector<16x128xf32>
    %236 = arith.truncf %235 : vector<16x128xf32> to vector<16x128xbf16>
    %c64 = arith.constant 64 : index
    %c0_75 = arith.constant 0 : index
    %237 = vector.load %arg9[%c64, %c0_75] : memref<128x128xbf16, #tpu.memory_space<vmem>>, vector<16x128xbf16>
    tpu.vector_store %arg9[%c64, %c0_75], %236 {strides = array<i32>} : memref<128x128xbf16, #tpu.memory_space<vmem>>, vector<16x128xbf16>,
    %c5 = arith.constant 5 : index
    %c0_76 = arith.constant 0 : index
    %c0_77 = arith.constant 0 : index
    %238 = vector.load %arg0[%c5, %c0_76, %c0_77] : memref<8x16x4xbf16, #tpu.memory_space<vmem>>, vector<1x16x4xbf16>
    %239 = vector.shape_cast %238 : vector<1x16x4xbf16> to vector<16x4xbf16>
    %cst_78 = arith.constant dense<0.000000e+00> : vector<16x4xf32>
    %240 = tpu.matmul %0, %239, %cst_78 {dimension_numbers = #tpu.dot_dimension_numbers<[1], [0], [0], [1], [0, 0, 1, 1], [], []>} : vector<16x16xbf16>, vector<16x4xbf16>, vector<16x4xf32> -> vector<16x4xf32>
    %241 = arith.truncf %240 : vector<16x4xf32> to vector<16x4xbf16>
    %242 = tpu.concatenate %239, %241 in 1 : vector<16x4xbf16>, vector<16x4xbf16> -> vector<16x8xbf16>
    %cst_79 = arith.constant dense<0.000000e+00> : vector<16x384xf32>
    %243 = tpu.matmul %242, %1, %cst_79 {dimension_numbers = #tpu.dot_dimension_numbers<[1], [0], [0], [1], [0, 0, 1, 1], [], []>} : vector<16x8xbf16>, vector<8x384xbf16>, vector<16x384xf32> -> vector<16x384xf32>
    %244 = arith.addf %243, %6 : vector<16x384xf32>
    %245 = arith.truncf %233 : vector<16x128xf32> to vector<16x128xbf16>
    %cst_80 = arith.constant dense<0.000000e+00> : vector<16x128xf32>
    %246 = tpu.matmul %0, %245, %cst_80 {dimension_numbers = #tpu.dot_dimension_numbers<[1], [0], [0], [1], [0, 0, 1, 1], [], []>} : vector<16x16xbf16>, vector<16x128xbf16>, vector<16x128xf32> -> vector<16x128xf32>
    %247 = arith.truncf %246 : vector<16x128xf32> to vector<16x128xbf16>
    %248 = tpu.concatenate %245, %247 in 1 : vector<16x128xbf16>, vector<16x128xbf16> -> vector<16x256xbf16>
    %cst_81 = arith.constant dense<0.000000e+00> : vector<16x256xf32>
    %249 = tpu.matmul %248, %2, %cst_81 {dimension_numbers = #tpu.dot_dimension_numbers<[1], [0], [0], [1], [0, 0, 1, 1], [], []>} : vector<16x256xbf16>, vector<256x256xbf16>, vector<16x256xf32> -> vector<16x256xf32>
    %250 = vector.extract_strided_slice %244 {offsets = [0, 0], sizes = [16, 128], strides = [1, 1]} : vector<16x384xf32> to vector<16x128xf32>
    %251 = vector.extract_strided_slice %249 {offsets = [0, 0], sizes = [16, 128], strides = [1, 1]} : vector<16x256xf32> to vector<16x128xf32>
    %252 = arith.addf %250, %251 : vector<16x128xf32>
    %253 = arith.negf %252 : vector<16x128xf32>
    %254 = math.exp %253 : vector<16x128xf32>
    %cst_82 = arith.constant 1.000000e+00 : f32
    %255 = vector.broadcast %cst_82 : f32 to vector<16x128xf32>
    %256 = arith.addf %255, %254 : vector<16x128xf32>
    %257 = arith.divf %255, %256 : vector<16x128xf32>
    %258 = vector.extract_strided_slice %244 {offsets = [0, 128], sizes = [16, 128], strides = [1, 1]} : vector<16x384xf32> to vector<16x128xf32>
    %259 = vector.extract_strided_slice %249 {offsets = [0, 128], sizes = [16, 128], strides = [1, 1]} : vector<16x256xf32> to vector<16x128xf32>
    %260 = arith.addf %258, %259 : vector<16x128xf32>
    %261 = arith.negf %260 : vector<16x128xf32>
    %262 = math.exp %261 : vector<16x128xf32>
    %cst_83 = arith.constant 1.000000e+00 : f32
    %263 = vector.broadcast %cst_83 : f32 to vector<16x128xf32>
    %264 = arith.addf %263, %262 : vector<16x128xf32>
    %265 = arith.divf %263, %264 : vector<16x128xf32>
    %266 = arith.mulf %233, %265 : vector<16x128xf32>
    %267 = arith.truncf %266 : vector<16x128xf32> to vector<16x128xbf16>
    %cst_84 = arith.constant dense<0.000000e+00> : vector<16x128xf32>
    %268 = tpu.matmul %0, %267, %cst_84 {dimension_numbers = #tpu.dot_dimension_numbers<[1], [0], [0], [1], [0, 0, 1, 1], [], []>} : vector<16x16xbf16>, vector<16x128xbf16>, vector<16x128xf32> -> vector<16x128xf32>
    %269 = arith.truncf %268 : vector<16x128xf32> to vector<16x128xbf16>
    %270 = tpu.concatenate %267, %269 in 1 : vector<16x128xbf16>, vector<16x128xbf16> -> vector<16x256xbf16>
    %cst_85 = arith.constant dense<0.000000e+00> : vector<16x128xf32>
    %271 = tpu.matmul %270, %3, %cst_85 {dimension_numbers = #tpu.dot_dimension_numbers<[1], [0], [0], [1], [0, 0, 1, 1], [], []>} : vector<16x256xbf16>, vector<256x128xbf16>, vector<16x128xf32> -> vector<16x128xf32>
    %272 = vector.extract_strided_slice %244 {offsets = [0, 256], sizes = [16, 128], strides = [1, 1]} : vector<16x384xf32> to vector<16x128xf32>
    %273 = arith.addf %272, %271 : vector<16x128xf32>
    %274 = math.tanh %273 : vector<16x128xf32>
    %275 = arith.mulf %257, %233 : vector<16x128xf32>
    %cst_86 = arith.constant 1.000000e+00 : f32
    %276 = vector.broadcast %cst_86 : f32 to vector<16x128xf32>
    %277 = arith.subf %276, %257 : vector<16x128xf32>
    %278 = arith.mulf %277, %274 : vector<16x128xf32>
    %279 = arith.addf %275, %278 : vector<16x128xf32>
    %cst_87 = arith.constant 0.000000e+00 : f32
    %280 = vector.broadcast %cst_87 : f32 to vector<16x128xf32>
    %281 = arith.maximumf %279, %280 : vector<16x128xf32>
    %282 = arith.truncf %281 : vector<16x128xf32> to vector<16x128xbf16>
    %c80 = arith.constant 80 : index
    %c0_88 = arith.constant 0 : index
    %283 = vector.load %arg9[%c80, %c0_88] : memref<128x128xbf16, #tpu.memory_space<vmem>>, vector<16x128xbf16>
    tpu.vector_store %arg9[%c80, %c0_88], %282 {strides = array<i32>} : memref<128x128xbf16, #tpu.memory_space<vmem>>, vector<16x128xbf16>,
    %c6 = arith.constant 6 : index
    %c0_89 = arith.constant 0 : index
    %c0_90 = arith.constant 0 : index
    %284 = vector.load %arg0[%c6, %c0_89, %c0_90] : memref<8x16x4xbf16, #tpu.memory_space<vmem>>, vector<1x16x4xbf16>
    %285 = vector.shape_cast %284 : vector<1x16x4xbf16> to vector<16x4xbf16>
    %cst_91 = arith.constant dense<0.000000e+00> : vector<16x4xf32>
    %286 = tpu.matmul %0, %285, %cst_91 {dimension_numbers = #tpu.dot_dimension_numbers<[1], [0], [0], [1], [0, 0, 1, 1], [], []>} : vector<16x16xbf16>, vector<16x4xbf16>, vector<16x4xf32> -> vector<16x4xf32>
    %287 = arith.truncf %286 : vector<16x4xf32> to vector<16x4xbf16>
    %288 = tpu.concatenate %285, %287 in 1 : vector<16x4xbf16>, vector<16x4xbf16> -> vector<16x8xbf16>
    %cst_92 = arith.constant dense<0.000000e+00> : vector<16x384xf32>
    %289 = tpu.matmul %288, %1, %cst_92 {dimension_numbers = #tpu.dot_dimension_numbers<[1], [0], [0], [1], [0, 0, 1, 1], [], []>} : vector<16x8xbf16>, vector<8x384xbf16>, vector<16x384xf32> -> vector<16x384xf32>
    %290 = arith.addf %289, %6 : vector<16x384xf32>
    %291 = arith.truncf %279 : vector<16x128xf32> to vector<16x128xbf16>
    %cst_93 = arith.constant dense<0.000000e+00> : vector<16x128xf32>
    %292 = tpu.matmul %0, %291, %cst_93 {dimension_numbers = #tpu.dot_dimension_numbers<[1], [0], [0], [1], [0, 0, 1, 1], [], []>} : vector<16x16xbf16>, vector<16x128xbf16>, vector<16x128xf32> -> vector<16x128xf32>
    %293 = arith.truncf %292 : vector<16x128xf32> to vector<16x128xbf16>
    %294 = tpu.concatenate %291, %293 in 1 : vector<16x128xbf16>, vector<16x128xbf16> -> vector<16x256xbf16>
    %cst_94 = arith.constant dense<0.000000e+00> : vector<16x256xf32>
    %295 = tpu.matmul %294, %2, %cst_94 {dimension_numbers = #tpu.dot_dimension_numbers<[1], [0], [0], [1], [0, 0, 1, 1], [], []>} : vector<16x256xbf16>, vector<256x256xbf16>, vector<16x256xf32> -> vector<16x256xf32>
    %296 = vector.extract_strided_slice %290 {offsets = [0, 0], sizes = [16, 128], strides = [1, 1]} : vector<16x384xf32> to vector<16x128xf32>
    %297 = vector.extract_strided_slice %295 {offsets = [0, 0], sizes = [16, 128], strides = [1, 1]} : vector<16x256xf32> to vector<16x128xf32>
    %298 = arith.addf %296, %297 : vector<16x128xf32>
    %299 = arith.negf %298 : vector<16x128xf32>
    %300 = math.exp %299 : vector<16x128xf32>
    %cst_95 = arith.constant 1.000000e+00 : f32
    %301 = vector.broadcast %cst_95 : f32 to vector<16x128xf32>
    %302 = arith.addf %301, %300 : vector<16x128xf32>
    %303 = arith.divf %301, %302 : vector<16x128xf32>
    %304 = vector.extract_strided_slice %290 {offsets = [0, 128], sizes = [16, 128], strides = [1, 1]} : vector<16x384xf32> to vector<16x128xf32>
    %305 = vector.extract_strided_slice %295 {offsets = [0, 128], sizes = [16, 128], strides = [1, 1]} : vector<16x256xf32> to vector<16x128xf32>
    %306 = arith.addf %304, %305 : vector<16x128xf32>
    %307 = arith.negf %306 : vector<16x128xf32>
    %308 = math.exp %307 : vector<16x128xf32>
    %cst_96 = arith.constant 1.000000e+00 : f32
    %309 = vector.broadcast %cst_96 : f32 to vector<16x128xf32>
    %310 = arith.addf %309, %308 : vector<16x128xf32>
    %311 = arith.divf %309, %310 : vector<16x128xf32>
    %312 = arith.mulf %279, %311 : vector<16x128xf32>
    %313 = arith.truncf %312 : vector<16x128xf32> to vector<16x128xbf16>
    %cst_97 = arith.constant dense<0.000000e+00> : vector<16x128xf32>
    %314 = tpu.matmul %0, %313, %cst_97 {dimension_numbers = #tpu.dot_dimension_numbers<[1], [0], [0], [1], [0, 0, 1, 1], [], []>} : vector<16x16xbf16>, vector<16x128xbf16>, vector<16x128xf32> -> vector<16x128xf32>
    %315 = arith.truncf %314 : vector<16x128xf32> to vector<16x128xbf16>
    %316 = tpu.concatenate %313, %315 in 1 : vector<16x128xbf16>, vector<16x128xbf16> -> vector<16x256xbf16>
    %cst_98 = arith.constant dense<0.000000e+00> : vector<16x128xf32>
    %317 = tpu.matmul %316, %3, %cst_98 {dimension_numbers = #tpu.dot_dimension_numbers<[1], [0], [0], [1], [0, 0, 1, 1], [], []>} : vector<16x256xbf16>, vector<256x128xbf16>, vector<16x128xf32> -> vector<16x128xf32>
    %318 = vector.extract_strided_slice %290 {offsets = [0, 256], sizes = [16, 128], strides = [1, 1]} : vector<16x384xf32> to vector<16x128xf32>
    %319 = arith.addf %318, %317 : vector<16x128xf32>
    %320 = math.tanh %319 : vector<16x128xf32>
    %321 = arith.mulf %303, %279 : vector<16x128xf32>
    %cst_99 = arith.constant 1.000000e+00 : f32
    %322 = vector.broadcast %cst_99 : f32 to vector<16x128xf32>
    %323 = arith.subf %322, %303 : vector<16x128xf32>
    %324 = arith.mulf %323, %320 : vector<16x128xf32>
    %325 = arith.addf %321, %324 : vector<16x128xf32>
    %cst_100 = arith.constant 0.000000e+00 : f32
    %326 = vector.broadcast %cst_100 : f32 to vector<16x128xf32>
    %327 = arith.maximumf %325, %326 : vector<16x128xf32>
    %328 = arith.truncf %327 : vector<16x128xf32> to vector<16x128xbf16>
    %c96 = arith.constant 96 : index
    %c0_101 = arith.constant 0 : index
    %329 = vector.load %arg9[%c96, %c0_101] : memref<128x128xbf16, #tpu.memory_space<vmem>>, vector<16x128xbf16>
    tpu.vector_store %arg9[%c96, %c0_101], %328 {strides = array<i32>} : memref<128x128xbf16, #tpu.memory_space<vmem>>, vector<16x128xbf16>,
    %c7 = arith.constant 7 : index
    %c0_102 = arith.constant 0 : index
    %c0_103 = arith.constant 0 : index
    %330 = vector.load %arg0[%c7, %c0_102, %c0_103] : memref<8x16x4xbf16, #tpu.memory_space<vmem>>, vector<1x16x4xbf16>
    %331 = vector.shape_cast %330 : vector<1x16x4xbf16> to vector<16x4xbf16>
    %cst_104 = arith.constant dense<0.000000e+00> : vector<16x4xf32>
    %332 = tpu.matmul %0, %331, %cst_104 {dimension_numbers = #tpu.dot_dimension_numbers<[1], [0], [0], [1], [0, 0, 1, 1], [], []>} : vector<16x16xbf16>, vector<16x4xbf16>, vector<16x4xf32> -> vector<16x4xf32>
    %333 = arith.truncf %332 : vector<16x4xf32> to vector<16x4xbf16>
    %334 = tpu.concatenate %331, %333 in 1 : vector<16x4xbf16>, vector<16x4xbf16> -> vector<16x8xbf16>
    %cst_105 = arith.constant dense<0.000000e+00> : vector<16x384xf32>
    %335 = tpu.matmul %334, %1, %cst_105 {dimension_numbers = #tpu.dot_dimension_numbers<[1], [0], [0], [1], [0, 0, 1, 1], [], []>} : vector<16x8xbf16>, vector<8x384xbf16>, vector<16x384xf32> -> vector<16x384xf32>
    %336 = arith.addf %335, %6 : vector<16x384xf32>
    %337 = arith.truncf %325 : vector<16x128xf32> to vector<16x128xbf16>
    %cst_106 = arith.constant dense<0.000000e+00> : vector<16x128xf32>
    %338 = tpu.matmul %0, %337, %cst_106 {dimension_numbers = #tpu.dot_dimension_numbers<[1], [0], [0], [1], [0, 0, 1, 1], [], []>} : vector<16x16xbf16>, vector<16x128xbf16>, vector<16x128xf32> -> vector<16x128xf32>
    %339 = arith.truncf %338 : vector<16x128xf32> to vector<16x128xbf16>
    %340 = tpu.concatenate %337, %339 in 1 : vector<16x128xbf16>, vector<16x128xbf16> -> vector<16x256xbf16>
    %cst_107 = arith.constant dense<0.000000e+00> : vector<16x256xf32>
    %341 = tpu.matmul %340, %2, %cst_107 {dimension_numbers = #tpu.dot_dimension_numbers<[1], [0], [0], [1], [0, 0, 1, 1], [], []>} : vector<16x256xbf16>, vector<256x256xbf16>, vector<16x256xf32> -> vector<16x256xf32>
    %342 = vector.extract_strided_slice %336 {offsets = [0, 0], sizes = [16, 128], strides = [1, 1]} : vector<16x384xf32> to vector<16x128xf32>
    %343 = vector.extract_strided_slice %341 {offsets = [0, 0], sizes = [16, 128], strides = [1, 1]} : vector<16x256xf32> to vector<16x128xf32>
    %344 = arith.addf %342, %343 : vector<16x128xf32>
    %345 = arith.negf %344 : vector<16x128xf32>
    %346 = math.exp %345 : vector<16x128xf32>
    %cst_108 = arith.constant 1.000000e+00 : f32
    %347 = vector.broadcast %cst_108 : f32 to vector<16x128xf32>
    %348 = arith.addf %347, %346 : vector<16x128xf32>
    %349 = arith.divf %347, %348 : vector<16x128xf32>
    %350 = vector.extract_strided_slice %336 {offsets = [0, 128], sizes = [16, 128], strides = [1, 1]} : vector<16x384xf32> to vector<16x128xf32>
    %351 = vector.extract_strided_slice %341 {offsets = [0, 128], sizes = [16, 128], strides = [1, 1]} : vector<16x256xf32> to vector<16x128xf32>
    %352 = arith.addf %350, %351 : vector<16x128xf32>
    %353 = arith.negf %352 : vector<16x128xf32>
    %354 = math.exp %353 : vector<16x128xf32>
    %cst_109 = arith.constant 1.000000e+00 : f32
    %355 = vector.broadcast %cst_109 : f32 to vector<16x128xf32>
    %356 = arith.addf %355, %354 : vector<16x128xf32>
    %357 = arith.divf %355, %356 : vector<16x128xf32>
    %358 = arith.mulf %325, %357 : vector<16x128xf32>
    %359 = arith.truncf %358 : vector<16x128xf32> to vector<16x128xbf16>
    %cst_110 = arith.constant dense<0.000000e+00> : vector<16x128xf32>
    %360 = tpu.matmul %0, %359, %cst_110 {dimension_numbers = #tpu.dot_dimension_numbers<[1], [0], [0], [1], [0, 0, 1, 1], [], []>} : vector<16x16xbf16>, vector<16x128xbf16>, vector<16x128xf32> -> vector<16x128xf32>
    %361 = arith.truncf %360 : vector<16x128xf32> to vector<16x128xbf16>
    %362 = tpu.concatenate %359, %361 in 1 : vector<16x128xbf16>, vector<16x128xbf16> -> vector<16x256xbf16>
    %cst_111 = arith.constant dense<0.000000e+00> : vector<16x128xf32>
    %363 = tpu.matmul %362, %3, %cst_111 {dimension_numbers = #tpu.dot_dimension_numbers<[1], [0], [0], [1], [0, 0, 1, 1], [], []>} : vector<16x256xbf16>, vector<256x128xbf16>, vector<16x128xf32> -> vector<16x128xf32>
    %364 = vector.extract_strided_slice %336 {offsets = [0, 256], sizes = [16, 128], strides = [1, 1]} : vector<16x384xf32> to vector<16x128xf32>
    %365 = arith.addf %364, %363 : vector<16x128xf32>
    %366 = math.tanh %365 : vector<16x128xf32>
    %367 = arith.mulf %349, %325 : vector<16x128xf32>
    %cst_112 = arith.constant 1.000000e+00 : f32
    %368 = vector.broadcast %cst_112 : f32 to vector<16x128xf32>
    %369 = arith.subf %368, %349 : vector<16x128xf32>
    %370 = arith.mulf %369, %366 : vector<16x128xf32>
    %371 = arith.addf %367, %370 : vector<16x128xf32>
    %cst_113 = arith.constant 0.000000e+00 : f32
    %372 = vector.broadcast %cst_113 : f32 to vector<16x128xf32>
    %373 = arith.maximumf %371, %372 : vector<16x128xf32>
    %374 = arith.truncf %373 : vector<16x128xf32> to vector<16x128xbf16>
    %c112 = arith.constant 112 : index
    %c0_114 = arith.constant 0 : index
    %375 = vector.load %arg9[%c112, %c0_114] : memref<128x128xbf16, #tpu.memory_space<vmem>>, vector<16x128xbf16>
    tpu.vector_store %arg9[%c112, %c0_114], %374 {strides = array<i32>} : memref<128x128xbf16, #tpu.memory_space<vmem>>, vector<16x128xbf16>,
    %c0_115 = arith.constant 0 : index
    %c0_116 = arith.constant 0 : index
    %376 = vector.load %arg9[%c0_115, %c0_116] : memref<128x128xbf16, #tpu.memory_space<vmem>>, vector<128x128xbf16>
    %c0_117 = arith.constant 0 : index
    %c0_118 = arith.constant 0 : index
    %377 = vector.load %arg6[%c0_117, %c0_118] : memref<128x128xbf16, #tpu.memory_space<vmem>>, vector<128x128xbf16>
    %cst_119 = arith.constant dense<0.000000e+00> : vector<128x128xf32>
    %378 = tpu.matmul %376, %377, %cst_119 {dimension_numbers = #tpu.dot_dimension_numbers<[1], [0], [0], [1], [0, 0, 1, 1], [], []>} : vector<128x128xbf16>, vector<128x128xbf16>, vector<128x128xf32> -> vector<128x128xf32>
    %c0_120 = arith.constant 0 : index
    %c0_121 = arith.constant 0 : index
    %379 = vector.load %arg7[%c0_120, %c0_121] : memref<1x128xf32, #tpu.memory_space<vmem>>, vector<1x128xf32>
    %380 = vector.broadcast %379 : vector<1x128xf32> to vector<128x128xf32>
    %381 = arith.addf %378, %380 : vector<128x128xf32>
    %c0_122 = arith.constant 0 : index
    %c0_123 = arith.constant 0 : index
    %382 = vector.load %arg8[%c0_122, %c0_123] : memref<128x128xf32, #tpu.memory_space<vmem>>, vector<128x128xf32>
    tpu.vector_store %arg8[%c0_122, %c0_123], %381 {strides = array<i32>} : memref<128x128xf32, #tpu.memory_space<vmem>>, vector<128x128xf32>,
    return
  }
}

</mosaic_0001>

<bundles_post_ra>
// kernel: gcrn_forward.1
= control target key start
LH: loop header
LB: loop body
LE: loop exit
PB: predicated region body
PF: predicated region fallthrough
CT: control target
= control target key end

     0   :  { %v6084_v0 = vmov 0.0   ;;  %vm4504_vm0 = vmmov 0   ;;  %vm128_vm1 = vcmask 130048   ;;  %v6064_v3 = vmov 0   ;;  %s4506_s9 = smov 4   ;;  %s6055_s0 = inlined_call_operand.vmem [shape: bf16[8,16,4], index: 0, kind: input, shape index: {}]   ;;  %s6056_s1 = inlined_call_operand.vmem [shape: bf16[16,16], index: 1, kind: input, shape index: {}]   ;;  %s6057_s4 = inlined_call_operand.vmem [shape: bf16[256,256], index: 4, kind: input, shape index: {}]   ;;  %s6058_s2 = inlined_call_operand.vmem [shape: bf16[8,384], index: 2, kind: input, shape index: {}]   ;;  %s6059_s5 = inlined_call_operand.vmem [shape: bf16[256,128], index: 5, kind: input, shape index: {}]   ;;  %s6060_s3 = inlined_call_operand.vmem [shape: f32[1,384], index: 3, kind: input, shape index: {}]   ;;  %s6061_s6 = inlined_call_operand.vmem [shape: bf16[128,128], index: 6, kind: input, shape index: {}]   ;;  %s6062_s7 = inlined_call_operand.vmem [shape: f32[1,128], index: 7, kind: input, shape index: {}]   ;;  %s6063_s8 = inlined_call_operand.vmem [shape: f32[128,128], index: 8, kind: output, shape index: {}]  }
   0x1   :  { %3885 = vmatprep.subr.bf16.mxu0 %v6084_v0  ;;  %v4556_v1 = vld [vmem:[%s6055_s0] sm:$0xff]   ;;  %3887 = vmatprep.mubr.msk.bf16.mxu0 %vm4504_vm0, %v6084_v0  ;;  %v4589_v6 = vld [vmem:[%s6057_s4 + $0x14] ss:$8 sps:$4 sm:$0xff]   ;;  %v4595_v7 = vld [vmem:[%s6057_s4 + $0x10] ss:$8 sps:$4 sm:$0xff]   ;;  %vm192_vm2 = vcmask 1043456   ;;  %v100_v58 = vlaneseq }
   0x2   :  { %v4563_v2 = vld [vmem:[%s6056_s1] sm:$0xff]   ;;  %3897 = vmatprep.subr.bf16.mxu1 %v6084_v0  ;;  %3899 = vmatprep.mubr.msk.bf16.mxu1 %vm4504_vm0, %v6084_v0  ;;  %v4613_v10 = vld [vmem:[%s6057_s4 + $0x34] ss:$8 sps:$4 sm:$0xff]   ;;  %v4619_v11 = vld [vmem:[%s6057_s4 + $0x30] ss:$8 sps:$4 sm:$0xff]   ;;  %vm177_vm3 = vcmask 31744  }
   0x3   :  { %3886 = vmatpush3.bf16.msra.mxu0 %v4556_v1  ;;  %3898 = vmatpush3.bf16.msra.mxu1 %v6064_v3  ;;  %v4578_v4 = vld [vmem:[%s6057_s4 + $0x4] ss:$8 sps:$4 sm:$0xff]   ;;  %v4583_v5 = vld [vmem:[%s6057_s4] ss:$8 sps:$4 sm:$0xff]   ;;  %v4637_v14 = vld [vmem:[%s6057_s4 + $0x54] ss:$8 sps:$4 sm:$0xff]  }
   0x4   :  { %488 = vmatprep.subr.bf16.mxu1 %v4578_v4  ;;  %v4601_v8 = vld [vmem:[%s6057_s4 + $0x24] ss:$8 sps:$4 sm:$0xff]   ;;  %v4607_v9 = vld [vmem:[%s6057_s4 + $0x20] ss:$8 sps:$4 sm:$0xff]   ;;  %v4643_v15 = vld [vmem:[%s6057_s4 + $0x50] ss:$8 sps:$4 sm:$0xff]  }
   0x5   :  { %v4625_v12 = vld [vmem:[%s6057_s4 + $0x44] ss:$8 sps:$4 sm:$0xff]   ;;  %v4631_v13 = vld [vmem:[%s6057_s4 + $0x40] ss:$8 sps:$4 sm:$0xff]   ;;  %v4666_v21 = vld [vmem:[%s6057_s4 + $0x74] ss:$8 sps:$4 sm:$0xff]  }
   0x6   :  { %3888 = vmatmul.mubr.msk.bf16.vlgmr.msra.gmra.mrb[0].mxu0 %vm128_vm1, %v4563_v2  ;;  %3900 = vmatmul.mubr.msk.bf16.vlgmr.msra.gmra.mrb[0].mxu1 %vm128_vm1, %v4563_v2  ;;  %v4649_v16 = vld [vmem:[%s6057_s4 + $0x64] ss:$8 sps:$4 sm:$0xff]   ;;  %v4660_v20 = vld [vmem:[%s6057_s4 + $0x60] ss:$8 sps:$4 sm:$0xff]   ;;  %v4679_v23 = vld [vmem:[%s6057_s4 + $0x70] ss:$8 sps:$4 sm:$0xff]  }
   0x7   :  { %234 = vmatprep.mubr.bf16.mxu0 %v6064_v3  ;;  %489 = vmatpush1.bf16.msra.mxu1 %v4583_v5  ;;  %v32_v17 = vld [vmem:[%s6058_s2] sm:$0xff]  ;;  %v4697_v26 = vld [vmem:[%s6057_s4 + $0x94] ss:$8 sps:$4 sm:$0xff]   ;;  %v4703_v27 = vld [vmem:[%s6057_s4 + $0x90] ss:$8 sps:$4 sm:$0xff]   ;;  %vm189_vm4 = vcmask 64512  }
   0x8   :  { %490 = vmatprep.subr.bf16.mxu1 %v4589_v6  ;;  %v4654_v18 = vcombine.high %v32_v17, %v32_v17  ;;  %v3469_v19 = vcombine.low %v32_v17, %v32_v17  ;;  %v4685_v24 = vld [vmem:[%s6057_s4 + $0x84] ss:$8 sps:$4 sm:$0xff]   ;;  %v4691_v25 = vld [vmem:[%s6057_s4 + $0x80] ss:$8 sps:$4 sm:$0xff]   ;;  %v4721_v30 = vld [vmem:[%s6057_s4 + $0xb4] ss:$8 sps:$4 sm:$0xff]  }
   0x9   :  { %v4709_v28 = vld [vmem:[%s6057_s4 + $0xa4] ss:$8 sps:$4 sm:$0xff]   ;;  %v4715_v29 = vld [vmem:[%s6057_s4 + $0xa0] ss:$8 sps:$4 sm:$0xff]   ;;  %v4727_v31 = vld [vmem:[%s6057_s4 + $0xb0] ss:$8 sps:$4 sm:$0xff]  }
   0xa   :  { %6162 = vst [vmem:[#allocation3_spill] sm:$0xff] %v4654_v18  ;;  %3472 = vmatprep.subr.msk.bf16.mxu0 %vm192_vm2, %v4654_v18  ;;  %v4671_v22 = vsel %vm192_vm2, %v3469_v19, 0  ;;  %v4733_v32 = vld [vmem:[%s6057_s4 + $0xc4] ss:$8 sps:$4 sm:$0xff]   ;;  %v4739_v33 = vld [vmem:[%s6057_s4 + $0xc0] ss:$8 sps:$4 sm:$0xff]  }
   0xb   :  { %491 = vmatpush1.bf16.msra.mxu1 %v4595_v7  ;;  %6163 = vst [vmem:[#allocation4_spill] sm:$0xff] %v4671_v22  ;;  %203 = vmatpush1.bf16.msra.mxu0 %v4671_v22  ;;  %v4745_v34 = vld [vmem:[%s6057_s4 + $0xd4] ss:$8 sps:$4 sm:$0xff]   ;;  %v4751_v35 = vld [vmem:[%s6057_s4 + $0xd0] ss:$8 sps:$4 sm:$0xff]   ;;  %v4800_v59 = vshrl.u32 %v100_v58, 7 }
   0xc   :  { %492 = vmatprep.subr.bf16.mxu1 %v4601_v8  ;;  %3891 = vmatprep.subr.bf16.mxu0 %v6084_v0  ;;  %v4757_v36 = vld [vmem:[%s6057_s4 + $0xe4] ss:$8 sps:$4 sm:$0xff]   ;;  %v4763_v37 = vld [vmem:[%s6057_s4 + $0xe0] ss:$8 sps:$4 sm:$0xff]   ;;  %v4769_v38 = vld [vmem:[%s6057_s4 + $0xf4] ss:$8 sps:$4 sm:$0xff]  }
   0xd   :  { %v4775_v39 = vld [vmem:[%s6057_s4 + $0xf0] ss:$8 sps:$4 sm:$0xff]   ;;  %v4229_v50 = vld [vmem:[%s6058_s2 + $0x8] ss:$0 sps:$4 sm:$0xff]   ;;  %v102_v60 = vsub.s32 0, %v4800_v59  ;;  %v106_v62 = vsub.s32 1, %v4800_v59 }
   0xe   :  { %v4788_v52 = vsel %vm192_vm2, %v4229_v50, 0  ;;  %v4806_v61 = vld [vmem:[%s6060_s3] sm:$0x7] }
   0xf   :  { %493 = vmatpush1.bf16.msra.mxu1 %v4607_v9  ;;  %v4810_v63 = vrot.slane %v4806_v61, %v102_v60 }
  0x10   :  { %494 = vmatprep.subr.bf16.mxu1 %v4613_v10 }
  0x11   :  { %6164 = vst [vmem:[#allocation5_spill] sm:$0xff] %v4810_v63 }
  0x13   :  { %495 = vmatpush1.bf16.msra.mxu1 %v4619_v11 }
  0x14   :  { %496 = vmatprep.subr.bf16.mxu1 %v4625_v12 }
  0x17   :  { %497 = vmatpush1.bf16.msra.mxu1 %v4631_v13 }
  0x18   :  { %498 = vmatprep.subr.bf16.mxu1 %v4637_v14 }
  0x1b   :  { %499 = vmatpush1.bf16.msra.mxu1 %v4643_v15 }
  0x1c   :  { %500 = vmatprep.subr.bf16.mxu1 %v4649_v16 }
  0x1f   :  { %501 = vmatpush1.bf16.msra.mxu1 %v4660_v20 }
  0x20   :  { %502 = vmatprep.subr.bf16.mxu1 %v4666_v21 }
  0x23   :  { %503 = vmatpush1.bf16.msra.mxu1 %v4679_v23 }
  0x24   :  { %504 = vmatprep.subr.bf16.mxu1 %v4685_v24 }
  0x27   :  { %505 = vmatpush1.bf16.msra.mxu1 %v4691_v25 }
  0x28   :  { %506 = vmatprep.subr.bf16.mxu1 %v4697_v26 }
  0x2b   :  { %507 = vmatpush1.bf16.msra.mxu1 %v4703_v27 }
  0x2c   :  { %508 = vmatprep.subr.bf16.mxu1 %v4709_v28 }
  0x2f   :  { %509 = vmatpush1.bf16.msra.mxu1 %v4715_v29 }
  0x30   :  { %510 = vmatprep.subr.bf16.mxu1 %v4721_v30 }
  0x33   :  { %511 = vmatpush1.bf16.msra.mxu1 %v4727_v31 }
  0x34   :  { %512 = vmatprep.subr.bf16.mxu1 %v4733_v32 }
  0x37   :  { %513 = vmatpush1.bf16.msra.mxu1 %v4739_v33 }
  0x38   :  { %514 = vmatprep.subr.bf16.mxu1 %v4745_v34 }
  0x3b   :  { %515 = vmatpush1.bf16.msra.mxu1 %v4751_v35 }
  0x3c   :  { %516 = vmatprep.subr.bf16.mxu1 %v4757_v36 }
  0x3f   :  { %517 = vmatpush1.bf16.msra.mxu1 %v4763_v37 }
  0x40   :  { %518 = vmatprep.subr.bf16.mxu1 %v4769_v38 }
  0x43   :  { %519 = vmatpush1.bf16.msra.mxu1 %v4775_v39 }
  0x44   :  { %3927 = vmatprep.subr.bf16.mxu1 %v6084_v0 }
  0xd9   :  { %v166_v40 = vpop.f32.mrb[0].mxu0  ;;  %v320_v41 = vpop.f32.mrb[0].mxu1 }
  0xda   :  { %v3889_v42 = vpop.f32.mrb[1].mxu0  ;;  %v3901_v43 = vpop.f32.mrb[1].mxu1 }
  0xdb   :  { %v169_v44 = vpop.f32.mrb[2].mxu0  ;;  %v323_v45 = vpop.f32.mrb[2].mxu1 }
  0xdc   :  { %v173_v46 = vpack.c.bf16 %v169_v44, %v166_v40  ;;  %v3890_v47 = vpop.f32.mrb[3].mxu0  ;;  %v327_v48 = vpack.c.bf16 %v323_v45, %v320_v41  ;;  %v3902_v49 = vpop.f32.mrb[3].mxu1 }
  0xde   :  { %175 = vrot.lane.b32.xlu0 %v173_v46, %s4506_s9  ;;  %520 = vmatprep.mubr.bf16.mxu1 %v327_v48 }
  0xdf   :  { %521 = vmatmul.mubr.bf16.vlgmr.msra.gmra.mrb[4].mxu1 %v6064_v3 }
  0xe0   :  { %3929 = vmatprep.mubr.msk.bf16.mxu1 %vm4504_vm0, %v6084_v0 }
 0x150   :  { %v176_v51 = vpop.permute.xlu0 %175 }
 0x151   :  { %v180_v53 = vsel %vm177_vm3, %v4556_v1, %v176_v51  ;;  %v4813_v1 = vrot.slane %v4806_v61, %v106_v62 }
 0x152   :  { %3473 = vmatmul.mubr.msk.bf16.vlgmr.msra.gmra.mrb[4].mxu0 %vm189_vm4, %v180_v53 }
 0x153   :  { %3892 = vmatpush3.bf16.msra.mxu0 %v4788_v52  ;;  %3893 = vmatprep.mubr.msk.bf16.mxu0 %vm4504_vm0, %v6084_v0 }
 0x154   :  { %3903 = vmatprep.subr.bf16.mxu0 %v6084_v0 }
 0x15a   :  { %3894 = vmatmul.mubr.msk.bf16.vlgmr.msra.gmra.mrb[8].mxu0 %vm189_vm4, %v180_v53 }
 0x15b   :  { %3905 = vmatprep.mubr.msk.bf16.mxu0 %vm4504_vm0, %v6084_v0 }
 0x1b2   :  { %v522_v54 = vpop.f32.mrb[4].mxu1 }
 0x1b3   :  { %v524_v55 = vpop.f32.mrb[5].mxu1 }
 0x1b4   :  { %v526_v56 = vpop.f32.mrb[6].mxu1 }
 0x1b5   :  { %v528_v57 = vpop.f32.mrb[7].mxu1 }
 0x225   :  { %v236_v17 = vpop.f32.mrb[4].mxu0 }
 0x226   :  { %v237_v19 = vadd.f32 %v236_v17, %v4810_v63  ;;  %v238_v40 = vpop.f32.mrb[5].mxu0 }
 0x227   :  { %v239_v41 = vadd.f32 %v238_v40, %v4813_v1  ;;  %v240_v42 = vpop.f32.mrb[6].mxu0 }
 0x228   :  { %v4817_v43 = vadd.f32 %v522_v54, %v237_v19  ;;  %v241_v44 = vadd.f32 %v240_v42, %v4810_v63  ;;  %v242_v45 = vpop.f32.mrb[7].mxu0 }
 0x229   :  { %v545_v46 = vadd.f32 %v524_v55, %v239_v41  ;;  %v243_v47 = vadd.f32 %v242_v45, %v4813_v1  ;;  %v4835_v45 = vld [vmem:[%s6059_s5] sm:$0xff]  }
 0x22a   :  { %v4821_v48 = vadd.f32 %v526_v56, %v241_v44 }
 0x22b   :  { %v3510_v49 = vmul.f32 -1.442695, %v545_v46  ;;  %v546_v50 = vadd.f32 %v528_v57, %v243_v47  ;;  %v4830_v57 = vld [vmem:[%s6059_s5 + $0x40] sm:$0xff]   ;;  %v4841_v46 = vld [vmem:[%s6059_s5 + $0x48] sm:$0xff]  }
 0x22c   :  { %v4849_v47 = vld [vmem:[%s6059_s5 + $0x8] sm:$0xff]  }
 0x22d   :  { %4261 = vpow2.f32 %v3510_v49  ;;  %v3511_v51 = vmul.f32 -1.442695, %v546_v50  ;;  %v4823_v53 = vpop.f32.mrb[8].mxu0  ;;  %v4855_v49 = vld [vmem:[%s6059_s5 + $0x50] sm:$0xff]  }
 0x22e   :  { %v3895_v58 = vpop.f32.mrb[9].mxu0  ;;  %6165 = vst [vmem:[#allocation6_spill] sm:$0xff] %v4855_v49  ;;  %v4861_v50 = vld [vmem:[%s6059_s5 + $0x10] sm:$0xff]  }
 0x22f   :  { %4263 = vpow2.f32 %v3511_v51  ;;  %v4825_v60 = vpop.f32.mrb[10].mxu0  ;;  %6166 = vst [vmem:[#allocation7_spill] sm:$0xff] %v4861_v50  ;;  %v4867_v51 = vld [vmem:[%s6059_s5 + $0x58] sm:$0xff]  }
 0x230   :  { %v3896_v54 = vpop.f32.mrb[11].mxu0  ;;  %6167 = vst [vmem:[#allocation8_spill] sm:$0xff] %v4867_v51  ;;  %v4873_v58 = vld [vmem:[%s6059_s5 + $0x18] sm:$0xff]  }
 0x231   :  { %6168 = vst [vmem:[#allocation9_spill] sm:$0xff] %v4873_v58  ;;  %v4879_v54 = vld [vmem:[%s6059_s5 + $0x60] sm:$0xff]  }
 0x232   :  { %6169 = vst [vmem:[#allocation10_spill] sm:$0xff] %v4879_v54 }
 0x237   :  { %v4262_v62 = vpop.eup %4261 }
 0x238   :  { %v553_v17 = vadd.f32 1.0, %v4262_v62  ;;  %v4885_v62 = vld [vmem:[%s6059_s5 + $0x20] sm:$0xff]  }
 0x239   :  { %v4264_v19 = vpop.eup %4263  ;;  %6170 = vst [vmem:[#allocation11_spill] sm:$0xff] %v4885_v62 }
 0x23a   :  { %4265 = vrcp.f32 %v553_v17  ;;  %v554_v55 = vadd.f32 1.0, %v4264_v19  ;;  %v4891_v17 = vld [vmem:[%s6059_s5 + $0x68] sm:$0xff]  }
 0x23b   :  { %6171 = vst [vmem:[#allocation12_spill] sm:$0xff] %v4891_v17  ;;  %v4897_v19 = vld [vmem:[%s6059_s5 + $0x28] sm:$0xff]  }
 0x23c   :  { %4267 = vrcp.f32 %v554_v55  ;;  %6172 = vst [vmem:[#allocation13_spill] sm:$0xff] %v4897_v19  ;;  %v4903_v55 = vld [vmem:[%s6059_s5 + $0x70] sm:$0xff]  }
 0x23d   :  { %6173 = vst [vmem:[#allocation14_spill] sm:$0xff] %v4903_v55 }
 0x244   :  { %v4266_v40 = vpop.eup %4265 }
 0x245   :  { %v559_v41 = vmul.f32 0.0, %v4266_v40  ;;  %v4909_v40 = vld [vmem:[%s6059_s5 + $0x30] sm:$0xff]  }
 0x246   :  { %v4268_v56 = vpop.eup %4267  ;;  %6174 = vst [vmem:[#allocation15_spill] sm:$0xff] %v4909_v40 }
 0x247   :  { %v560_v42 = vmul.f32 0.0, %v4268_v56  ;;  %v4916_v56 = vld [vmem:[%s6059_s5 + $0x78] sm:$0xff]  }
 0x248   :  { %6175 = vst [vmem:[#allocation16_spill] sm:$0xff] %v4916_v56 }
 0x249   :  { %v561_v44 = vpack.c.bf16 %v560_v42, %v559_v41  ;;  %v4921_v41 = vld [vmem:[%s6059_s5 + $0x38] sm:$0xff]  }
 0x24a   :  { %6176 = vst [vmem:[#allocation17_spill] sm:$0xff] %v4921_v41 }
 0x24b   :  { %3904 = vmatpush3.bf16.msra.mxu0 %v561_v44 }
 0x24c   :  { %3637 = vmatprep.subr.bf16.mxu0 %v4830_v57 }
 0x24e   :  { %3906 = vmatmul.mubr.msk.bf16.vlgmr.msra.gmra.mrb[12].mxu0 %vm128_vm1, %v4563_v2 }
 0x24f   :  { %3638 = vmatpush3.bf16.msra.mxu0 %v4835_v45 }
 0x250   :  { %3639 = vmatprep.subr.bf16.mxu0 %v4841_v46 }
 0x253   :  { %3640 = vmatpush3.bf16.msra.mxu0 %v4849_v47 }
 0x254   :  { %3641 = vmatprep.subr.bf16.mxu0 %v4855_v49 }
 0x257   :  { %3642 = vmatpush3.bf16.msra.mxu0 %v4861_v50 }
 0x258   :  { %3643 = vmatprep.subr.bf16.mxu0 %v4867_v51 }
 0x25b   :  { %3644 = vmatpush3.bf16.msra.mxu0 %v4873_v58 }
 0x25c   :  { %3645 = vmatprep.subr.bf16.mxu0 %v4879_v54 }
 0x25f   :  { %3646 = vmatpush3.bf16.msra.mxu0 %v4885_v62 }
 0x260   :  { %3647 = vmatprep.subr.bf16.mxu0 %v4891_v17 }
 0x263   :  { %3648 = vmatpush3.bf16.msra.mxu0 %v4897_v19  ;;  %v4246_v19 = vld [vmem:[%s6055_s0 + $0x8] sm:$0xff]  }
 0x264   :  { %3649 = vmatprep.subr.bf16.mxu0 %v4903_v55 }
 0x267   :  { %3650 = vmatpush3.bf16.msra.mxu0 %v4909_v40 }
 0x268   :  { %3651 = vmatprep.subr.bf16.mxu0 %v4916_v56 }
 0x26b   :  { %3652 = vmatpush3.bf16.msra.mxu0 %v4921_v41 }
 0x26c   :  { %3909 = vmatprep.subr.bf16.mxu0 %v6084_v0 }
 0x321   :  { %v596_v42 = vpop.f32.mrb[12].mxu0 }
 0x322   :  { %v3907_v3 = vpop.f32.mrb[13].mxu0 }
 0x323   :  { %v599_v63 = vpop.f32.mrb[14].mxu0  ;;  %v6177_v3 = vmov 0  }
 0x324   :  { %v603_v40 = vpack.c.bf16 %v599_v63, %v596_v42  ;;  %v3908_v55 = vpop.f32.mrb[15].mxu0  ;;  %v3508_v63 = vmul.f32 -1.442695, %v4817_v43 }
 0x325   :  { %v110_v55 = vsub.s32 2, %v4800_v59 }
 0x326   :  { %732 = vmatprep.mubr.bf16.mxu0 %v603_v40  ;;  %4269 = vpow2.f32 %v3508_v63 }
 0x327   :  { %733 = vmatmul.mubr.bf16.vlgmr.msra.gmra.mrb[16].mxu0 %v561_v44  ;;  %v3509_v44 = vmul.f32 -1.442695, %v4821_v48  ;;  %v4942_v41 = vrot.slane %v4806_v61, %v110_v55 }
 0x328   :  { %3910 = vmatpush3.bf16.msra.mxu0 %v4246_v19  ;;  %3911 = vmatprep.mubr.msk.bf16.mxu0 %vm4504_vm0, %v6084_v0 }
 0x329   :  { %3533 = vmatprep.subr.msk.bf16.mxu0 %vm192_vm2, %v4654_v18  ;;  %4271 = vpow2.f32 %v3509_v44  ;;  %v283_v59 = vadd.f32 %v4825_v60, %v4942_v41 }
 0x32f   :  { %3912 = vmatmul.mubr.msk.bf16.vlgmr.msra.gmra.mrb[20].mxu0 %vm128_vm1, %v4563_v2 }
 0x330   :  { %817 = vmatpush1.bf16.msra.mxu0 %v4671_v22  ;;  %848 = vmatprep.mubr.bf16.mxu0 %v6177_v3  ;;  %v4270_v40 = vpop.eup %4269 }
 0x331   :  { %3915 = vmatprep.subr.bf16.mxu0 %v6084_v0  ;;  %v539_v18 = vadd.f32 1.0, %v4270_v40  ;;  %v280_v0 = vadd.f32 %v4823_v53, %v4942_v41 }
 0x333   :  { %v4272_v42 = vpop.eup %4271  ;;  %4273 = vrcp.f32 %v539_v18 }
 0x334   :  { %v540_v56 = vadd.f32 1.0, %v4272_v42 }
 0x336   :  { %4275 = vrcp.f32 %v540_v56 }
 0x33d   :  { %v4274_v54 = vpop.eup %4273 }
 0x33e   :  { %v747_v53 = vsub.f32 1.0, %v4274_v54  ;;  %v745_v51 = vmul.f32 0.0, %v4274_v54 }
 0x3fa   :  { %v3653_v22 = vpop.f32.mrb[16].mxu0 }
 0x3fb   :  { %v3654_v17 = vpop.f32.mrb[17].mxu0 }
 0x3fc   :  { %v3655_v43 = vadd.f32 %v3654_v17, %v3653_v22  ;;  %v3656_v3 = vpop.f32.mrb[18].mxu0  ;;  %v4276_v22 = vpop.eup %4275 }
 0x3fd   :  { %v3657_v48 = vpop.f32.mrb[19].mxu0  ;;  %v748_v58 = vsub.f32 1.0, %v4276_v22 }
 0x3fe   :  { %v741_v63 = vadd.f32 %v3655_v43, %v280_v0  ;;  %v3658_v44 = vadd.f32 %v3657_v48, %v3656_v3  ;;  %v746_v3 = vmul.f32 0.0, %v4276_v22 }
 0x400   :  { %4277 = vtanh.f32 %v741_v63  ;;  %v742_v40 = vadd.f32 %v3658_v44, %v283_v59 }
 0x402   :  { %4279 = vtanh.f32 %v742_v40  ;;  %v800_v61 = vpop.f32.mrb[20].mxu0 }
 0x403   :  { %v3913_v55 = vpop.f32.mrb[21].mxu0 }
 0x404   :  { %v803_v42 = vpop.f32.mrb[22].mxu0 }
 0x405   :  { %v807_v62 = vpack.c.bf16 %v803_v42, %v800_v61  ;;  %v3914_v18 = vpop.f32.mrb[23].mxu0 }
 0x407   :  { %809 = vrot.lane.b32.xlu0 %v807_v62, %s4506_s9  ;;  %v6180_v62 = vmov 0.0  }
 0x40a   :  { %v4278_v17 = vpop.eup %4277 }
 0x40b   :  { %v749_v56 = vmul.f32 %v4278_v17, %v747_v53 }
 0x40c   :  { %v4280_v60 = vpop.eup %4279 }
 0x40d   :  { %v750_v0 = vmul.f32 %v4280_v60, %v748_v58  ;;  %v4949_v43 = vadd.f32 %v749_v56, %v745_v51 }
 0x40f   :  { %6178 = vst [vmem:[#allocation18_spill] sm:$0xff] %v4949_v43  ;;  %v4951_v48 = vadd.f32 %v750_v0, %v746_v3 }
 0x411   :  { %6179 = vst [vmem:[#allocation19_spill] sm:$0xff] %v4951_v48  ;;  %v900_v58 = vpack.c.bf16 %v4951_v48, %v4949_v43 }
 0x479   :  { %v810_v59 = vpop.permute.xlu0 %809 }
 0x47a   :  { %v813_v63 = vsel %vm177_vm3, %v4246_v19, %v810_v59 }
 0x47b   :  { %3534 = vmatmul.mubr.msk.bf16.vlgmr.msra.gmra.mrb[24].mxu0 %vm189_vm4, %v813_v63 }
 0x47c   :  { %3916 = vmatpush3.bf16.msra.mxu0 %v4788_v52  ;;  %3917 = vmatprep.mubr.msk.bf16.mxu0 %vm4504_vm0, %v6180_v62 }
 0x47d   :  { %3921 = vmatprep.subr.bf16.mxu0 %v6180_v62 }
 0x483   :  { %3918 = vmatmul.mubr.msk.bf16.vlgmr.msra.gmra.mrb[28].mxu0 %vm189_vm4, %v813_v63 }
 0x484   :  { %3922 = vmatpush3.bf16.msra.mxu0 %v900_v58  ;;  %3923 = vmatprep.mubr.msk.bf16.mxu0 %vm4504_vm0, %v6180_v62 }
 0x485   :  { %943 = vmatprep.subr.bf16.mxu0 %v4578_v4 }
 0x48b   :  { %3924 = vmatmul.mubr.msk.bf16.vlgmr.msra.gmra.mrb[32].mxu0 %vm128_vm1, %v4563_v2 }
 0x48c   :  { %944 = vmatpush1.bf16.msra.mxu0 %v4583_v5 }
 0x48d   :  { %945 = vmatprep.subr.bf16.mxu0 %v4589_v6 }
 0x490   :  { %946 = vmatpush1.bf16.msra.mxu0 %v4595_v7 }
 0x491   :  { %947 = vmatprep.subr.bf16.mxu0 %v4601_v8 }
 0x494   :  { %948 = vmatpush1.bf16.msra.mxu0 %v4607_v9 }
 0x495   :  { %949 = vmatprep.subr.bf16.mxu0 %v4613_v10 }
 0x498   :  { %950 = vmatpush1.bf16.msra.mxu0 %v4619_v11 }
 0x499   :  { %951 = vmatprep.subr.bf16.mxu0 %v4625_v12 }
 0x49c   :  { %952 = vmatpush1.bf16.msra.mxu0 %v4631_v13 }
 0x49d   :  { %953 = vmatprep.subr.bf16.mxu0 %v4637_v14 }
 0x4a0   :  { %954 = vmatpush1.bf16.msra.mxu0 %v4643_v15 }
 0x4a1   :  { %955 = vmatprep.subr.bf16.mxu0 %v4649_v16 }
 0x4a4   :  { %956 = vmatpush1.bf16.msra.mxu0 %v4660_v20 }
 0x4a5   :  { %957 = vmatprep.subr.bf16.mxu0 %v4666_v21 }
 0x4a8   :  { %958 = vmatpush1.bf16.msra.mxu0 %v4679_v23 }
 0x4a9   :  { %959 = vmatprep.subr.bf16.mxu0 %v4685_v24 }
 0x4ac   :  { %960 = vmatpush1.bf16.msra.mxu0 %v4691_v25 }
 0x4ad   :  { %961 = vmatprep.subr.bf16.mxu0 %v4697_v26 }
 0x4b0   :  { %962 = vmatpush1.bf16.msra.mxu0 %v4703_v27 }
 0x4b1   :  { %963 = vmatprep.subr.bf16.mxu0 %v4709_v28 }
 0x4b4   :  { %964 = vmatpush1.bf16.msra.mxu0 %v4715_v29 }
 0x4b5   :  { %965 = vmatprep.subr.bf16.mxu0 %v4721_v30 }
 0x4b8   :  { %966 = vmatpush1.bf16.msra.mxu0 %v4727_v31 }
 0x4b9   :  { %967 = vmatprep.subr.bf16.mxu0 %v4733_v32 }
 0x4bc   :  { %968 = vmatpush1.bf16.msra.mxu0 %v4739_v33 }
 0x4bd   :  { %969 = vmatprep.subr.bf16.mxu0 %v4745_v34 }
 0x4c0   :  { %970 = vmatpush1.bf16.msra.mxu0 %v4751_v35 }
 0x4c1   :  { %971 = vmatprep.subr.bf16.mxu0 %v4757_v36 }
 0x4c4   :  { %972 = vmatpush1.bf16.msra.mxu0 %v4763_v37 }
 0x4c5   :  { %973 = vmatprep.subr.bf16.mxu0 %v4769_v38 }
 0x4c8   :  { %974 = vmatpush1.bf16.msra.mxu0 %v4775_v39 }
 0x4c9   :  { %3951 = vmatprep.subr.bf16.mxu0 %v6180_v62 }
 0x556   :  { %v4999_v51 = vpop.f32.mrb[28].mxu0 }
 0x557   :  { %v3919_v54 = vpop.f32.mrb[29].mxu0 }
 0x558   :  { %v5001_v19 = vpop.f32.mrb[30].mxu0 }
 0x559   :  { %v3920_v44 = vpop.f32.mrb[31].mxu0 }
 0x55e   :  { %v935_v40 = vpop.f32.mrb[32].mxu0 }
 0x55f   :  { %v3925_v61 = vpop.f32.mrb[33].mxu0 }
 0x560   :  { %v938_v55 = vpop.f32.mrb[34].mxu0 }
 0x561   :  { %v942_v42 = vpack.c.bf16 %v938_v55, %v935_v40  ;;  %v3926_v18 = vpop.f32.mrb[35].mxu0 }
 0x563   :  { %975 = vmatprep.mubr.bf16.mxu0 %v942_v42 }
 0x564   :  { %976 = vmatmul.mubr.bf16.vlgmr.msra.gmra.mrb[24].mxu0 %v900_v58 }
 0x565   :  { %3953 = vmatprep.mubr.msk.bf16.mxu0 %vm4504_vm0, %v6180_v62 }
 0x637   :  { %v977_v22 = vpop.f32.mrb[24].mxu0 }
 0x638   :  { %v979_v53 = vpop.f32.mrb[25].mxu0 }
 0x639   :  { %v4118_v17 = vadd.f32 %v979_v53, %v4813_v1  ;;  %v981_v56 = vpop.f32.mrb[26].mxu0  ;;  %v6181_v53 = vld [vmem:[#allocation8_spill] sm:$0xff] }
 0x63a   :  { %v983_v60 = vpop.f32.mrb[27].mxu0 }
 0x63b   :  { %v3539_v0 = vmul.f32 -1.442695, %v4118_v17  ;;  %v4120_v3 = vadd.f32 %v983_v60, %v4813_v1  ;;  %v6182_v17 = vld [vmem:[#allocation9_spill] sm:$0xff]  ;;  %v6183_v60 = vld [vmem:[#allocation10_spill] sm:$0xff] }
 0x63d   :  { %4281 = vpow2.f32 %v3539_v0  ;;  %v3540_v59 = vmul.f32 -1.442695, %v4120_v3  ;;  %v6184_v0 = vld [vmem:[#allocation11_spill] sm:$0xff]  ;;  %v6185_v3 = vld [vmem:[#allocation12_spill] sm:$0xff] }
 0x63f   :  { %4283 = vpow2.f32 %v3540_v59  ;;  %v6186_v59 = vld [vmem:[#allocation13_spill] sm:$0xff] }
 0x647   :  { %v4282_v63 = vpop.eup %4281 }
 0x648   :  { %v1008_v54 = vadd.f32 1.0, %v4282_v63  ;;  %v6187_v63 = vld [vmem:[#allocation14_spill] sm:$0xff] }
 0x649   :  { %v4284_v44 = vpop.eup %4283 }
 0x64a   :  { %4285 = vrcp.f32 %v1008_v54  ;;  %v1009_v58 = vadd.f32 1.0, %v4284_v44  ;;  %v6188_v54 = vld [vmem:[#allocation15_spill] sm:$0xff]  ;;  %v6189_v44 = vld [vmem:[#allocation16_spill] sm:$0xff] }
 0x64c   :  { %4287 = vrcp.f32 %v1009_v58  ;;  %v6190_v58 = vld [vmem:[#allocation17_spill] sm:$0xff] }
 0x654   :  { %v4286_v40 = vpop.eup %4285 }
 0x655   :  { %v1014_v55 = vmul.f32 %v4286_v40, %v4949_v43 }
 0x656   :  { %v4288_v61 = vpop.eup %4287 }
 0x657   :  { %v1015_v42 = vmul.f32 %v4288_v61, %v4951_v48 }
 0x659   :  { %v1016_v18 = vpack.c.bf16 %v1015_v42, %v1014_v55 }
 0x65b   :  { %3928 = vmatpush3.bf16.msra.mxu1 %v1016_v18 }
 0x65c   :  { %3667 = vmatprep.subr.bf16.mxu1 %v4830_v57 }
 0x65e   :  { %3930 = vmatmul.mubr.msk.bf16.vlgmr.msra.gmra.mrb[8].mxu1 %vm128_vm1, %v4563_v2 }
 0x65f   :  { %3668 = vmatpush3.bf16.msra.mxu1 %v4835_v45 }
 0x660   :  { %3669 = vmatprep.subr.bf16.mxu1 %v4841_v46 }
 0x663   :  { %3670 = vmatpush3.bf16.msra.mxu1 %v4849_v47 }
 0x664   :  { %3671 = vmatprep.subr.bf16.mxu1 %v4855_v49 }
 0x667   :  { %3672 = vmatpush3.bf16.msra.mxu1 %v4861_v50 }
 0x668   :  { %3673 = vmatprep.subr.bf16.mxu1 %v6181_v53 }
 0x66b   :  { %3674 = vmatpush3.bf16.msra.mxu1 %v6182_v17 }
 0x66c   :  { %3675 = vmatprep.subr.bf16.mxu1 %v6183_v60 }
 0x66f   :  { %3676 = vmatpush3.bf16.msra.mxu1 %v6184_v0 }
 0x670   :  { %3677 = vmatprep.subr.bf16.mxu1 %v6185_v3  ;;  %v4247_v3 = vld [vmem:[%s6055_s0 + $0x10] sm:$0xff]  }
 0x673   :  { %3678 = vmatpush3.bf16.msra.mxu1 %v6186_v59 }
 0x674   :  { %3679 = vmatprep.subr.bf16.mxu1 %v6187_v63 }
 0x677   :  { %3680 = vmatpush3.bf16.msra.mxu1 %v6188_v54 }
 0x678   :  { %3681 = vmatprep.subr.bf16.mxu1 %v6189_v44  ;;  %v6191_v44 = vld [vmem:[#allocation3_spill] sm:$0xff] }
 0x67b   :  { %3682 = vmatpush3.bf16.msra.mxu1 %v6190_v58 }
 0x67c   :  { %3933 = vmatprep.subr.bf16.mxu1 %v6180_v62 }
 0x731   :  { %v1051_v40 = vpop.f32.mrb[8].mxu1 }
 0x732   :  { %v3931_v61 = vpop.f32.mrb[9].mxu1 }
 0x733   :  { %v1054_v55 = vpop.f32.mrb[10].mxu1  ;;  %v6192_v61 = vld [vmem:[#allocation4_spill] sm:$0xff] }
 0x734   :  { %v1058_v42 = vpack.c.bf16 %v1054_v55, %v1051_v40  ;;  %v3932_v60 = vpop.f32.mrb[11].mxu1  ;;  %v6193_v40 = vmov 0  }
 0x735   :  { %v6194_v60 = vld [vmem:[#allocation5_spill] sm:$0xff] }
 0x736   :  { %1091 = vmatprep.mubr.bf16.mxu1 %v1058_v42  ;;  %v4117_v55 = vadd.f32 %v977_v22, %v6194_v60  ;;  %v897_v22 = vadd.f32 %v5001_v19, %v4942_v41 }
 0x737   :  { %1092 = vmatmul.mubr.bf16.vlgmr.msra.gmra.mrb[12].mxu1 %v1016_v18  ;;  %v4119_v18 = vadd.f32 %v981_v56, %v6194_v60 }
 0x738   :  { %3934 = vmatpush3.bf16.msra.mxu1 %v4247_v3  ;;  %3935 = vmatprep.mubr.msk.bf16.mxu1 %vm4504_vm0, %v6180_v62  ;;  %v3537_v42 = vmul.f32 -1.442695, %v4117_v55 }
 0x739   :  { %3546 = vmatprep.subr.msk.bf16.mxu1 %vm192_vm2, %v6191_v44  ;;  %v3538_v58 = vmul.f32 -1.442695, %v4119_v18 }
 0x73a   :  { %4289 = vpow2.f32 %v3537_v42 }
 0x73b   :  { %4291 = vpow2.f32 %v3538_v58 }
 0x73f   :  { %3936 = vmatmul.mubr.msk.bf16.vlgmr.msra.gmra.mrb[16].mxu1 %vm128_vm1, %v4563_v2 }
 0x740   :  { %1176 = vmatpush1.bf16.msra.mxu1 %v6192_v61  ;;  %1207 = vmatprep.mubr.bf16.mxu1 %v6193_v40  ;;  %v894_v61 = vadd.f32 %v4999_v51, %v4942_v41 }
 0x741   :  { %3939 = vmatprep.subr.bf16.mxu1 %v6180_v62 }
 0x744   :  { %v4290_v54 = vpop.eup %4289 }
 0x745   :  { %v4292_v63 = vpop.eup %4291  ;;  %v994_v44 = vadd.f32 1.0, %v4290_v54 }
 0x746   :  { %v995_v59 = vadd.f32 1.0, %v4292_v63 }
 0x747   :  { %4293 = vrcp.f32 %v994_v44 }
 0x748   :  { %4295 = vrcp.f32 %v995_v59 }
 0x751   :  { %v4294_v49 = vpop.eup %4293 }
 0x752   :  { %v4296_v51 = vpop.eup %4295  ;;  %v1104_v44 = vmul.f32 %v4294_v49, %v4949_v43 }
 0x753   :  { %v1107_v19 = vsub.f32 1.0, %v4296_v51 }
 0x80a   :  { %v3683_v0 = vpop.f32.mrb[12].mxu1 }
 0x80b   :  { %v3684_v17 = vpop.f32.mrb[13].mxu1 }
 0x80c   :  { %v3685_v40 = vadd.f32 %v3684_v17, %v3683_v0  ;;  %v3686_v53 = vpop.f32.mrb[14].mxu1  ;;  %v1106_v17 = vsub.f32 1.0, %v4294_v49 }
 0x80d   :  { %v3687_v50 = vpop.f32.mrb[15].mxu1 }
 0x80e   :  { %v1100_v56 = vadd.f32 %v3685_v40, %v894_v61  ;;  %v3688_v55 = vadd.f32 %v3687_v50, %v3686_v53  ;;  %v1105_v50 = vmul.f32 %v4296_v51, %v4951_v48 }
 0x810   :  { %4297 = vtanh.f32 %v1100_v56  ;;  %v1101_v58 = vadd.f32 %v3688_v55, %v897_v22  ;;  %v6204_v55 = vld [vmem:[#allocation13_spill] sm:$0xff] }
 0x812   :  { %4299 = vtanh.f32 %v1101_v58  ;;  %v1159_v54 = vpop.f32.mrb[16].mxu1  ;;  %v6205_v58 = vld [vmem:[#allocation14_spill] sm:$0xff] }
 0x813   :  { %v3937_v63 = vpop.f32.mrb[17].mxu1 }
 0x814   :  { %v1162_v18 = vpop.f32.mrb[18].mxu1  ;;  %v6207_v63 = vld [vmem:[#allocation16_spill] sm:$0xff] }
 0x815   :  { %v1166_v42 = vpack.c.bf16 %v1162_v18, %v1159_v54  ;;  %v3938_v60 = vpop.f32.mrb[19].mxu1  ;;  %v6206_v54 = vld [vmem:[#allocation15_spill] sm:$0xff]  ;;  %v6208_v18 = vld [vmem:[#allocation17_spill] sm:$0xff] }
 0x817   :  { %1168 = vrot.lane.b32.xlu1 %v1166_v42, %s4506_s9 }
 0x81a   :  { %v4298_v0 = vpop.eup %4297 }
 0x81b   :  { %v1108_v59 = vmul.f32 %v4298_v0, %v1106_v17 }
 0x81c   :  { %v4300_v61 = vpop.eup %4299 }
 0x81d   :  { %v1109_v53 = vmul.f32 %v4300_v61, %v1107_v19  ;;  %v5049_v40 = vadd.f32 %v1108_v59, %v1104_v44  ;;  %v4248_v19 = vld [vmem:[%s6055_s0 + $0x18] sm:$0xff]   ;;  %v6209_v59 = vld [vmem:[#allocation3_spill] sm:$0xff]  ;;  %v6210_v61 = vld [vmem:[#allocation4_spill] sm:$0xff] }
 0x81f   :  { %6195 = vst [vmem:[#allocation20_spill] sm:$0xff] %v5049_v40  ;;  %v5051_v22 = vadd.f32 %v1109_v53, %v1105_v50  ;;  %v6211_v50 = vmov 0   ;;  %v6212_v53 = vld [vmem:[#allocation5_spill] sm:$0xff] }
 0x821   :  { %6196 = vst [vmem:[#allocation21_spill] sm:$0xff] %v5051_v22  ;;  %v1259_v49 = vpack.c.bf16 %v5051_v22, %v5049_v40 }
 0x889   :  { %v1169_v56 = vpop.permute.xlu1 %1168 }
 0x88a   :  { %v1172_v60 = vsel %vm177_vm3, %v4247_v3, %v1169_v56  ;;  %v6203_v3 = vld [vmem:[#allocation12_spill] sm:$0xff] }
 0x88b   :  { %3547 = vmatmul.mubr.msk.bf16.vlgmr.msra.gmra.mrb[20].mxu1 %vm189_vm4, %v1172_v60 }
 0x88c   :  { %3940 = vmatpush3.bf16.msra.mxu1 %v4788_v52  ;;  %3941 = vmatprep.mubr.msk.bf16.mxu1 %vm4504_vm0, %v6180_v62 }
 0x88d   :  { %3945 = vmatprep.subr.bf16.mxu1 %v6180_v62 }
 0x893   :  { %3942 = vmatmul.mubr.msk.bf16.vlgmr.msra.gmra.mrb[24].mxu1 %vm189_vm4, %v1172_v60 }
 0x894   :  { %3946 = vmatpush3.bf16.msra.mxu1 %v1259_v49  ;;  %3947 = vmatprep.mubr.msk.bf16.mxu1 %vm4504_vm0, %v6180_v62 }
 0x895   :  { %1302 = vmatprep.subr.bf16.mxu1 %v4578_v4 }
 0x89b   :  { %3948 = vmatmul.mubr.msk.bf16.vlgmr.msra.gmra.mrb[28].mxu1 %vm128_vm1, %v4563_v2 }
 0x89c   :  { %1303 = vmatpush1.bf16.msra.mxu1 %v4583_v5 }
 0x89d   :  { %1304 = vmatprep.subr.bf16.mxu1 %v4589_v6 }
 0x8a0   :  { %1305 = vmatpush1.bf16.msra.mxu1 %v4595_v7 }
 0x8a1   :  { %1306 = vmatprep.subr.bf16.mxu1 %v4601_v8 }
 0x8a4   :  { %1307 = vmatpush1.bf16.msra.mxu1 %v4607_v9 }
 0x8a5   :  { %1308 = vmatprep.subr.bf16.mxu1 %v4613_v10 }
 0x8a8   :  { %1309 = vmatpush1.bf16.msra.mxu1 %v4619_v11 }
 0x8a9   :  { %1310 = vmatprep.subr.bf16.mxu1 %v4625_v12 }
 0x8ac   :  { %1311 = vmatpush1.bf16.msra.mxu1 %v4631_v13 }
 0x8ad   :  { %1312 = vmatprep.subr.bf16.mxu1 %v4637_v14 }
 0x8b0   :  { %1313 = vmatpush1.bf16.msra.mxu1 %v4643_v15 }
 0x8b1   :  { %1314 = vmatprep.subr.bf16.mxu1 %v4649_v16 }
 0x8b4   :  { %1315 = vmatpush1.bf16.msra.mxu1 %v4660_v20 }
 0x8b5   :  { %1316 = vmatprep.subr.bf16.mxu1 %v4666_v21 }
 0x8b8   :  { %1317 = vmatpush1.bf16.msra.mxu1 %v4679_v23 }
 0x8b9   :  { %1318 = vmatprep.subr.bf16.mxu1 %v4685_v24 }
 0x8bc   :  { %1319 = vmatpush1.bf16.msra.mxu1 %v4691_v25 }
 0x8bd   :  { %1320 = vmatprep.subr.bf16.mxu1 %v4697_v26 }
 0x8c0   :  { %1321 = vmatpush1.bf16.msra.mxu1 %v4703_v27 }
 0x8c1   :  { %1322 = vmatprep.subr.bf16.mxu1 %v4709_v28 }
 0x8c4   :  { %1323 = vmatpush1.bf16.msra.mxu1 %v4715_v29 }
 0x8c5   :  { %1324 = vmatprep.subr.bf16.mxu1 %v4721_v30 }
 0x8c8   :  { %1325 = vmatpush1.bf16.msra.mxu1 %v4727_v31 }
 0x8c9   :  { %1326 = vmatprep.subr.bf16.mxu1 %v4733_v32 }
 0x8cc   :  { %1327 = vmatpush1.bf16.msra.mxu1 %v4739_v33  ;;  %v5113_v33 = vld [vmem:[%s6056_s1] sm:$0xff]  }
 0x8cd   :  { %1328 = vmatprep.subr.bf16.mxu1 %v4745_v34  ;;  %v6197_v34 = vld [vmem:[#allocation6_spill] sm:$0xff] }
 0x8d0   :  { %1329 = vmatpush1.bf16.msra.mxu1 %v4751_v35  ;;  %v6198_v35 = vld [vmem:[#allocation7_spill] sm:$0xff] }
 0x8d1   :  { %1330 = vmatprep.subr.bf16.mxu1 %v4757_v36  ;;  %v6199_v36 = vld [vmem:[#allocation8_spill] sm:$0xff] }
 0x8d4   :  { %1331 = vmatpush1.bf16.msra.mxu1 %v4763_v37  ;;  %v6200_v37 = vld [vmem:[#allocation9_spill] sm:$0xff] }
 0x8d5   :  { %1332 = vmatprep.subr.bf16.mxu1 %v4769_v38  ;;  %v6201_v38 = vld [vmem:[#allocation10_spill] sm:$0xff] }
 0x8d8   :  { %1333 = vmatpush1.bf16.msra.mxu1 %v4775_v39  ;;  %v6202_v39 = vld [vmem:[#allocation11_spill] sm:$0xff] }
 0x8d9   :  { %3975 = vmatprep.subr.bf16.mxu1 %v6180_v62 }
 0x966   :  { %v5099_v2 = vpop.f32.mrb[24].mxu1 }
 0x967   :  { %v3943_v4 = vpop.f32.mrb[25].mxu1 }
 0x968   :  { %v5101_v5 = vpop.f32.mrb[26].mxu1 }
 0x969   :  { %v3944_v6 = vpop.f32.mrb[27].mxu1 }
 0x96e   :  { %v1294_v7 = vpop.f32.mrb[28].mxu1 }
 0x96f   :  { %v3949_v8 = vpop.f32.mrb[29].mxu1 }
 0x970   :  { %v1297_v9 = vpop.f32.mrb[30].mxu1 }
 0x971   :  { %v1301_v10 = vpack.c.bf16 %v1297_v9, %v1294_v7  ;;  %v3950_v11 = vpop.f32.mrb[31].mxu1 }
 0x973   :  { %1334 = vmatprep.mubr.bf16.mxu1 %v1301_v10 }
 0x974   :  { %1335 = vmatmul.mubr.bf16.vlgmr.msra.gmra.mrb[20].mxu1 %v1259_v49 }
 0x975   :  { %3977 = vmatprep.mubr.msk.bf16.mxu1 %vm4504_vm0, %v6180_v62 }
 0xa47   :  { %v1336_v12 = vpop.f32.mrb[20].mxu1 }
 0xa48   :  { %v1338_v13 = vpop.f32.mrb[21].mxu1  ;;  %v4121_v56 = vadd.f32 %v1336_v12, %v6212_v53  ;;  %v1256_v12 = vadd.f32 %v5101_v5, %v4942_v41 }
 0xa49   :  { %v4122_v14 = vadd.f32 %v1338_v13, %v4813_v1  ;;  %v1340_v15 = vpop.f32.mrb[22].mxu1  ;;  %v1253_v13 = vadd.f32 %v5099_v2, %v4942_v41 }
 0xa4a   :  { %v1342_v16 = vpop.f32.mrb[23].mxu1  ;;  %v4123_v60 = vadd.f32 %v1340_v15, %v6212_v53  ;;  %v3550_v49 = vmul.f32 -1.442695, %v4121_v56 }
 0xa4b   :  { %v3552_v20 = vmul.f32 -1.442695, %v4122_v14  ;;  %v4124_v21 = vadd.f32 %v1342_v16, %v4813_v1 }
 0xa4c   :  { %v3551_v4 = vmul.f32 -1.442695, %v4123_v60 }
 0xa4d   :  { %4301 = vpow2.f32 %v3552_v20  ;;  %v3553_v23 = vmul.f32 -1.442695, %v4124_v21 }
 0xa4f   :  { %4303 = vpow2.f32 %v3553_v23 }
 0xa57   :  { %v4302_v24 = vpop.eup %4301 }
 0xa58   :  { %v1367_v25 = vadd.f32 1.0, %v4302_v24 }
 0xa59   :  { %v4304_v26 = vpop.eup %4303 }
 0xa5a   :  { %4305 = vrcp.f32 %v1367_v25  ;;  %v1368_v27 = vadd.f32 1.0, %v4304_v26 }
 0xa5c   :  { %4307 = vrcp.f32 %v1368_v27 }
 0xa5d   :  { %4309 = vpow2.f32 %v3550_v49 }
 0xa5e   :  { %4311 = vpow2.f32 %v3551_v4 }
 0xa64   :  { %v4306_v28 = vpop.eup %4305 }
 0xa65   :  { %v1373_v30 = vmul.f32 %v4306_v28, %v5049_v40 }
 0xa66   :  { %v4308_v29 = vpop.eup %4307 }
 0xa67   :  { %v1374_v31 = vmul.f32 %v4308_v29, %v5051_v22  ;;  %v4310_v6 = vpop.eup %4309 }
 0xa68   :  { %v4312_v7 = vpop.eup %4311  ;;  %v1353_v8 = vadd.f32 1.0, %v4310_v6  ;;  %v5183_v6 = vld [vmem:[%s6057_s4] ss:$8 sps:$4 sm:$0xff]  }
 0xa69   :  { %v1375_v32 = vpack.c.bf16 %v1374_v31, %v1373_v30  ;;  %v1354_v9 = vadd.f32 1.0, %v4312_v7  ;;  %v5189_v7 = vld [vmem:[%s6057_s4 + $0x14] ss:$8 sps:$4 sm:$0xff]  }
 0xa6a   :  { %4313 = vrcp.f32 %v1353_v8  ;;  %v5195_v8 = vld [vmem:[%s6057_s4 + $0x10] ss:$8 sps:$4 sm:$0xff]  }
 0xa6b   :  { %3952 = vmatpush3.bf16.msra.mxu0 %v1375_v32  ;;  %4315 = vrcp.f32 %v1354_v9  ;;  %v5201_v9 = vld [vmem:[%s6057_s4 + $0x24] ss:$8 sps:$4 sm:$0xff]  }
 0xa6c   :  { %3697 = vmatprep.subr.bf16.mxu0 %v4830_v57 }
 0xa6e   :  { %3954 = vmatmul.mubr.msk.bf16.vlgmr.msra.gmra.mrb[36].mxu0 %vm128_vm1, %v5113_v33 }
 0xa6f   :  { %3698 = vmatpush3.bf16.msra.mxu0 %v4835_v45 }
 0xa70   :  { %3699 = vmatprep.subr.bf16.mxu0 %v4841_v46 }
 0xa73   :  { %3700 = vmatpush3.bf16.msra.mxu0 %v4849_v47 }
 0xa74   :  { %3701 = vmatprep.subr.bf16.mxu0 %v6197_v34  ;;  %v4314_v29 = vpop.eup %4313 }
 0xa75   :  { %v4316_v2 = vpop.eup %4315  ;;  %v1465_v30 = vsub.f32 1.0, %v4314_v29 }
 0xa76   :  { %v1466_v5 = vsub.f32 1.0, %v4316_v2 }
 0xa77   :  { %3702 = vmatpush3.bf16.msra.mxu0 %v6198_v35 }
 0xa78   :  { %3703 = vmatprep.subr.bf16.mxu0 %v6199_v36 }
 0xa7b   :  { %3704 = vmatpush3.bf16.msra.mxu0 %v6200_v37 }
 0xa7c   :  { %3705 = vmatprep.subr.bf16.mxu0 %v6201_v38 }
 0xa7f   :  { %3706 = vmatpush3.bf16.msra.mxu0 %v6202_v39 }
 0xa80   :  { %3707 = vmatprep.subr.bf16.mxu0 %v6203_v3 }
 0xa83   :  { %3708 = vmatpush3.bf16.msra.mxu0 %v6204_v55 }
 0xa84   :  { %3709 = vmatprep.subr.bf16.mxu0 %v6205_v58 }
 0xa87   :  { %3710 = vmatpush3.bf16.msra.mxu0 %v6206_v54 }
 0xa88   :  { %3711 = vmatprep.subr.bf16.mxu0 %v6207_v63 }
 0xa8b   :  { %3712 = vmatpush3.bf16.msra.mxu0 %v6208_v18 }
 0xa8c   :  { %3957 = vmatprep.subr.bf16.mxu0 %v6180_v62 }
 0xb41   :  { %v1410_v42 = vpop.f32.mrb[36].mxu0 }
 0xb42   :  { %v3955_v51 = vpop.f32.mrb[37].mxu0 }
 0xb43   :  { %v1413_v17 = vpop.f32.mrb[38].mxu0 }
 0xb44   :  { %v1417_v0 = vpack.c.bf16 %v1413_v17, %v1410_v42  ;;  %v3956_v44 = vpop.f32.mrb[39].mxu0  ;;  %v1464_v17 = vmul.f32 %v4316_v2, %v5051_v22  ;;  %v5303_v2 = vld [vmem:[%s6057_s4 + $0xa0] ss:$8 sps:$4 sm:$0xff]  }
 0xb45   :  { %6217 = vst [vmem:[#allocation10_spill] sm:$0xff] %v5303_v2 }
 0xb46   :  { %1450 = vmatprep.mubr.bf16.mxu0 %v1417_v0 }
 0xb47   :  { %1451 = vmatmul.mubr.bf16.vlgmr.msra.gmra.mrb[40].mxu0 %v1375_v32  ;;  %v1463_v32 = vmul.f32 %v4314_v29, %v5049_v40  ;;  %v5297_v29 = vld [vmem:[%s6057_s4 + $0xa4] ss:$8 sps:$4 sm:$0xff]  }
 0xb48   :  { %3958 = vmatpush3.bf16.msra.mxu0 %v4248_v19  ;;  %3959 = vmatprep.mubr.msk.bf16.mxu0 %vm4504_vm0, %v6180_v62  ;;  %6216 = vst [vmem:[#allocation9_spill] sm:$0xff] %v5297_v29 }
 0xb49   :  { %3559 = vmatprep.subr.msk.bf16.mxu0 %vm192_vm2, %v6209_v59 }
 0xb4f   :  { %3960 = vmatmul.mubr.msk.bf16.vlgmr.msra.gmra.mrb[44].mxu0 %vm128_vm1, %v5113_v33 }
 0xb50   :  { %1535 = vmatpush1.bf16.msra.mxu0 %v6210_v61  ;;  %1566 = vmatprep.mubr.bf16.mxu0 %v6211_v50 }
 0xb51   :  { %3963 = vmatprep.subr.bf16.mxu0 %v6180_v62 }
 0xc1a   :  { %v3713_v10 = vpop.f32.mrb[40].mxu0 }
 0xc1b   :  { %v3714_v11 = vpop.f32.mrb[41].mxu0 }
 0xc1c   :  { %v3715_v14 = vadd.f32 %v3714_v11, %v3713_v10  ;;  %v3716_v16 = vpop.f32.mrb[42].mxu0  ;;  %v5207_v10 = vld [vmem:[%s6057_s4 + $0x20] ss:$8 sps:$4 sm:$0xff]   ;;  %v5213_v11 = vld [vmem:[%s6057_s4 + $0x34] ss:$8 sps:$4 sm:$0xff]  }
 0xc1d   :  { %v3717_v20 = vpop.f32.mrb[43].mxu0 }
 0xc1e   :  { %v1459_v15 = vadd.f32 %v3715_v14, %v1253_v13  ;;  %v3718_v21 = vadd.f32 %v3717_v20, %v3716_v16  ;;  %v5219_v13 = vld [vmem:[%s6057_s4 + $0x30] ss:$8 sps:$4 sm:$0xff]   ;;  %v5225_v14 = vld [vmem:[%s6057_s4 + $0x44] ss:$8 sps:$4 sm:$0xff]   ;;  %v5231_v16 = vld [vmem:[%s6057_s4 + $0x40] ss:$8 sps:$4 sm:$0xff]  }
 0xc1f   :  { %v5237_v20 = vld [vmem:[%s6057_s4 + $0x54] ss:$8 sps:$4 sm:$0xff]  }
 0xc20   :  { %4317 = vtanh.f32 %v1459_v15  ;;  %v1460_v23 = vadd.f32 %v3718_v21, %v1256_v12  ;;  %v5243_v12 = vld [vmem:[%s6057_s4 + $0x50] ss:$8 sps:$4 sm:$0xff]   ;;  %v5249_v15 = vld [vmem:[%s6057_s4 + $0x64] ss:$8 sps:$4 sm:$0xff]   ;;  %v5255_v21 = vld [vmem:[%s6057_s4 + $0x60] ss:$8 sps:$4 sm:$0xff]  }
 0xc22   :  { %4319 = vtanh.f32 %v1460_v23  ;;  %v1518_v24 = vpop.f32.mrb[44].mxu0  ;;  %v5261_v23 = vld [vmem:[%s6057_s4 + $0x74] ss:$8 sps:$4 sm:$0xff]  }
 0xc23   :  { %v3961_v25 = vpop.f32.mrb[45].mxu0 }
 0xc24   :  { %v1521_v26 = vpop.f32.mrb[46].mxu0  ;;  %v5273_v25 = vld [vmem:[%s6057_s4 + $0x84] ss:$8 sps:$4 sm:$0xff]  }
 0xc25   :  { %v1525_v27 = vpack.c.bf16 %v1521_v26, %v1518_v24  ;;  %v3962_v28 = vpop.f32.mrb[47].mxu0  ;;  %v5267_v24 = vld [vmem:[%s6057_s4 + $0x70] ss:$8 sps:$4 sm:$0xff]   ;;  %v5279_v26 = vld [vmem:[%s6057_s4 + $0x80] ss:$8 sps:$4 sm:$0xff]  }
 0xc26   :  { %v5291_v28 = vld [vmem:[%s6057_s4 + $0x90] ss:$8 sps:$4 sm:$0xff]  }
 0xc27   :  { %1527 = vrot.lane.b32.xlu1 %v1525_v27, %s4506_s9  ;;  %v5285_v27 = vld [vmem:[%s6057_s4 + $0x94] ss:$8 sps:$4 sm:$0xff]   ;;  %6215 = vst [vmem:[#allocation8_spill] sm:$0xff] %v5291_v28 }
 0xc2a   :  { %v4318_v31 = vpop.eup %4317 }
 0xc2b   :  { %v1467_v42 = vmul.f32 %v4318_v31, %v1465_v30  ;;  %v5309_v30 = vld [vmem:[%s6057_s4 + $0xb4] ss:$8 sps:$4 sm:$0xff]   ;;  %v5315_v31 = vld [vmem:[%s6057_s4 + $0xb0] ss:$8 sps:$4 sm:$0xff]  }
 0xc2c   :  { %v4320_v51 = vpop.eup %4319  ;;  %6218 = vst [vmem:[#allocation11_spill] sm:$0xff] %v5309_v30  ;;  %6219 = vst [vmem:[#allocation12_spill] sm:$0xff] %v5315_v31 }
 0xc2d   :  { %v1468_v0 = vmul.f32 %v4320_v51, %v1466_v5  ;;  %v5154_v44 = vadd.f32 %v1467_v42, %v1463_v32  ;;  %v5321_v32 = vld [vmem:[%s6057_s4 + $0xc4] ss:$8 sps:$4 sm:$0xff]   ;;  %v5327_v5 = vld [vmem:[%s6057_s4 + $0xc0] ss:$8 sps:$4 sm:$0xff]   ;;  %v5333_v42 = vld [vmem:[%s6057_s4 + $0xd4] ss:$8 sps:$4 sm:$0xff]  }
 0xc2e   :  { %6220 = vst [vmem:[#allocation13_spill] sm:$0xff] %v5321_v32  ;;  %6221 = vst [vmem:[#allocation14_spill] sm:$0xff] %v5327_v5  ;;  %v5339_v51 = vld [vmem:[%s6057_s4 + $0xd0] ss:$8 sps:$4 sm:$0xff]  }
 0xc2f   :  { %6213 = vst [vmem:[#allocation6_spill] sm:$0xff] %v5154_v44  ;;  %v5156_v56 = vadd.f32 %v1468_v0, %v1464_v17  ;;  %6222 = vst [vmem:[#allocation15_spill] sm:$0xff] %v5333_v42  ;;  %v5345_v17 = vld [vmem:[%s6057_s4 + $0xe4] ss:$8 sps:$4 sm:$0xff]   ;;  %v5351_v0 = vld [vmem:[%s6057_s4 + $0xe0] ss:$8 sps:$4 sm:$0xff]  }
 0xc30   :  { %6223 = vst [vmem:[#allocation16_spill] sm:$0xff] %v5339_v51  ;;  %6224 = vst [vmem:[#allocation17_spill] sm:$0xff] %v5345_v17 }
 0xc31   :  { %6214 = vst [vmem:[#allocation7_spill] sm:$0xff] %v5156_v56  ;;  %v5166_v4 = vpack.c.bf16 %v5156_v56, %v5154_v44  ;;  %6225 = vst [vmem:[#allocation22_spill] sm:$0xff] %v5351_v0 }
 0xc99   :  { %v1528_v60 = vpop.permute.xlu1 %1527 }
 0xc9a   :  { %v1531_v49 = vsel %vm177_vm3, %v4248_v19, %v1528_v60  ;;  %v5175_v19 = vld [vmem:[%s6057_s4 + $0x4] ss:$8 sps:$4 sm:$0xff]   ;;  %v5357_v60 = vld [vmem:[%s6057_s4 + $0xf4] ss:$8 sps:$4 sm:$0xff]  }
 0xc9b   :  { %3560 = vmatmul.mubr.msk.bf16.vlgmr.msra.gmra.mrb[48].mxu0 %vm189_vm4, %v1531_v49  ;;  %6226 = vst [vmem:[#allocation23_spill] sm:$0xff] %v5357_v60 }
 0xc9c   :  { %3964 = vmatpush3.bf16.msra.mxu0 %v4788_v52  ;;  %3965 = vmatprep.mubr.msk.bf16.mxu0 %vm4504_vm0, %v6180_v62 }
 0xc9d   :  { %3969 = vmatprep.subr.bf16.mxu0 %v6180_v62 }
 0xca3   :  { %3966 = vmatmul.mubr.msk.bf16.vlgmr.msra.gmra.mrb[52].mxu0 %vm189_vm4, %v1531_v49  ;;  %v5363_v49 = vld [vmem:[%s6057_s4 + $0xf0] ss:$8 sps:$4 sm:$0xff]  }
 0xca4   :  { %3970 = vmatpush3.bf16.msra.mxu0 %v5166_v4  ;;  %3971 = vmatprep.mubr.msk.bf16.mxu0 %vm4504_vm0, %v6180_v62  ;;  %6227 = vst [vmem:[#allocation24_spill] sm:$0xff] %v5363_v49 }
 0xca5   :  { %1661 = vmatprep.subr.bf16.mxu0 %v5175_v19 }
 0xcab   :  { %3972 = vmatmul.mubr.msk.bf16.vlgmr.msra.gmra.mrb[56].mxu0 %vm128_vm1, %v5113_v33 }
 0xcac   :  { %1662 = vmatpush1.bf16.msra.mxu0 %v5183_v6 }
 0xcad   :  { %1663 = vmatprep.subr.bf16.mxu0 %v5189_v7 }
 0xcb0   :  { %1664 = vmatpush1.bf16.msra.mxu0 %v5195_v8 }
 0xcb1   :  { %1665 = vmatprep.subr.bf16.mxu0 %v5201_v9 }
 0xcb4   :  { %1666 = vmatpush1.bf16.msra.mxu0 %v5207_v10 }
 0xcb5   :  { %1667 = vmatprep.subr.bf16.mxu0 %v5213_v11 }
 0xcb8   :  { %1668 = vmatpush1.bf16.msra.mxu0 %v5219_v13 }
 0xcb9   :  { %1669 = vmatprep.subr.bf16.mxu0 %v5225_v14 }
 0xcbc   :  { %1670 = vmatpush1.bf16.msra.mxu0 %v5231_v16 }
 0xcbd   :  { %1671 = vmatprep.subr.bf16.mxu0 %v5237_v20 }
 0xcc0   :  { %1672 = vmatpush1.bf16.msra.mxu0 %v5243_v12 }
 0xcc1   :  { %1673 = vmatprep.subr.bf16.mxu0 %v5249_v15 }
 0xcc4   :  { %1674 = vmatpush1.bf16.msra.mxu0 %v5255_v21 }
 0xcc5   :  { %1675 = vmatprep.subr.bf16.mxu0 %v5261_v23 }
 0xcc8   :  { %1676 = vmatpush1.bf16.msra.mxu0 %v5267_v24 }
 0xcc9   :  { %1677 = vmatprep.subr.bf16.mxu0 %v5273_v25 }
 0xccc   :  { %1678 = vmatpush1.bf16.msra.mxu0 %v5279_v26 }
 0xccd   :  { %1679 = vmatprep.subr.bf16.mxu0 %v5285_v27 }
 0xcd0   :  { %1680 = vmatpush1.bf16.msra.mxu0 %v5291_v28 }
 0xcd1   :  { %1681 = vmatprep.subr.bf16.mxu0 %v5297_v29 }
 0xcd4   :  { %1682 = vmatpush1.bf16.msra.mxu0 %v5303_v2 }
 0xcd5   :  { %1683 = vmatprep.subr.bf16.mxu0 %v5309_v30 }
 0xcd8   :  { %1684 = vmatpush1.bf16.msra.mxu0 %v5315_v31 }
 0xcd9   :  { %1685 = vmatprep.subr.bf16.mxu0 %v5321_v32 }
 0xcdc   :  { %1686 = vmatpush1.bf16.msra.mxu0 %v5327_v5 }
 0xcdd   :  { %1687 = vmatprep.subr.bf16.mxu0 %v5333_v42 }
 0xce0   :  { %1688 = vmatpush1.bf16.msra.mxu0 %v5339_v51 }
 0xce1   :  { %1689 = vmatprep.subr.bf16.mxu0 %v5345_v17 }
 0xce4   :  { %1690 = vmatpush1.bf16.msra.mxu0 %v5351_v0 }
 0xce5   :  { %1691 = vmatprep.subr.bf16.mxu0 %v5357_v60 }
 0xce8   :  { %1692 = vmatpush1.bf16.msra.mxu0 %v5363_v49 }
 0xce9   :  { %3999 = vmatprep.subr.bf16.mxu0 %v6180_v62 }
 0xd76   :  { %v5367_v40 = vpop.f32.mrb[52].mxu0 }
 0xd77   :  { %v3967_v22 = vpop.f32.mrb[53].mxu0 }
 0xd78   :  { %v5369_v43 = vpop.f32.mrb[54].mxu0 }
 0xd79   :  { %v3968_v48 = vpop.f32.mrb[55].mxu0 }
 0xd7e   :  { %v1653_v0 = vpop.f32.mrb[56].mxu0 }
 0xd7f   :  { %v3973_v17 = vpop.f32.mrb[57].mxu0 }
 0xd80   :  { %v1656_v51 = vpop.f32.mrb[58].mxu0 }
 0xd81   :  { %v1660_v42 = vpack.c.bf16 %v1656_v51, %v1653_v0  ;;  %v3974_v60 = vpop.f32.mrb[59].mxu0 }
 0xd83   :  { %1693 = vmatprep.mubr.bf16.mxu0 %v1660_v42 }
 0xd84   :  { %1694 = vmatmul.mubr.bf16.vlgmr.msra.gmra.mrb[48].mxu0 %v5166_v4 }
 0xd85   :  { %4001 = vmatprep.mubr.msk.bf16.mxu0 %vm4504_vm0, %v6180_v62 }
 0xe57   :  { %v1695_v49 = vpop.f32.mrb[48].mxu0 }
 0xe58   :  { %v1697_v5 = vpop.f32.mrb[49].mxu0 }
 0xe59   :  { %v4126_v32 = vadd.f32 %v1697_v5, %v4813_v1  ;;  %v1699_v31 = vpop.f32.mrb[50].mxu0 }
 0xe5a   :  { %v1701_v22 = vpop.f32.mrb[51].mxu0 }
 0xe5b   :  { %v3565_v30 = vmul.f32 -1.442695, %v4126_v32  ;;  %v4128_v48 = vadd.f32 %v1701_v22, %v4813_v1 }
 0xe5d   :  { %4321 = vpow2.f32 %v3565_v30  ;;  %v3566_v17 = vmul.f32 -1.442695, %v4128_v48 }
 0xe5f   :  { %4323 = vpow2.f32 %v3566_v17 }
 0xe67   :  { %v4322_v51 = vpop.eup %4321 }
 0xe68   :  { %v1726_v0 = vadd.f32 1.0, %v4322_v51 }
 0xe69   :  { %v4324_v42 = vpop.eup %4323 }
 0xe6a   :  { %4325 = vrcp.f32 %v1726_v0  ;;  %v1727_v4 = vadd.f32 1.0, %v4324_v42 }
 0xe6c   :  { %4327 = vrcp.f32 %v1727_v4 }
 0xe74   :  { %v4326_v60 = vpop.eup %4325 }
 0xe75   :  { %v1732_v29 = vmul.f32 %v4326_v60, %v5154_v44 }
 0xe76   :  { %v4328_v2 = vpop.eup %4327 }
 0xe77   :  { %v1733_v5 = vmul.f32 %v4328_v2, %v5156_v56 }
 0xe79   :  { %v1734_v28 = vpack.c.bf16 %v1733_v5, %v1732_v29 }
 0xe7b   :  { %3976 = vmatpush3.bf16.msra.mxu1 %v1734_v28 }
 0xe7c   :  { %3727 = vmatprep.subr.bf16.mxu1 %v4830_v57 }
 0xe7e   :  { %3978 = vmatmul.mubr.msk.bf16.vlgmr.msra.gmra.mrb[32].mxu1 %vm128_vm1, %v5113_v33 }
 0xe7f   :  { %3728 = vmatpush3.bf16.msra.mxu1 %v4835_v45 }
 0xe80   :  { %3729 = vmatprep.subr.bf16.mxu1 %v4841_v46 }
 0xe83   :  { %3730 = vmatpush3.bf16.msra.mxu1 %v4849_v47 }
 0xe84   :  { %3731 = vmatprep.subr.bf16.mxu1 %v6197_v34 }
 0xe87   :  { %3732 = vmatpush3.bf16.msra.mxu1 %v6198_v35  ;;  %v4249_v35 = vld [vmem:[%s6055_s0 + $0x20] sm:$0xff]  }
 0xe88   :  { %3733 = vmatprep.subr.bf16.mxu1 %v6199_v36  ;;  %v4125_v36 = vadd.f32 %v1695_v49, %v6212_v53 }
 0xe8b   :  { %3734 = vmatpush3.bf16.msra.mxu1 %v6200_v37  ;;  %v4127_v37 = vadd.f32 %v1699_v31, %v6212_v53  ;;  %v1615_v31 = vadd.f32 %v5369_v43, %v4942_v41 }
 0xe8c   :  { %3735 = vmatprep.subr.bf16.mxu1 %v6201_v38  ;;  %v3563_v38 = vmul.f32 -1.442695, %v4125_v36 }
 0xe8e   :  { %4329 = vpow2.f32 %v3563_v38 }
 0xe8f   :  { %3736 = vmatpush3.bf16.msra.mxu1 %v6202_v39  ;;  %v3564_v39 = vmul.f32 -1.442695, %v4127_v37 }
 0xe90   :  { %3737 = vmatprep.subr.bf16.mxu1 %v6203_v3 }
 0xe91   :  { %4331 = vpow2.f32 %v3564_v39 }
 0xe93   :  { %3738 = vmatpush3.bf16.msra.mxu1 %v6204_v55 }
 0xe94   :  { %3739 = vmatprep.subr.bf16.mxu1 %v6205_v58 }
 0xe97   :  { %3740 = vmatpush3.bf16.msra.mxu1 %v6206_v54 }
 0xe98   :  { %3741 = vmatprep.subr.bf16.mxu1 %v6207_v63  ;;  %v4330_v3 = vpop.eup %4329 }
 0xe99   :  { %v1712_v58 = vadd.f32 1.0, %v4330_v3 }
 0xe9b   :  { %3742 = vmatpush3.bf16.msra.mxu1 %v6208_v18  ;;  %v4332_v55 = vpop.eup %4331  ;;  %4333 = vrcp.f32 %v1712_v58  ;;  %v6232_v58 = vld [vmem:[#allocation10_spill] sm:$0xff] }
 0xe9c   :  { %3981 = vmatprep.subr.bf16.mxu1 %v6180_v62  ;;  %v1713_v54 = vadd.f32 1.0, %v4332_v55  ;;  %v6231_v55 = vld [vmem:[#allocation9_spill] sm:$0xff] }
 0xe9e   :  { %4335 = vrcp.f32 %v1713_v54  ;;  %v6233_v54 = vld [vmem:[#allocation11_spill] sm:$0xff] }
 0xea5   :  { %v4334_v4 = vpop.eup %4333 }
 0xea6   :  { %v1824_v60 = vsub.f32 1.0, %v4334_v4 }
 0xf51   :  { %v1769_v57 = vpop.f32.mrb[32].mxu1 }
 0xf52   :  { %v3979_v45 = vpop.f32.mrb[33].mxu1 }
 0xf53   :  { %v1772_v46 = vpop.f32.mrb[34].mxu1 }
 0xf54   :  { %v1776_v47 = vpack.c.bf16 %v1772_v46, %v1769_v57  ;;  %v3980_v34 = vpop.f32.mrb[35].mxu1  ;;  %v1822_v57 = vmul.f32 %v4334_v4, %v5154_v44  ;;  %v5571_v44 = vld [vmem:[%s6059_s5 + $0x78] sm:$0xff]  }
 0xf56   :  { %1809 = vmatprep.mubr.bf16.mxu1 %v1776_v47 }
 0xf57   :  { %1810 = vmatmul.mubr.bf16.vlgmr.msra.gmra.mrb[36].mxu1 %v1734_v28  ;;  %v1612_v28 = vadd.f32 %v5367_v40, %v4942_v41  ;;  %v4336_v40 = vpop.eup %4335 }
 0xf58   :  { %3982 = vmatpush3.bf16.msra.mxu1 %v4249_v35  ;;  %3983 = vmatprep.mubr.msk.bf16.mxu1 %vm4504_vm0, %v6180_v62  ;;  %v1825_v43 = vsub.f32 1.0, %v4336_v40  ;;  %v1823_v47 = vmul.f32 %v4336_v40, %v5156_v56  ;;  %v5577_v56 = vld [vmem:[%s6059_s5 + $0x38] sm:$0xff]  }
 0xf59   :  { %3572 = vmatprep.subr.msk.bf16.mxu1 %vm192_vm2, %v6209_v59 }
 0xf5f   :  { %3984 = vmatmul.mubr.msk.bf16.vlgmr.msra.gmra.mrb[40].mxu1 %vm128_vm1, %v5113_v33 }
 0xf60   :  { %1894 = vmatpush1.bf16.msra.mxu1 %v6210_v61  ;;  %1925 = vmatprep.mubr.bf16.mxu1 %v6211_v50 }
 0xf61   :  { %3987 = vmatprep.subr.bf16.mxu1 %v6180_v62 }
0x102a   :  { %v3743_v63 = vpop.f32.mrb[36].mxu1 }
0x102b   :  { %v3744_v18 = vpop.f32.mrb[37].mxu1 }
0x102c   :  { %v3745_v29 = vadd.f32 %v3744_v18, %v3743_v63  ;;  %v3746_v2 = vpop.f32.mrb[38].mxu1  ;;  %v6234_v63 = vld [vmem:[#allocation12_spill] sm:$0xff]  ;;  %v6235_v18 = vld [vmem:[#allocation13_spill] sm:$0xff] }
0x102d   :  { %v3747_v30 = vpop.f32.mrb[39].mxu1 }
0x102e   :  { %v1818_v32 = vadd.f32 %v3745_v29, %v1612_v28  ;;  %v3748_v49 = vadd.f32 %v3747_v30, %v3746_v2  ;;  %v6236_v28 = vld [vmem:[#allocation14_spill] sm:$0xff]  ;;  %v6237_v29 = vld [vmem:[#allocation15_spill] sm:$0xff]  ;;  %v6238_v2 = vld [vmem:[#allocation16_spill] sm:$0xff] }
0x102f   :  { %v6239_v30 = vld [vmem:[#allocation17_spill] sm:$0xff] }
0x1030   :  { %4337 = vtanh.f32 %v1818_v32  ;;  %v1819_v22 = vadd.f32 %v3748_v49, %v1615_v31  ;;  %v6240_v31 = vld [vmem:[#allocation22_spill] sm:$0xff]  ;;  %v6241_v32 = vld [vmem:[#allocation23_spill] sm:$0xff]  ;;  %v6242_v49 = vld [vmem:[#allocation24_spill] sm:$0xff] }
0x1031   :  { %6253 = vst [vmem:[#allocation22_spill] sm:$0xff] %v5571_v44  ;;  %6254 = vst [vmem:[#allocation23_spill] sm:$0xff] %v5577_v56 }
0x1032   :  { %4339 = vtanh.f32 %v1819_v22  ;;  %v1877_v48 = vpop.f32.mrb[40].mxu1 }
0x1033   :  { %v3985_v17 = vpop.f32.mrb[41].mxu1 }
0x1034   :  { %v1880_v51 = vpop.f32.mrb[42].mxu1 }
0x1035   :  { %v1884_v0 = vpack.c.bf16 %v1880_v51, %v1877_v48  ;;  %v3986_v42 = vpop.f32.mrb[43].mxu1 }
0x1037   :  { %1886 = vrot.lane.b32.xlu0 %v1884_v0, %s4506_s9 }
0x103a   :  { %v4338_v5 = vpop.eup %4337 }
0x103b   :  { %v1826_v45 = vmul.f32 %v4338_v5, %v1824_v60 }
0x103c   :  { %v4340_v46 = vpop.eup %4339 }
0x103d   :  { %v1827_v34 = vmul.f32 %v4340_v46, %v1825_v43  ;;  %v5418_v36 = vadd.f32 %v1826_v45, %v1822_v57 }
0x103f   :  { %6228 = vst [vmem:[#allocation25_spill] sm:$0xff] %v5418_v36  ;;  %v5420_v37 = vadd.f32 %v1827_v34, %v1823_v47 }
0x1041   :  { %6229 = vst [vmem:[#allocation26_spill] sm:$0xff] %v5420_v37  ;;  %v1977_v3 = vpack.c.bf16 %v5420_v37, %v5418_v36 }
0x10a9   :  { %v1887_v38 = vpop.permute.xlu0 %1886 }
0x10aa   :  { %v1890_v39 = vsel %vm177_vm3, %v4249_v35, %v1887_v38  ;;  %v6230_v35 = vld [vmem:[#allocation8_spill] sm:$0xff] }
0x10ab   :  { %3573 = vmatmul.mubr.msk.bf16.vlgmr.msra.gmra.mrb[44].mxu1 %vm189_vm4, %v1890_v39 }
0x10ac   :  { %3988 = vmatpush3.bf16.msra.mxu1 %v4788_v52  ;;  %3989 = vmatprep.mubr.msk.bf16.mxu1 %vm4504_vm0, %v6180_v62 }
0x10ad   :  { %3993 = vmatprep.subr.bf16.mxu1 %v6180_v62 }
0x10b3   :  { %3990 = vmatmul.mubr.msk.bf16.vlgmr.msra.gmra.mrb[48].mxu1 %vm189_vm4, %v1890_v39 }
0x10b4   :  { %3994 = vmatpush3.bf16.msra.mxu1 %v1977_v3  ;;  %3995 = vmatprep.mubr.msk.bf16.mxu1 %vm4504_vm0, %v6180_v62 }
0x10b5   :  { %2020 = vmatprep.subr.bf16.mxu1 %v5175_v19 }
0x10bb   :  { %3996 = vmatmul.mubr.msk.bf16.vlgmr.msra.gmra.mrb[52].mxu1 %vm128_vm1, %v5113_v33 }
0x10bc   :  { %2021 = vmatpush1.bf16.msra.mxu1 %v5183_v6 }
0x10bd   :  { %2022 = vmatprep.subr.bf16.mxu1 %v5189_v7 }
0x10c0   :  { %2023 = vmatpush1.bf16.msra.mxu1 %v5195_v8 }
0x10c1   :  { %2024 = vmatprep.subr.bf16.mxu1 %v5201_v9 }
0x10c4   :  { %2025 = vmatpush1.bf16.msra.mxu1 %v5207_v10 }
0x10c5   :  { %2026 = vmatprep.subr.bf16.mxu1 %v5213_v11 }
0x10c8   :  { %2027 = vmatpush1.bf16.msra.mxu1 %v5219_v13 }
0x10c9   :  { %2028 = vmatprep.subr.bf16.mxu1 %v5225_v14 }
0x10cc   :  { %2029 = vmatpush1.bf16.msra.mxu1 %v5231_v16 }
0x10cd   :  { %2030 = vmatprep.subr.bf16.mxu1 %v5237_v20 }
0x10d0   :  { %2031 = vmatpush1.bf16.msra.mxu1 %v5243_v12 }
0x10d1   :  { %2032 = vmatprep.subr.bf16.mxu1 %v5249_v15 }
0x10d4   :  { %2033 = vmatpush1.bf16.msra.mxu1 %v5255_v21 }
0x10d5   :  { %2034 = vmatprep.subr.bf16.mxu1 %v5261_v23 }
0x10d8   :  { %2035 = vmatpush1.bf16.msra.mxu1 %v5267_v24 }
0x10d9   :  { %2036 = vmatprep.subr.bf16.mxu1 %v5273_v25 }
0x10dc   :  { %2037 = vmatpush1.bf16.msra.mxu1 %v5279_v26 }
0x10dd   :  { %2038 = vmatprep.subr.bf16.mxu1 %v5285_v27 }
0x10e0   :  { %2039 = vmatpush1.bf16.msra.mxu1 %v6230_v35 }
0x10e1   :  { %2040 = vmatprep.subr.bf16.mxu1 %v6231_v55 }
0x10e4   :  { %2041 = vmatpush1.bf16.msra.mxu1 %v6232_v58 }
0x10e5   :  { %2042 = vmatprep.subr.bf16.mxu1 %v6233_v54 }
0x10e8   :  { %2043 = vmatpush1.bf16.msra.mxu1 %v6234_v63 }
0x10e9   :  { %2044 = vmatprep.subr.bf16.mxu1 %v6235_v18 }
0x10ec   :  { %2045 = vmatpush1.bf16.msra.mxu1 %v6236_v28 }
0x10ed   :  { %2046 = vmatprep.subr.bf16.mxu1 %v6237_v29 }
0x10f0   :  { %2047 = vmatpush1.bf16.msra.mxu1 %v6238_v2 }
0x10f1   :  { %2048 = vmatprep.subr.bf16.mxu1 %v6239_v30 }
0x10f4   :  { %2049 = vmatpush1.bf16.msra.mxu1 %v6240_v31 }
0x10f5   :  { %2050 = vmatprep.subr.bf16.mxu1 %v6241_v32 }
0x10f8   :  { %2051 = vmatpush1.bf16.msra.mxu1 %v6242_v49 }
0x10f9   :  { %4023 = vmatprep.subr.bf16.mxu1 %v6180_v62 }
0x1186   :  { %v5468_v22 = vpop.f32.mrb[48].mxu1 }
0x1187   :  { %v3991_v48 = vpop.f32.mrb[49].mxu1 }
0x1188   :  { %v5470_v17 = vpop.f32.mrb[50].mxu1 }
0x1189   :  { %v3992_v51 = vpop.f32.mrb[51].mxu1 }
0x118e   :  { %v2012_v0 = vpop.f32.mrb[52].mxu1 }
0x118f   :  { %v3997_v42 = vpop.f32.mrb[53].mxu1 }
0x1190   :  { %v2015_v4 = vpop.f32.mrb[54].mxu1 }
0x1191   :  { %v2019_v40 = vpack.c.bf16 %v2015_v4, %v2012_v0  ;;  %v3998_v60 = vpop.f32.mrb[55].mxu1 }
0x1193   :  { %2052 = vmatprep.mubr.bf16.mxu1 %v2019_v40 }
0x1194   :  { %2053 = vmatmul.mubr.bf16.vlgmr.msra.gmra.mrb[44].mxu1 %v1977_v3 }
0x1195   :  { %4025 = vmatprep.mubr.msk.bf16.mxu1 %vm4504_vm0, %v6180_v62 }
0x1267   :  { %v5474_v5 = vpop.f32.mrb[44].mxu1 }
0x1268   :  { %v2056_v57 = vpop.f32.mrb[45].mxu1 }
0x1269   :  { %v4130_v43 = vadd.f32 %v2056_v57, %v4813_v1  ;;  %v5477_v45 = vpop.f32.mrb[46].mxu1  ;;  %v5485_v57 = vld [vmem:[%s6059_s5 + $0x40] sm:$0xff]  }
0x126a   :  { %v2060_v46 = vpop.f32.mrb[47].mxu1 }
0x126b   :  { %v3578_v47 = vmul.f32 -1.442695, %v4130_v43  ;;  %v4132_v34 = vadd.f32 %v2060_v46, %v4813_v1  ;;  %v5493_v43 = vld [vmem:[%s6059_s5] sm:$0xff]   ;;  %v5499_v46 = vld [vmem:[%s6059_s5 + $0x48] sm:$0xff]  }
0x126d   :  { %4341 = vpow2.f32 %v3578_v47  ;;  %v3579_v38 = vmul.f32 -1.442695, %v4132_v34  ;;  %v5505_v47 = vld [vmem:[%s6059_s5 + $0x8] sm:$0xff]   ;;  %v5511_v34 = vld [vmem:[%s6059_s5 + $0x50] sm:$0xff]  }
0x126e   :  { %6243 = vst [vmem:[#allocation8_spill] sm:$0xff] %v5511_v34 }
0x126f   :  { %4343 = vpow2.f32 %v3579_v38  ;;  %v5517_v38 = vld [vmem:[%s6059_s5 + $0x10] sm:$0xff]  }
0x1270   :  { %6244 = vst [vmem:[#allocation9_spill] sm:$0xff] %v5517_v38 }
0x1277   :  { %v4342_v39 = vpop.eup %4341 }
0x1278   :  { %v2085_v48 = vadd.f32 1.0, %v4342_v39  ;;  %v5523_v39 = vld [vmem:[%s6059_s5 + $0x58] sm:$0xff]  }
0x1279   :  { %v4344_v3 = vpop.eup %4343  ;;  %6245 = vst [vmem:[#allocation10_spill] sm:$0xff] %v5523_v39 }
0x127a   :  { %4345 = vrcp.f32 %v2085_v48  ;;  %v2086_v51 = vadd.f32 1.0, %v4344_v3  ;;  %v5529_v48 = vld [vmem:[%s6059_s5 + $0x18] sm:$0xff]   ;;  %v5535_v3 = vld [vmem:[%s6059_s5 + $0x60] sm:$0xff]  }
0x127b   :  { %6246 = vst [vmem:[#allocation11_spill] sm:$0xff] %v5529_v48  ;;  %6247 = vst [vmem:[#allocation12_spill] sm:$0xff] %v5535_v3 }
0x127c   :  { %4347 = vrcp.f32 %v2086_v51  ;;  %v5541_v51 = vld [vmem:[%s6059_s5 + $0x20] sm:$0xff]  }
0x127d   :  { %6248 = vst [vmem:[#allocation13_spill] sm:$0xff] %v5541_v51 }
0x1284   :  { %v4346_v0 = vpop.eup %4345 }
0x1285   :  { %v2091_v4 = vmul.f32 %v4346_v0, %v5418_v36  ;;  %v5547_v0 = vld [vmem:[%s6059_s5 + $0x68] sm:$0xff]  }
0x1286   :  { %v4348_v42 = vpop.eup %4347  ;;  %6249 = vst [vmem:[#allocation14_spill] sm:$0xff] %v5547_v0 }
0x1287   :  { %v2092_v40 = vmul.f32 %v4348_v42, %v5420_v37  ;;  %v5553_v42 = vld [vmem:[%s6059_s5 + $0x28] sm:$0xff]  }
0x1288   :  { %6250 = vst [vmem:[#allocation15_spill] sm:$0xff] %v5553_v42 }
0x1289   :  { %v2093_v60 = vpack.c.bf16 %v2092_v40, %v2091_v4  ;;  %v5559_v4 = vld [vmem:[%s6059_s5 + $0x70] sm:$0xff]  }
0x128a   :  { %6251 = vst [vmem:[#allocation16_spill] sm:$0xff] %v5559_v4  ;;  %v5565_v40 = vld [vmem:[%s6059_s5 + $0x30] sm:$0xff]  }
0x128b   :  { %4000 = vmatpush3.bf16.msra.mxu0 %v2093_v60  ;;  %6252 = vst [vmem:[#allocation17_spill] sm:$0xff] %v5565_v40 }
0x128c   :  { %3757 = vmatprep.subr.bf16.mxu0 %v5485_v57 }
0x128e   :  { %4002 = vmatmul.mubr.msk.bf16.vlgmr.msra.gmra.mrb[60].mxu0 %vm128_vm1, %v5113_v33 }
0x128f   :  { %3758 = vmatpush3.bf16.msra.mxu0 %v5493_v43 }
0x1290   :  { %3759 = vmatprep.subr.bf16.mxu0 %v5499_v46 }
0x1293   :  { %3760 = vmatpush3.bf16.msra.mxu0 %v5505_v47 }
0x1294   :  { %3761 = vmatprep.subr.bf16.mxu0 %v5511_v34 }
0x1297   :  { %3762 = vmatpush3.bf16.msra.mxu0 %v5517_v38 }
0x1298   :  { %3763 = vmatprep.subr.bf16.mxu0 %v5523_v39 }
0x129b   :  { %3764 = vmatpush3.bf16.msra.mxu0 %v5529_v48 }
0x129c   :  { %3765 = vmatprep.subr.bf16.mxu0 %v5535_v3  ;;  %v4250_v3 = vld [vmem:[%s6055_s0 + $0x28] sm:$0xff]  }
0x129f   :  { %3766 = vmatpush3.bf16.msra.mxu0 %v5541_v51 }
0x12a0   :  { %3767 = vmatprep.subr.bf16.mxu0 %v5547_v0 }
0x12a3   :  { %3768 = vmatpush3.bf16.msra.mxu0 %v5553_v42 }
0x12a4   :  { %3769 = vmatprep.subr.bf16.mxu0 %v5559_v4 }
0x12a7   :  { %3770 = vmatpush3.bf16.msra.mxu0 %v5565_v40 }
0x12a8   :  { %3771 = vmatprep.subr.bf16.mxu0 %v5571_v44 }
0x12ab   :  { %3772 = vmatpush3.bf16.msra.mxu0 %v5577_v56 }
0x12ac   :  { %4005 = vmatprep.subr.bf16.mxu0 %v6180_v62 }
0x1361   :  { %v2128_v4 = vpop.f32.mrb[60].mxu0 }
0x1362   :  { %v4003_v42 = vpop.f32.mrb[61].mxu0 }
0x1363   :  { %v2131_v0 = vpop.f32.mrb[62].mxu0 }
0x1364   :  { %v2135_v40 = vpack.c.bf16 %v2131_v0, %v2128_v4  ;;  %v4004_v51 = vpop.f32.mrb[63].mxu0 }
0x1365   :  { %v4129_v51 = vadd.f32 %v5474_v5, %v6212_v53 }
0x1366   :  { %2168 = vmatprep.mubr.bf16.mxu0 %v2135_v40 }
0x1367   :  { %2169 = vmatmul.mubr.bf16.vlgmr.msra.gmra.mrb[64].mxu0 %v2093_v60  ;;  %v4131_v60 = vadd.f32 %v5477_v45, %v6212_v53  ;;  %v3576_v0 = vmul.f32 -1.442695, %v4129_v51  ;;  %v1974_v45 = vadd.f32 %v5470_v17, %v4942_v41 }
0x1368   :  { %4006 = vmatpush3.bf16.msra.mxu0 %v4250_v3  ;;  %4007 = vmatprep.mubr.msk.bf16.mxu0 %vm4504_vm0, %v6180_v62 }
0x1369   :  { %3585 = vmatprep.subr.msk.bf16.mxu0 %vm192_vm2, %v6209_v59  ;;  %v3577_v42 = vmul.f32 -1.442695, %v4131_v60  ;;  %4349 = vpow2.f32 %v3576_v0 }
0x136b   :  { %4351 = vpow2.f32 %v3577_v42 }
0x136f   :  { %4008 = vmatmul.mubr.msk.bf16.vlgmr.msra.gmra.mrb[68].mxu0 %vm128_vm1, %v5113_v33 }
0x1370   :  { %2253 = vmatpush1.bf16.msra.mxu0 %v6210_v61  ;;  %2284 = vmatprep.mubr.bf16.mxu0 %v6211_v50  ;;  %v1971_v50 = vadd.f32 %v5468_v22, %v4942_v41 }
0x1371   :  { %4011 = vmatprep.subr.bf16.mxu0 %v6180_v62 }
0x1373   :  { %v4350_v4 = vpop.eup %4349 }
0x1374   :  { %v2071_v59 = vadd.f32 1.0, %v4350_v4 }
0x1375   :  { %v4352_v40 = vpop.eup %4351 }
0x1376   :  { %v2072_v56 = vadd.f32 1.0, %v4352_v40  ;;  %4353 = vrcp.f32 %v2071_v59 }
0x1378   :  { %4355 = vrcp.f32 %v2072_v56 }
0x1380   :  { %v4354_v34 = vpop.eup %4353 }
0x1381   :  { %v2181_v22 = vmul.f32 %v4354_v34, %v5418_v36 }
0x1382   :  { %v4356_v59 = vpop.eup %4355 }
0x1383   :  { %v2184_v17 = vsub.f32 1.0, %v4356_v59 }
0x143a   :  { %v3773_v44 = vpop.f32.mrb[64].mxu0 }
0x143b   :  { %v3774_v61 = vpop.f32.mrb[65].mxu0 }
0x143c   :  { %v3775_v48 = vadd.f32 %v3774_v61, %v3773_v44  ;;  %v3776_v39 = vpop.f32.mrb[66].mxu0  ;;  %v2183_v61 = vsub.f32 1.0, %v4354_v34 }
0x143d   :  { %v3777_v5 = vpop.f32.mrb[67].mxu0 }
0x143e   :  { %v2177_v51 = vadd.f32 %v3775_v48, %v1971_v50  ;;  %v3778_v60 = vadd.f32 %v3777_v5, %v3776_v39  ;;  %v2182_v39 = vmul.f32 %v4356_v59, %v5420_v37 }
0x1440   :  { %4357 = vtanh.f32 %v2177_v51  ;;  %v2178_v0 = vadd.f32 %v3778_v60, %v1974_v45 }
0x1442   :  { %4359 = vtanh.f32 %v2178_v0  ;;  %v2236_v42 = vpop.f32.mrb[68].mxu0 }
0x1443   :  { %v4009_v4 = vpop.f32.mrb[69].mxu0 }
0x1444   :  { %v2239_v40 = vpop.f32.mrb[70].mxu0 }
0x1445   :  { %v2243_v53 = vpack.c.bf16 %v2239_v40, %v2236_v42  ;;  %v4010_v38 = vpop.f32.mrb[71].mxu0 }
0x1447   :  { %2245 = vrot.lane.b32.xlu1 %v2243_v53, %s4506_s9 }
0x144a   :  { %v4358_v44 = vpop.eup %4357 }
0x144b   :  { %v2185_v56 = vmul.f32 %v4358_v44, %v2183_v61 }
0x144c   :  { %v4360_v50 = vpop.eup %4359 }
0x144d   :  { %v2186_v48 = vmul.f32 %v4360_v50, %v2184_v17  ;;  %v5604_v5 = vadd.f32 %v2185_v56, %v2181_v22 }
0x144f   :  { %v5606_v45 = vadd.f32 %v2186_v48, %v2182_v39 }
0x1451   :  { %v2336_v53 = vpack.c.bf16 %v5606_v45, %v5604_v5 }
0x14b9   :  { %v2246_v51 = vpop.permute.xlu1 %2245 }
0x14ba   :  { %v2249_v38 = vsel %vm177_vm3, %v4250_v3, %v2246_v51 }
0x14bb   :  { %3586 = vmatmul.mubr.msk.bf16.vlgmr.msra.gmra.mrb[72].mxu0 %vm189_vm4, %v2249_v38 }
0x14bc   :  { %4012 = vmatpush3.bf16.msra.mxu0 %v4788_v52  ;;  %4013 = vmatprep.mubr.msk.bf16.mxu0 %vm4504_vm0, %v6180_v62 }
0x14bd   :  { %4017 = vmatprep.subr.bf16.mxu0 %v6180_v62 }
0x14c3   :  { %4014 = vmatmul.mubr.msk.bf16.vlgmr.msra.gmra.mrb[76].mxu0 %vm189_vm4, %v2249_v38 }
0x14c4   :  { %4018 = vmatpush3.bf16.msra.mxu0 %v2336_v53  ;;  %4019 = vmatprep.mubr.msk.bf16.mxu0 %vm4504_vm0, %v6180_v62 }
0x14c5   :  { %2379 = vmatprep.subr.bf16.mxu0 %v5175_v19 }
0x14cb   :  { %4020 = vmatmul.mubr.msk.bf16.vlgmr.msra.gmra.mrb[80].mxu0 %vm128_vm1, %v5113_v33 }
0x14cc   :  { %2380 = vmatpush1.bf16.msra.mxu0 %v5183_v6 }
0x14cd   :  { %2381 = vmatprep.subr.bf16.mxu0 %v5189_v7 }
0x14d0   :  { %2382 = vmatpush1.bf16.msra.mxu0 %v5195_v8 }
0x14d1   :  { %2383 = vmatprep.subr.bf16.mxu0 %v5201_v9 }
0x14d4   :  { %2384 = vmatpush1.bf16.msra.mxu0 %v5207_v10 }
0x14d5   :  { %2385 = vmatprep.subr.bf16.mxu0 %v5213_v11 }
0x14d8   :  { %2386 = vmatpush1.bf16.msra.mxu0 %v5219_v13 }
0x14d9   :  { %2387 = vmatprep.subr.bf16.mxu0 %v5225_v14 }
0x14dc   :  { %2388 = vmatpush1.bf16.msra.mxu0 %v5231_v16 }
0x14dd   :  { %2389 = vmatprep.subr.bf16.mxu0 %v5237_v20 }
0x14e0   :  { %2390 = vmatpush1.bf16.msra.mxu0 %v5243_v12 }
0x14e1   :  { %2391 = vmatprep.subr.bf16.mxu0 %v5249_v15 }
0x14e4   :  { %2392 = vmatpush1.bf16.msra.mxu0 %v5255_v21 }
0x14e5   :  { %2393 = vmatprep.subr.bf16.mxu0 %v5261_v23 }
0x14e8   :  { %2394 = vmatpush1.bf16.msra.mxu0 %v5267_v24 }
0x14e9   :  { %2395 = vmatprep.subr.bf16.mxu0 %v5273_v25 }
0x14ec   :  { %2396 = vmatpush1.bf16.msra.mxu0 %v5279_v26 }
0x14ed   :  { %2397 = vmatprep.subr.bf16.mxu0 %v5285_v27 }
0x14f0   :  { %2398 = vmatpush1.bf16.msra.mxu0 %v6230_v35 }
0x14f1   :  { %2399 = vmatprep.subr.bf16.mxu0 %v6231_v55 }
0x14f4   :  { %2400 = vmatpush1.bf16.msra.mxu0 %v6232_v58 }
0x14f5   :  { %2401 = vmatprep.subr.bf16.mxu0 %v6233_v54 }
0x14f8   :  { %2402 = vmatpush1.bf16.msra.mxu0 %v6234_v63 }
0x14f9   :  { %2403 = vmatprep.subr.bf16.mxu0 %v6235_v18 }
0x14fc   :  { %2404 = vmatpush1.bf16.msra.mxu0 %v6236_v28 }
0x14fd   :  { %2405 = vmatprep.subr.bf16.mxu0 %v6237_v29 }
0x1500   :  { %2406 = vmatpush1.bf16.msra.mxu0 %v6238_v2 }
0x1501   :  { %2407 = vmatprep.subr.bf16.mxu0 %v6239_v30 }
0x1504   :  { %2408 = vmatpush1.bf16.msra.mxu0 %v6240_v31 }
0x1505   :  { %2409 = vmatprep.subr.bf16.mxu0 %v6241_v32 }
0x1508   :  { %2410 = vmatpush1.bf16.msra.mxu0 %v6242_v49 }
0x1509   :  { %4047 = vmatprep.subr.bf16.mxu0 %v6180_v62 }
0x1596   :  { %v5654_v34 = vpop.f32.mrb[76].mxu0 }
0x1597   :  { %v4015_v3 = vpop.f32.mrb[77].mxu0 }
0x1598   :  { %v5656_v60 = vpop.f32.mrb[78].mxu0 }
0x1599   :  { %v4016_v0 = vpop.f32.mrb[79].mxu0 }
0x159e   :  { %v2371_v42 = vpop.f32.mrb[80].mxu0 }
0x159f   :  { %v4021_v4 = vpop.f32.mrb[81].mxu0 }
0x15a0   :  { %v2374_v40 = vpop.f32.mrb[82].mxu0 }
0x15a1   :  { %v2378_v59 = vpack.c.bf16 %v2374_v40, %v2371_v42  ;;  %v4022_v61 = vpop.f32.mrb[83].mxu0 }
0x15a3   :  { %2411 = vmatprep.mubr.bf16.mxu0 %v2378_v59 }
0x15a4   :  { %2412 = vmatmul.mubr.bf16.vlgmr.msra.gmra.mrb[72].mxu0 %v2336_v53 }
0x15a5   :  { %4049 = vmatprep.mubr.msk.bf16.mxu0 %vm4504_vm0, %v6180_v62 }
0x1677   :  { %v2413_v44 = vpop.f32.mrb[72].mxu0 }
0x1678   :  { %v2415_v22 = vpop.f32.mrb[73].mxu0 }
0x1679   :  { %v4134_v17 = vadd.f32 %v2415_v22, %v4813_v1  ;;  %v2417_v56 = vpop.f32.mrb[74].mxu0  ;;  %v6255_v22 = vld [vmem:[#allocation8_spill] sm:$0xff] }
0x167a   :  { %v2419_v50 = vpop.f32.mrb[75].mxu0 }
0x167b   :  { %v3591_v39 = vmul.f32 -1.442695, %v4134_v17  ;;  %v4136_v48 = vadd.f32 %v2419_v50, %v4813_v1  ;;  %v6256_v17 = vld [vmem:[#allocation9_spill] sm:$0xff]  ;;  %v6257_v50 = vld [vmem:[#allocation10_spill] sm:$0xff] }
0x167d   :  { %4361 = vpow2.f32 %v3591_v39  ;;  %v3592_v51 = vmul.f32 -1.442695, %v4136_v48  ;;  %v6258_v39 = vld [vmem:[#allocation11_spill] sm:$0xff]  ;;  %v6259_v48 = vld [vmem:[#allocation12_spill] sm:$0xff] }
0x167f   :  { %4363 = vpow2.f32 %v3592_v51  ;;  %v6260_v51 = vld [vmem:[#allocation13_spill] sm:$0xff] }
0x1687   :  { %v4362_v38 = vpop.eup %4361 }
0x1688   :  { %v2444_v3 = vadd.f32 1.0, %v4362_v38  ;;  %v6261_v38 = vld [vmem:[#allocation14_spill] sm:$0xff] }
0x1689   :  { %v4364_v0 = vpop.eup %4363 }
0x168a   :  { %4365 = vrcp.f32 %v2444_v3  ;;  %v2445_v53 = vadd.f32 1.0, %v4364_v0  ;;  %v6262_v3 = vld [vmem:[#allocation15_spill] sm:$0xff]  ;;  %v6263_v0 = vld [vmem:[#allocation16_spill] sm:$0xff] }
0x168c   :  { %4367 = vrcp.f32 %v2445_v53  ;;  %v6264_v53 = vld [vmem:[#allocation17_spill] sm:$0xff] }
0x1694   :  { %v4366_v42 = vpop.eup %4365 }
0x1695   :  { %v2450_v40 = vmul.f32 %v4366_v42, %v5604_v5  ;;  %v6265_v42 = vld [vmem:[#allocation22_spill] sm:$0xff] }
0x1696   :  { %v4368_v4 = vpop.eup %4367 }
0x1697   :  { %v2451_v59 = vmul.f32 %v4368_v4, %v5606_v45  ;;  %v6266_v4 = vld [vmem:[#allocation23_spill] sm:$0xff] }
0x1699   :  { %v2452_v61 = vpack.c.bf16 %v2451_v59, %v2450_v40 }
0x169b   :  { %4024 = vmatpush3.bf16.msra.mxu1 %v2452_v61 }
0x169c   :  { %3787 = vmatprep.subr.bf16.mxu1 %v5485_v57 }
0x169e   :  { %4026 = vmatmul.mubr.msk.bf16.vlgmr.msra.gmra.mrb[56].mxu1 %vm128_vm1, %v5113_v33 }
0x169f   :  { %3788 = vmatpush3.bf16.msra.mxu1 %v5493_v43 }
0x16a0   :  { %3789 = vmatprep.subr.bf16.mxu1 %v5499_v46 }
0x16a3   :  { %3790 = vmatpush3.bf16.msra.mxu1 %v5505_v47 }
0x16a4   :  { %3791 = vmatprep.subr.bf16.mxu1 %v6255_v22 }
0x16a7   :  { %3792 = vmatpush3.bf16.msra.mxu1 %v6256_v17 }
0x16a8   :  { %3793 = vmatprep.subr.bf16.mxu1 %v6257_v50 }
0x16ab   :  { %3794 = vmatpush3.bf16.msra.mxu1 %v6258_v39 }
0x16ac   :  { %3795 = vmatprep.subr.bf16.mxu1 %v6259_v48 }
0x16af   :  { %3796 = vmatpush3.bf16.msra.mxu1 %v6260_v51 }
0x16b0   :  { %3797 = vmatprep.subr.bf16.mxu1 %v6261_v38  ;;  %v4251_v38 = vld [vmem:[%s6055_s0 + $0x30] sm:$0xff]  }
0x16b3   :  { %3798 = vmatpush3.bf16.msra.mxu1 %v6262_v3 }
0x16b4   :  { %3799 = vmatprep.subr.bf16.mxu1 %v6263_v0 }
0x16b7   :  { %3800 = vmatpush3.bf16.msra.mxu1 %v6264_v53 }
0x16b8   :  { %3801 = vmatprep.subr.bf16.mxu1 %v6265_v42  ;;  %v6267_v42 = vld [vmem:[#allocation3_spill] sm:$0xff] }
0x16bb   :  { %3802 = vmatpush3.bf16.msra.mxu1 %v6266_v4 }
0x16bc   :  { %4029 = vmatprep.subr.bf16.mxu1 %v6180_v62 }
0x1771   :  { %v2487_v40 = vpop.f32.mrb[56].mxu1 }
0x1772   :  { %v4027_v59 = vpop.f32.mrb[57].mxu1 }
0x1773   :  { %v2490_v36 = vpop.f32.mrb[58].mxu1  ;;  %v6268_v59 = vld [vmem:[#allocation4_spill] sm:$0xff] }
0x1774   :  { %v2494_v37 = vpack.c.bf16 %v2490_v36, %v2487_v40  ;;  %v4028_v48 = vpop.f32.mrb[59].mxu1  ;;  %v6269_v36 = vmov 0  }
0x1775   :  { %v6270_v48 = vld [vmem:[#allocation5_spill] sm:$0xff] }
0x1776   :  { %2527 = vmatprep.mubr.bf16.mxu1 %v2494_v37  ;;  %v4133_v40 = vadd.f32 %v2413_v44, %v6270_v48  ;;  %v4135_v37 = vadd.f32 %v2417_v56, %v6270_v48  ;;  %v2333_v44 = vadd.f32 %v5656_v60, %v4942_v41 }
0x1777   :  { %2528 = vmatmul.mubr.bf16.vlgmr.msra.gmra.mrb[60].mxu1 %v2452_v61 }
0x1778   :  { %4030 = vmatpush3.bf16.msra.mxu1 %v4251_v38  ;;  %4031 = vmatprep.mubr.msk.bf16.mxu1 %vm4504_vm0, %v6180_v62  ;;  %v3589_v61 = vmul.f32 -1.442695, %v4133_v40  ;;  %v3590_v4 = vmul.f32 -1.442695, %v4135_v37 }
0x1779   :  { %3598 = vmatprep.subr.msk.bf16.mxu1 %vm192_vm2, %v6267_v42 }
0x177a   :  { %4369 = vpow2.f32 %v3589_v61 }
0x177b   :  { %4371 = vpow2.f32 %v3590_v4 }
0x177f   :  { %4032 = vmatmul.mubr.msk.bf16.vlgmr.msra.gmra.mrb[64].mxu1 %vm128_vm1, %v5113_v33 }
0x1780   :  { %2612 = vmatpush1.bf16.msra.mxu1 %v6268_v59  ;;  %2643 = vmatprep.mubr.bf16.mxu1 %v6269_v36  ;;  %v2330_v59 = vadd.f32 %v5654_v34, %v4942_v41 }
0x1781   :  { %4035 = vmatprep.subr.bf16.mxu1 %v6180_v62 }
0x1784   :  { %v4370_v53 = vpop.eup %4369 }
0x1785   :  { %v4372_v0 = vpop.eup %4371  ;;  %v2430_v42 = vadd.f32 1.0, %v4370_v53 }
0x1786   :  { %v2431_v3 = vadd.f32 1.0, %v4372_v0 }
0x1787   :  { %4373 = vrcp.f32 %v2430_v42 }
0x1788   :  { %4375 = vrcp.f32 %v2431_v3 }
0x1791   :  { %v4374_v17 = vpop.eup %4373 }
0x1792   :  { %v4376_v34 = vpop.eup %4375 }
0x1793   :  { %v2543_v60 = vsub.f32 1.0, %v4376_v34 }
0x184a   :  { %v3803_v51 = vpop.f32.mrb[60].mxu1 }
0x184b   :  { %v3804_v33 = vpop.f32.mrb[61].mxu1 }
0x184c   :  { %v3805_v36 = vadd.f32 %v3804_v33, %v3803_v51  ;;  %v3806_v39 = vpop.f32.mrb[62].mxu1  ;;  %v2542_v51 = vsub.f32 1.0, %v4374_v17  ;;  %v2540_v33 = vmul.f32 %v4374_v17, %v5604_v5 }
0x184d   :  { %v3807_v50 = vpop.f32.mrb[63].mxu1 }
0x184e   :  { %v2536_v56 = vadd.f32 %v3805_v36, %v2330_v59  ;;  %v3808_v40 = vadd.f32 %v3807_v50, %v3806_v39  ;;  %v2541_v50 = vmul.f32 %v4376_v34, %v5606_v45 }
0x1850   :  { %4377 = vtanh.f32 %v2536_v56  ;;  %v2537_v4 = vadd.f32 %v3808_v40, %v2333_v44  ;;  %v6277_v40 = vld [vmem:[#allocation15_spill] sm:$0xff] }
0x1852   :  { %4379 = vtanh.f32 %v2537_v4  ;;  %v2595_v53 = vpop.f32.mrb[64].mxu1  ;;  %v6278_v4 = vld [vmem:[#allocation16_spill] sm:$0xff] }
0x1853   :  { %v4033_v0 = vpop.f32.mrb[65].mxu1 }
0x1854   :  { %v2598_v37 = vpop.f32.mrb[66].mxu1  ;;  %v6280_v0 = vld [vmem:[#allocation22_spill] sm:$0xff] }
0x1855   :  { %v2602_v61 = vpack.c.bf16 %v2598_v37, %v2595_v53  ;;  %v4034_v48 = vpop.f32.mrb[67].mxu1  ;;  %v6279_v53 = vld [vmem:[#allocation17_spill] sm:$0xff]  ;;  %v6281_v37 = vld [vmem:[#allocation23_spill] sm:$0xff] }
0x1857   :  { %2604 = vrot.lane.b32.xlu0 %v2602_v61, %s4506_s9 }
0x185a   :  { %v4378_v42 = vpop.eup %4377 }
0x185b   :  { %v2544_v3 = vmul.f32 %v4378_v42, %v2542_v51 }
0x185c   :  { %v4380_v59 = vpop.eup %4379 }
0x185d   :  { %v2545_v39 = vmul.f32 %v4380_v59, %v2543_v60  ;;  %v5704_v36 = vadd.f32 %v2544_v3, %v2540_v33  ;;  %v4252_v60 = vld [vmem:[%s6055_s0 + $0x38] sm:$0xff]   ;;  %v6282_v3 = vld [vmem:[#allocation3_spill] sm:$0xff]  ;;  %v6283_v59 = vld [vmem:[#allocation4_spill] sm:$0xff] }
0x185f   :  { %v5706_v44 = vadd.f32 %v2545_v39, %v2541_v50  ;;  %v6284_v50 = vmov 0   ;;  %v6285_v39 = vld [vmem:[#allocation5_spill] sm:$0xff] }
0x1861   :  { %v2695_v17 = vpack.c.bf16 %v5706_v44, %v5704_v36 }
0x18c9   :  { %v2605_v56 = vpop.permute.xlu0 %2604 }
0x18ca   :  { %v2608_v48 = vsel %vm177_vm3, %v4251_v38, %v2605_v56  ;;  %v5723_v38 = vld [vmem:[%s6056_s1] sm:$0xff]  }
0x18cb   :  { %3599 = vmatmul.mubr.msk.bf16.vlgmr.msra.gmra.mrb[68].mxu1 %vm189_vm4, %v2608_v48 }
0x18cc   :  { %4036 = vmatpush3.bf16.msra.mxu1 %v4788_v52  ;;  %4037 = vmatprep.mubr.msk.bf16.mxu1 %vm4504_vm0, %v6180_v62 }
0x18cd   :  { %4041 = vmatprep.subr.bf16.mxu1 %v6180_v62 }
0x18d3   :  { %4038 = vmatmul.mubr.msk.bf16.vlgmr.msra.gmra.mrb[72].mxu1 %vm189_vm4, %v2608_v48 }
0x18d4   :  { %4042 = vmatpush3.bf16.msra.mxu1 %v2695_v17  ;;  %4043 = vmatprep.mubr.msk.bf16.mxu1 %vm4504_vm0, %v6180_v62 }
0x18d5   :  { %2738 = vmatprep.subr.bf16.mxu1 %v5175_v19 }
0x18db   :  { %4044 = vmatmul.mubr.msk.bf16.vlgmr.msra.gmra.mrb[76].mxu1 %vm128_vm1, %v5723_v38 }
0x18dc   :  { %2739 = vmatpush1.bf16.msra.mxu1 %v5183_v6 }
0x18dd   :  { %2740 = vmatprep.subr.bf16.mxu1 %v5189_v7 }
0x18e0   :  { %2741 = vmatpush1.bf16.msra.mxu1 %v5195_v8 }
0x18e1   :  { %2742 = vmatprep.subr.bf16.mxu1 %v5201_v9 }
0x18e4   :  { %2743 = vmatpush1.bf16.msra.mxu1 %v5207_v10 }
0x18e5   :  { %2744 = vmatprep.subr.bf16.mxu1 %v5213_v11 }
0x18e8   :  { %2745 = vmatpush1.bf16.msra.mxu1 %v5219_v13 }
0x18e9   :  { %2746 = vmatprep.subr.bf16.mxu1 %v5225_v14 }
0x18ec   :  { %2747 = vmatpush1.bf16.msra.mxu1 %v5231_v16 }
0x18ed   :  { %2748 = vmatprep.subr.bf16.mxu1 %v5237_v20 }
0x18f0   :  { %2749 = vmatpush1.bf16.msra.mxu1 %v5243_v12 }
0x18f1   :  { %2750 = vmatprep.subr.bf16.mxu1 %v5249_v15 }
0x18f4   :  { %2751 = vmatpush1.bf16.msra.mxu1 %v5255_v21 }
0x18f5   :  { %2752 = vmatprep.subr.bf16.mxu1 %v5261_v23 }
0x18f8   :  { %2753 = vmatpush1.bf16.msra.mxu1 %v5267_v24 }
0x18f9   :  { %2754 = vmatprep.subr.bf16.mxu1 %v5273_v25 }
0x18fc   :  { %2755 = vmatpush1.bf16.msra.mxu1 %v5279_v26 }
0x18fd   :  { %2756 = vmatprep.subr.bf16.mxu1 %v5285_v27 }
0x1900   :  { %2757 = vmatpush1.bf16.msra.mxu1 %v6230_v35 }
0x1901   :  { %2758 = vmatprep.subr.bf16.mxu1 %v6231_v55 }
0x1904   :  { %2759 = vmatpush1.bf16.msra.mxu1 %v6232_v58 }
0x1905   :  { %2760 = vmatprep.subr.bf16.mxu1 %v6233_v54 }
0x1908   :  { %2761 = vmatpush1.bf16.msra.mxu1 %v6234_v63 }
0x1909   :  { %2762 = vmatprep.subr.bf16.mxu1 %v6235_v18 }
0x190c   :  { %2763 = vmatpush1.bf16.msra.mxu1 %v6236_v28 }
0x190d   :  { %2764 = vmatprep.subr.bf16.mxu1 %v6237_v29  ;;  %v6271_v29 = vld [vmem:[#allocation9_spill] sm:$0xff] }
0x1910   :  { %2765 = vmatpush1.bf16.msra.mxu1 %v6238_v2  ;;  %v6272_v2 = vld [vmem:[#allocation10_spill] sm:$0xff] }
0x1911   :  { %2766 = vmatprep.subr.bf16.mxu1 %v6239_v30  ;;  %v6273_v30 = vld [vmem:[#allocation11_spill] sm:$0xff] }
0x1914   :  { %2767 = vmatpush1.bf16.msra.mxu1 %v6240_v31  ;;  %v6274_v31 = vld [vmem:[#allocation12_spill] sm:$0xff] }
0x1915   :  { %2768 = vmatprep.subr.bf16.mxu1 %v6241_v32  ;;  %v6275_v32 = vld [vmem:[#allocation13_spill] sm:$0xff] }
0x1918   :  { %2769 = vmatpush1.bf16.msra.mxu1 %v6242_v49  ;;  %v6276_v49 = vld [vmem:[#allocation14_spill] sm:$0xff] }
0x1919   :  { %4071 = vmatprep.subr.bf16.mxu1 %v6180_v62 }
0x19a6   :  { %v5759_v19 = vpop.f32.mrb[72].mxu1 }
0x19a7   :  { %v4039_v6 = vpop.f32.mrb[73].mxu1 }
0x19a8   :  { %v5761_v7 = vpop.f32.mrb[74].mxu1 }
0x19a9   :  { %v4040_v8 = vpop.f32.mrb[75].mxu1 }
0x19ae   :  { %v2730_v9 = vpop.f32.mrb[76].mxu1 }
0x19af   :  { %v4045_v10 = vpop.f32.mrb[77].mxu1 }
0x19b0   :  { %v2733_v11 = vpop.f32.mrb[78].mxu1 }
0x19b1   :  { %v2737_v13 = vpack.c.bf16 %v2733_v11, %v2730_v9  ;;  %v4046_v14 = vpop.f32.mrb[79].mxu1 }
0x19b3   :  { %2770 = vmatprep.mubr.bf16.mxu1 %v2737_v13 }
0x19b4   :  { %2771 = vmatmul.mubr.bf16.vlgmr.msra.gmra.mrb[68].mxu1 %v2695_v17 }
0x19b5   :  { %4073 = vmatprep.mubr.msk.bf16.mxu1 %vm4504_vm0, %v6180_v62 }
0x1a87   :  { %v2772_v16 = vpop.f32.mrb[68].mxu1 }
0x1a88   :  { %v2774_v20 = vpop.f32.mrb[69].mxu1  ;;  %v4137_v56 = vadd.f32 %v2772_v16, %v6285_v39  ;;  %v2692_v16 = vadd.f32 %v5761_v7, %v4942_v41 }
0x1a89   :  { %v4138_v12 = vadd.f32 %v2774_v20, %v4813_v1  ;;  %v2776_v15 = vpop.f32.mrb[70].mxu1  ;;  %v2689_v20 = vadd.f32 %v5759_v19, %v4942_v41 }
0x1a8a   :  { %v2778_v21 = vpop.f32.mrb[71].mxu1  ;;  %v4139_v48 = vadd.f32 %v2776_v15, %v6285_v39  ;;  %v3602_v17 = vmul.f32 -1.442695, %v4137_v56 }
0x1a8b   :  { %v3604_v23 = vmul.f32 -1.442695, %v4138_v12  ;;  %v4140_v24 = vadd.f32 %v2778_v21, %v4813_v1 }
0x1a8c   :  { %v3603_v6 = vmul.f32 -1.442695, %v4139_v48  ;;  %v4473_v48 = vld [vmem:[%s6057_s4 + $0x14] ss:$8 sps:$4 sm:$0xff]  }
0x1a8d   :  { %4381 = vpow2.f32 %v3604_v23  ;;  %v3605_v25 = vmul.f32 -1.442695, %v4140_v24 }
0x1a8f   :  { %4383 = vpow2.f32 %v3605_v25 }
0x1a97   :  { %v4382_v26 = vpop.eup %4381 }
0x1a98   :  { %v2803_v27 = vadd.f32 1.0, %v4382_v26 }
0x1a99   :  { %v4384_v35 = vpop.eup %4383 }
0x1a9a   :  { %4385 = vrcp.f32 %v2803_v27  ;;  %v2804_v55 = vadd.f32 1.0, %v4384_v35 }
0x1a9c   :  { %4387 = vrcp.f32 %v2804_v55 }
0x1a9d   :  { %4389 = vpow2.f32 %v3602_v17  ;;  %v4475_v17 = vld [vmem:[%s6057_s4 + $0x24] ss:$8 sps:$4 sm:$0xff]  }
0x1a9e   :  { %4391 = vpow2.f32 %v3603_v6  ;;  %v4476_v6 = vld [vmem:[%s6057_s4 + $0x20] ss:$8 sps:$4 sm:$0xff]  }
0x1aa4   :  { %v4386_v58 = vpop.eup %4385 }
0x1aa5   :  { %v2809_v63 = vmul.f32 %v4386_v58, %v5704_v36 }
0x1aa6   :  { %v4388_v54 = vpop.eup %4387 }
0x1aa7   :  { %v2810_v18 = vmul.f32 %v4388_v54, %v5706_v44  ;;  %v4390_v8 = vpop.eup %4389 }
0x1aa8   :  { %v4392_v9 = vpop.eup %4391  ;;  %v2789_v10 = vadd.f32 1.0, %v4390_v8  ;;  %v4477_v8 = vld [vmem:[%s6057_s4 + $0x34] ss:$8 sps:$4 sm:$0xff]  }
0x1aa9   :  { %v2811_v28 = vpack.c.bf16 %v2810_v18, %v2809_v63  ;;  %v2790_v11 = vadd.f32 1.0, %v4392_v9  ;;  %v4478_v9 = vld [vmem:[%s6057_s4 + $0x30] ss:$8 sps:$4 sm:$0xff]  }
0x1aaa   :  { %4393 = vrcp.f32 %v2789_v10  ;;  %v4479_v10 = vld [vmem:[%s6057_s4 + $0x44] ss:$8 sps:$4 sm:$0xff]  }
0x1aab   :  { %4048 = vmatpush3.bf16.msra.mxu0 %v2811_v28  ;;  %4395 = vrcp.f32 %v2790_v11  ;;  %v4480_v11 = vld [vmem:[%s6057_s4 + $0x40] ss:$8 sps:$4 sm:$0xff]  }
0x1aac   :  { %3817 = vmatprep.subr.bf16.mxu0 %v5485_v57 }
0x1aae   :  { %4050 = vmatmul.mubr.msk.bf16.vlgmr.msra.gmra.mrb[84].mxu0 %vm128_vm1, %v5723_v38 }
0x1aaf   :  { %3818 = vmatpush3.bf16.msra.mxu0 %v5493_v43 }
0x1ab0   :  { %3819 = vmatprep.subr.bf16.mxu0 %v5499_v46 }
0x1ab3   :  { %3820 = vmatpush3.bf16.msra.mxu0 %v5505_v47 }
0x1ab4   :  { %3821 = vmatprep.subr.bf16.mxu0 %v6255_v22  ;;  %v4394_v54 = vpop.eup %4393 }
0x1ab5   :  { %v4396_v19 = vpop.eup %4395  ;;  %v2901_v63 = vsub.f32 1.0, %v4394_v54 }
0x1ab6   :  { %v2902_v7 = vsub.f32 1.0, %v4396_v19 }
0x1ab7   :  { %3822 = vmatpush3.bf16.msra.mxu0 %v6271_v29 }
0x1ab8   :  { %3823 = vmatprep.subr.bf16.mxu0 %v6272_v2 }
0x1abb   :  { %3824 = vmatpush3.bf16.msra.mxu0 %v6273_v30 }
0x1abc   :  { %3825 = vmatprep.subr.bf16.mxu0 %v6274_v31 }
0x1abf   :  { %3826 = vmatpush3.bf16.msra.mxu0 %v6275_v32 }
0x1ac0   :  { %3827 = vmatprep.subr.bf16.mxu0 %v6276_v49 }
0x1ac3   :  { %3828 = vmatpush3.bf16.msra.mxu0 %v6277_v40 }
0x1ac4   :  { %3829 = vmatprep.subr.bf16.mxu0 %v6278_v4 }
0x1ac7   :  { %3830 = vmatpush3.bf16.msra.mxu0 %v6279_v53 }
0x1ac8   :  { %3831 = vmatprep.subr.bf16.mxu0 %v6280_v0 }
0x1acb   :  { %3832 = vmatpush3.bf16.msra.mxu0 %v6281_v37 }
0x1acc   :  { %4053 = vmatprep.subr.bf16.mxu0 %v6180_v62 }
0x1b81   :  { %v2846_v61 = vpop.f32.mrb[84].mxu0 }
0x1b82   :  { %v4051_v34 = vpop.f32.mrb[85].mxu0 }
0x1b83   :  { %v2849_v51 = vpop.f32.mrb[86].mxu0 }
0x1b84   :  { %v2853_v42 = vpack.c.bf16 %v2849_v51, %v2846_v61  ;;  %v4052_v33 = vpop.f32.mrb[87].mxu0  ;;  %v2900_v51 = vmul.f32 %v4396_v19, %v5706_v44  ;;  %v4497_v19 = vld [vmem:[%s6057_s4 + $0xd4] ss:$8 sps:$4 sm:$0xff]  }
0x1b86   :  { %2886 = vmatprep.mubr.bf16.mxu0 %v2853_v42 }
0x1b87   :  { %2887 = vmatmul.mubr.bf16.vlgmr.msra.gmra.mrb[88].mxu0 %v2811_v28  ;;  %v2899_v28 = vmul.f32 %v4394_v54, %v5704_v36  ;;  %v4496_v54 = vld [vmem:[%s6057_s4 + $0xc0] ss:$8 sps:$4 sm:$0xff]  }
0x1b88   :  { %4054 = vmatpush3.bf16.msra.mxu0 %v4252_v60  ;;  %4055 = vmatprep.mubr.msk.bf16.mxu0 %vm4504_vm0, %v6180_v62 }
0x1b89   :  { %3611 = vmatprep.subr.msk.bf16.mxu0 %vm192_vm2, %v6282_v3 }
0x1b8f   :  { %4056 = vmatmul.mubr.msk.bf16.vlgmr.msra.gmra.mrb[92].mxu0 %vm128_vm1, %v5723_v38 }
0x1b90   :  { %2971 = vmatpush1.bf16.msra.mxu0 %v6283_v59  ;;  %3002 = vmatprep.mubr.bf16.mxu0 %v6284_v50 }
0x1b91   :  { %4059 = vmatprep.subr.bf16.mxu0 %v6180_v62 }
0x1c5a   :  { %v3833_v13 = vpop.f32.mrb[88].mxu0 }
0x1c5b   :  { %v3834_v14 = vpop.f32.mrb[89].mxu0 }
0x1c5c   :  { %v3835_v12 = vadd.f32 %v3834_v14, %v3833_v13  ;;  %v3836_v21 = vpop.f32.mrb[90].mxu0  ;;  %v4481_v13 = vld [vmem:[%s6057_s4 + $0x54] ss:$8 sps:$4 sm:$0xff]   ;;  %v4482_v14 = vld [vmem:[%s6057_s4 + $0x50] ss:$8 sps:$4 sm:$0xff]  }
0x1c5d   :  { %v3837_v23 = vpop.f32.mrb[91].mxu0 }
0x1c5e   :  { %v2895_v15 = vadd.f32 %v3835_v12, %v2689_v20  ;;  %v3838_v24 = vadd.f32 %v3837_v23, %v3836_v21  ;;  %v4483_v20 = vld [vmem:[%s6057_s4 + $0x64] ss:$8 sps:$4 sm:$0xff]   ;;  %v4484_v12 = vld [vmem:[%s6057_s4 + $0x60] ss:$8 sps:$4 sm:$0xff]   ;;  %v4485_v21 = vld [vmem:[%s6057_s4 + $0x74] ss:$8 sps:$4 sm:$0xff]  }
0x1c5f   :  { %v4486_v23 = vld [vmem:[%s6057_s4 + $0x70] ss:$8 sps:$4 sm:$0xff]  }
0x1c60   :  { %4397 = vtanh.f32 %v2895_v15  ;;  %v2896_v25 = vadd.f32 %v3838_v24, %v2692_v16  ;;  %v4487_v16 = vld [vmem:[%s6057_s4 + $0x84] ss:$8 sps:$4 sm:$0xff]   ;;  %v4488_v15 = vld [vmem:[%s6057_s4 + $0x80] ss:$8 sps:$4 sm:$0xff]   ;;  %v4489_v24 = vld [vmem:[%s6057_s4 + $0x94] ss:$8 sps:$4 sm:$0xff]  }
0x1c62   :  { %4399 = vtanh.f32 %v2896_v25  ;;  %v2954_v26 = vpop.f32.mrb[92].mxu0  ;;  %v4490_v25 = vld [vmem:[%s6057_s4 + $0x90] ss:$8 sps:$4 sm:$0xff]  }
0x1c63   :  { %v4057_v27 = vpop.f32.mrb[93].mxu0 }
0x1c64   :  { %v2957_v35 = vpop.f32.mrb[94].mxu0  ;;  %v4492_v27 = vld [vmem:[%s6057_s4 + $0xa0] ss:$8 sps:$4 sm:$0xff]  }
0x1c65   :  { %v2961_v55 = vpack.c.bf16 %v2957_v35, %v2954_v26  ;;  %v4058_v58 = vpop.f32.mrb[95].mxu0  ;;  %v4491_v26 = vld [vmem:[%s6057_s4 + $0xa4] ss:$8 sps:$4 sm:$0xff]   ;;  %v4493_v35 = vld [vmem:[%s6057_s4 + $0xb4] ss:$8 sps:$4 sm:$0xff]  }
0x1c66   :  { %v4495_v58 = vld [vmem:[%s6057_s4 + $0xc4] ss:$8 sps:$4 sm:$0xff]  }
0x1c67   :  { %2963 = vrot.lane.b32.xlu1 %v2961_v55, %s4506_s9  ;;  %v4494_v55 = vld [vmem:[%s6057_s4 + $0xb0] ss:$8 sps:$4 sm:$0xff]  }
0x1c6a   :  { %v4398_v18 = vpop.eup %4397 }
0x1c6b   :  { %v2903_v61 = vmul.f32 %v4398_v18, %v2901_v63  ;;  %v4498_v63 = vld [vmem:[%s6057_s4 + $0xd0] ss:$8 sps:$4 sm:$0xff]   ;;  %v4499_v18 = vld [vmem:[%s6057_s4 + $0xe4] ss:$8 sps:$4 sm:$0xff]  }
0x1c6c   :  { %v4400_v34 = vpop.eup %4399 }
0x1c6d   :  { %v2904_v42 = vmul.f32 %v4400_v34, %v2902_v7  ;;  %v5809_v33 = vadd.f32 %v2903_v61, %v2899_v28  ;;  %v4500_v28 = vld [vmem:[%s6057_s4 + $0xe0] ss:$8 sps:$4 sm:$0xff]   ;;  %v4501_v7 = vld [vmem:[%s6057_s4 + $0xf4] ss:$8 sps:$4 sm:$0xff]   ;;  %v4502_v61 = vld [vmem:[%s6057_s4 + $0xf0] ss:$8 sps:$4 sm:$0xff]  }
0x1c6f   :  { %v5811_v3 = vadd.f32 %v2904_v42, %v2900_v51 }
0x1c71   :  { %v5821_v56 = vpack.c.bf16 %v5811_v3, %v5809_v33 }
0x1cd9   :  { %v2964_v59 = vpop.permute.xlu1 %2963 }
0x1cda   :  { %v2967_v50 = vsel %vm177_vm3, %v4252_v60, %v2964_v59  ;;  %v4472_v60 = vld [vmem:[%s6057_s4] ss:$8 sps:$4 sm:$0xff]  }
0x1cdb   :  { %3612 = vmatmul.mubr.msk.bf16.vlgmr.msra.gmra.mrb[96].mxu0 %vm189_vm4, %v2967_v50 }
0x1cdc   :  { %4060 = vmatpush3.bf16.msra.mxu0 %v4788_v52  ;;  %4061 = vmatprep.mubr.msk.bf16.mxu0 %vm4504_vm0, %v6180_v62  ;;  %v4471_v52 = vld [vmem:[%s6057_s4 + $0x4] ss:$8 sps:$4 sm:$0xff]  }
0x1cdd   :  { %4065 = vmatprep.subr.bf16.mxu0 %v6180_v62 }
0x1ce3   :  { %4062 = vmatmul.mubr.msk.bf16.vlgmr.msra.gmra.mrb[100].mxu0 %vm189_vm4, %v2967_v50 }
0x1ce4   :  { %4066 = vmatpush3.bf16.msra.mxu0 %v5821_v56  ;;  %4067 = vmatprep.mubr.msk.bf16.mxu0 %vm4504_vm0, %v6180_v62  ;;  %v4474_v62 = vld [vmem:[%s6057_s4 + $0x10] ss:$8 sps:$4 sm:$0xff]  }
0x1ce5   :  { %3097 = vmatprep.subr.bf16.mxu0 %v4471_v52 }
0x1ceb   :  { %4068 = vmatmul.mubr.msk.bf16.vlgmr.msra.gmra.mrb[104].mxu0 %vm128_vm1, %v5723_v38 }
0x1cec   :  { %3098 = vmatpush1.bf16.msra.mxu0 %v4472_v60 }
0x1ced   :  { %3099 = vmatprep.subr.bf16.mxu0 %v4473_v48 }
0x1cf0   :  { %3100 = vmatpush1.bf16.msra.mxu0 %v4474_v62 }
0x1cf1   :  { %3101 = vmatprep.subr.bf16.mxu0 %v4475_v17 }
0x1cf4   :  { %3102 = vmatpush1.bf16.msra.mxu0 %v4476_v6 }
0x1cf5   :  { %3103 = vmatprep.subr.bf16.mxu0 %v4477_v8 }
0x1cf8   :  { %3104 = vmatpush1.bf16.msra.mxu0 %v4478_v9 }
0x1cf9   :  { %3105 = vmatprep.subr.bf16.mxu0 %v4479_v10 }
0x1cfc   :  { %3106 = vmatpush1.bf16.msra.mxu0 %v4480_v11 }
0x1cfd   :  { %3107 = vmatprep.subr.bf16.mxu0 %v4481_v13 }
0x1d00   :  { %3108 = vmatpush1.bf16.msra.mxu0 %v4482_v14 }
0x1d01   :  { %3109 = vmatprep.subr.bf16.mxu0 %v4483_v20 }
0x1d04   :  { %3110 = vmatpush1.bf16.msra.mxu0 %v4484_v12 }
0x1d05   :  { %3111 = vmatprep.subr.bf16.mxu0 %v4485_v21 }
0x1d08   :  { %3112 = vmatpush1.bf16.msra.mxu0 %v4486_v23 }
0x1d09   :  { %3113 = vmatprep.subr.bf16.mxu0 %v4487_v16 }
0x1d0c   :  { %3114 = vmatpush1.bf16.msra.mxu0 %v4488_v15 }
0x1d0d   :  { %3115 = vmatprep.subr.bf16.mxu0 %v4489_v24 }
0x1d10   :  { %3116 = vmatpush1.bf16.msra.mxu0 %v4490_v25 }
0x1d11   :  { %3117 = vmatprep.subr.bf16.mxu0 %v4491_v26  ;;  %v6288_v26 = vld [vmem:[#allocation21_spill] sm:$0xff] }
0x1d14   :  { %3118 = vmatpush1.bf16.msra.mxu0 %v4492_v27  ;;  %v1113_v27 = vmax.f32 %v6288_v26, 0.0 }
0x1d15   :  { %3119 = vmatprep.subr.bf16.mxu0 %v4493_v35  ;;  %v6289_v35 = vld [vmem:[#allocation7_spill] sm:$0xff] }
0x1d18   :  { %3120 = vmatpush1.bf16.msra.mxu0 %v4494_v55  ;;  %v1472_v55 = vmax.f32 %v6289_v35, 0.0 }
0x1d19   :  { %3121 = vmatprep.subr.bf16.mxu0 %v4495_v58  ;;  %v6290_v58 = vld [vmem:[#allocation20_spill] sm:$0xff] }
0x1d1c   :  { %3122 = vmatpush1.bf16.msra.mxu0 %v4496_v54  ;;  %v1112_v54 = vmax.f32 %v6290_v58, 0.0 }
0x1d1d   :  { %3123 = vmatprep.subr.bf16.mxu0 %v4497_v19  ;;  %v6291_v19 = vld [vmem:[#allocation6_spill] sm:$0xff] }
0x1d20   :  { %3124 = vmatpush1.bf16.msra.mxu0 %v4498_v63  ;;  %v1471_v63 = vmax.f32 %v6291_v19, 0.0 }
0x1d21   :  { %3125 = vmatprep.subr.bf16.mxu0 %v4499_v18  ;;  %v1114_v18 = vpack.c.bf16 %v1113_v27, %v1112_v54 }
0x1d24   :  { %3126 = vmatpush1.bf16.msra.mxu0 %v4500_v28  ;;  %v1473_v28 = vpack.c.bf16 %v1472_v55, %v1471_v63 }
0x1d25   :  { %3127 = vmatprep.subr.bf16.mxu0 %v4501_v7  ;;  %v6292_v7 = vld [vmem:[#allocation26_spill] sm:$0xff] }
0x1d28   :  { %3128 = vmatpush1.bf16.msra.mxu0 %v4502_v61  ;;  %v1831_v61 = vmax.f32 %v6292_v7, 0.0 }
0x1db6   :  { %v5925_v34 = vpop.f32.mrb[100].mxu0 }
0x1db7   :  { %v4063_v51 = vpop.f32.mrb[101].mxu0 }
0x1db8   :  { %v5927_v42 = vpop.f32.mrb[102].mxu0  ;;  %v2190_v51 = vmax.f32 %v5606_v45, 0.0 }
0x1db9   :  { %v4064_v59 = vpop.f32.mrb[103].mxu0 }
0x1dba   :  { %v6293_v59 = vld [vmem:[#allocation25_spill] sm:$0xff] }
0x1dbe   :  { %v3089_v50 = vpop.f32.mrb[104].mxu0 }
0x1dbf   :  { %v4069_v52 = vpop.f32.mrb[105].mxu0 }
0x1dc0   :  { %v3092_v60 = vpop.f32.mrb[106].mxu0  ;;  %v2189_v52 = vmax.f32 %v5604_v5, 0.0 }
0x1dc1   :  { %v3096_v48 = vpack.c.bf16 %v3092_v60, %v3089_v50  ;;  %v4070_v62 = vpop.f32.mrb[107].mxu0  ;;  %v1830_v50 = vmax.f32 %v6293_v59, 0.0 }
0x1dc2   :  { %v2549_v62 = vmax.f32 %v5706_v44, 0.0 }
0x1dc3   :  { %3129 = vmatprep.mubr.bf16.mxu0 %v3096_v48  ;;  %v1832_v60 = vpack.c.bf16 %v1831_v61, %v1830_v50  ;;  %v2191_v48 = vpack.c.bf16 %v2190_v51, %v2189_v52 }
0x1dc4   :  { %3130 = vmatmul.mubr.bf16.vlgmr.msra.gmra.mrb[96].mxu0 %v5821_v56 }
0x1e97   :  { %v5930_v17 = vpop.f32.mrb[96].mxu0 }
0x1e98   :  { %v3133_v6 = vpop.f32.mrb[97].mxu0  ;;  %v4141_v45 = vadd.f32 %v5930_v17, %v6285_v39 }
0x1e99   :  { %v4142_v8 = vadd.f32 %v3133_v6, %v4813_v1  ;;  %v5933_v9 = vpop.f32.mrb[98].mxu0  ;;  %v2908_v6 = vmax.f32 %v5811_v3, 0.0 }
0x1e9a   :  { %v3137_v10 = vpop.f32.mrb[99].mxu0  ;;  %v4143_v5 = vadd.f32 %v5933_v9, %v6285_v39  ;;  %v3051_v39 = vadd.f32 %v5927_v42, %v4942_v41 }
0x1e9b   :  { %v3617_v11 = vmul.f32 -1.442695, %v4142_v8  ;;  %v4144_v13 = vadd.f32 %v3137_v10, %v4813_v1  ;;  %v4253_v1 = vld [vmem:[%s6061_s6] sm:$0xff]   ;;  %v2548_v8 = vmax.f32 %v5704_v36, 0.0  ;;  %v2907_v10 = vmax.f32 %v5809_v33, 0.0 }
0x1e9d   :  { %4401 = vpow2.f32 %v3617_v11  ;;  %v3618_v14 = vmul.f32 -1.442695, %v4144_v13  ;;  %v2550_v11 = vpack.c.bf16 %v2549_v62, %v2548_v8  ;;  %v2909_v13 = vpack.c.bf16 %v2908_v6, %v2907_v10 }
0x1e9f   :  { %4403 = vpow2.f32 %v3618_v14  ;;  %v3615_v14 = vmul.f32 -1.442695, %v4141_v45 }
0x1ea7   :  { %v4402_v20 = vpop.eup %4401 }
0x1ea8   :  { %v3162_v12 = vadd.f32 1.0, %v4402_v20  ;;  %v3616_v20 = vmul.f32 -1.442695, %v4143_v5 }
0x1ea9   :  { %v4404_v21 = vpop.eup %4403 }
0x1eaa   :  { %4405 = vrcp.f32 %v3162_v12  ;;  %v3163_v23 = vadd.f32 1.0, %v4404_v21 }
0x1eac   :  { %4407 = vrcp.f32 %v3163_v23 }
0x1ead   :  { %4409 = vpow2.f32 %v3615_v14 }
0x1eae   :  { %4411 = vpow2.f32 %v3616_v20 }
0x1eb4   :  { %v4406_v56 = vpop.eup %4405 }
0x1eb5   :  { %v3168_v15 = vmul.f32 %v4406_v56, %v5809_v33 }
0x1eb6   :  { %v4408_v16 = vpop.eup %4407 }
0x1eb7   :  { %v3169_v24 = vmul.f32 %v4408_v16, %v5811_v3  ;;  %v4410_v44 = vpop.eup %4409  ;;  %v3048_v16 = vadd.f32 %v5925_v34, %v4942_v41 }
0x1eb8   :  { %v4412_v12 = vpop.eup %4411  ;;  %v3148_v21 = vadd.f32 1.0, %v4410_v44 }
0x1eb9   :  { %v3170_v25 = vpack.c.bf16 %v3169_v24, %v3168_v15  ;;  %v3149_v36 = vadd.f32 1.0, %v4412_v12 }
0x1eba   :  { %4413 = vrcp.f32 %v3148_v21 }
0x1ebb   :  { %4072 = vmatpush3.bf16.msra.mxu1 %v3170_v25  ;;  %4415 = vrcp.f32 %v3149_v36 }
0x1ebc   :  { %3847 = vmatprep.subr.bf16.mxu1 %v5485_v57 }
0x1ebe   :  { %4074 = vmatmul.mubr.msk.bf16.vlgmr.msra.gmra.mrb[80].mxu1 %vm128_vm1, %v5723_v38 }
0x1ebf   :  { %3848 = vmatpush3.bf16.msra.mxu1 %v5493_v43 }
0x1ec0   :  { %3849 = vmatprep.subr.bf16.mxu1 %v5499_v46  ;;  %v6286_v46 = vld [vmem:[#allocation19_spill] sm:$0xff] }
0x1ec3   :  { %3850 = vmatpush3.bf16.msra.mxu1 %v5505_v47  ;;  %v754_v47 = vmax.f32 %v6286_v46, 0.0 }
0x1ec4   :  { %3851 = vmatprep.subr.bf16.mxu1 %v6255_v22 }
0x1ec7   :  { %3852 = vmatpush3.bf16.msra.mxu1 %v6271_v29 }
0x1ec8   :  { %3853 = vmatprep.subr.bf16.mxu1 %v6272_v2  ;;  %v6287_v2 = vld [vmem:[#allocation18_spill] sm:$0xff] }
0x1ecb   :  { %3854 = vmatpush3.bf16.msra.mxu1 %v6273_v30  ;;  %v753_v30 = vmax.f32 %v6287_v2, 0.0 }
0x1ecc   :  { %3855 = vmatprep.subr.bf16.mxu1 %v6274_v31  ;;  %v4254_v31 = vld [vmem:[%s6061_s6 + $0x8] sm:$0xff]  }
0x1ecf   :  { %3856 = vmatpush3.bf16.msra.mxu1 %v6275_v32  ;;  %v755_v32 = vpack.c.bf16 %v754_v47, %v753_v30 }
0x1ed0   :  { %3857 = vmatprep.subr.bf16.mxu1 %v6276_v49  ;;  %v4255_v49 = vld [vmem:[%s6061_s6 + $0x10] sm:$0xff]  }
0x1ed3   :  { %3858 = vmatpush3.bf16.msra.mxu1 %v6277_v40  ;;  %v4256_v40 = vld [vmem:[%s6061_s6 + $0x18] sm:$0xff]  }
0x1ed4   :  { %3859 = vmatprep.subr.bf16.mxu1 %v6278_v4  ;;  %v4257_v4 = vld [vmem:[%s6061_s6 + $0x20] sm:$0xff]  }
0x1ed7   :  { %3860 = vmatpush3.bf16.msra.mxu1 %v6279_v53  ;;  %v4258_v53 = vld [vmem:[%s6061_s6 + $0x28] sm:$0xff]  }
0x1ed8   :  { %3861 = vmatprep.subr.bf16.mxu1 %v6280_v0  ;;  %v4259_v0 = vld [vmem:[%s6061_s6 + $0x30] sm:$0xff]  }
0x1edb   :  { %3862 = vmatpush3.bf16.msra.mxu1 %v6281_v37  ;;  %v4260_v37 = vld [vmem:[%s6061_s6 + $0x38] sm:$0xff]  }
0x1edc   :  { %4077 = vmatprep.subr.bf16.mxu1 %v4253_v1 }
0x1f91   :  { %v3205_v57 = vpop.f32.mrb[80].mxu1 }
0x1f92   :  { %v4075_v43 = vpop.f32.mrb[81].mxu1 }
0x1f93   :  { %v3208_v22 = vpop.f32.mrb[82].mxu1 }
0x1f94   :  { %v3212_v38 = vpack.c.bf16 %v3208_v22, %v3205_v57  ;;  %v4076_v29 = vpop.f32.mrb[83].mxu1  ;;  %v4414_v57 = vpop.eup %4413 }
0x1f95   :  { %v4416_v43 = vpop.eup %4415  ;;  %v3260_v46 = vsub.f32 1.0, %v4414_v57  ;;  %v3258_v22 = vmul.f32 %v4414_v57, %v5809_v33 }
0x1f96   :  { %3245 = vmatprep.mubr.bf16.mxu1 %v3212_v38  ;;  %v3261_v34 = vsub.f32 1.0, %v4416_v43  ;;  %v3259_v2 = vmul.f32 %v4416_v43, %v5811_v3 }
0x1f97   :  { %3246 = vmatmul.mubr.bf16.vlgmr.msra.gmra.mrb[84].mxu1 %v3170_v25 }
0x1f98   :  { %4078 = vmatpush3.bf16.msra.mxu1 %v4253_v1  ;;  %4093 = vmatprep.mubr.bf16.mxu1 %v755_v32 }
0x1f99   :  { %4079 = vmatprep.subr.bf16.mxu1 %v4254_v31 }
0x1f9c   :  { %4080 = vmatpush3.bf16.msra.mxu1 %v4254_v31 }
0x1f9d   :  { %4081 = vmatprep.subr.bf16.mxu1 %v4255_v49 }
0x1fa0   :  { %4082 = vmatpush3.bf16.msra.mxu1 %v4255_v49 }
0x1fa1   :  { %4083 = vmatprep.subr.bf16.mxu1 %v4256_v40 }
0x1fa4   :  { %4084 = vmatpush3.bf16.msra.mxu1 %v4256_v40  ;;  %v3620_v40 = vld [vmem:[%s6062_s7] ss:$0 sm:$0xff] }
0x1fa5   :  { %4085 = vmatprep.subr.bf16.mxu1 %v4257_v4 }
0x1fa8   :  { %4086 = vmatpush3.bf16.msra.mxu1 %v4257_v4 }
0x1fa9   :  { %4087 = vmatprep.subr.bf16.mxu1 %v4258_v53 }
0x1fac   :  { %4088 = vmatpush3.bf16.msra.mxu1 %v4258_v53 }
0x1fad   :  { %4089 = vmatprep.subr.bf16.mxu1 %v4259_v0 }
0x1fb0   :  { %4090 = vmatpush3.bf16.msra.mxu1 %v4259_v0 }
0x1fb1   :  { %4091 = vmatprep.subr.bf16.mxu1 %v4260_v37 }
0x1fb4   :  { %4092 = vmatpush3.bf16.msra.mxu1 %v4260_v37 }
0x1fb7   :  { %4094 = vmatmul.mubr.bf16.vlgmr.msra.gmra.mrb[88].mxu1 %v1114_v18 }
0x1fb8   :  { %4097 = vmatprep.mubr.bf16.mxu1 %v1473_v28 }
0x1fbf   :  { %4098 = vmatmul.mubr.bf16.gmra.mrb[92].mxu1 %v1832_v60 }
0x1fc0   :  { %4101 = vmatprep.mubr.bf16.mxu1 %v2191_v48 }
0x1fc7   :  { %4102 = vmatmul.mubr.bf16.gmra.mrb[96].mxu1 %v2550_v11 }
0x1fc8   :  { %4105 = vmatprep.mubr.bf16.mxu1 %v2909_v13 }
0x206a   :  { %v3863_v23 = vpop.f32.mrb[84].mxu1 }
0x206b   :  { %v3864_v56 = vpop.f32.mrb[85].mxu1 }
0x206c   :  { %v3865_v15 = vadd.f32 %v3864_v56, %v3863_v23  ;;  %v3866_v24 = vpop.f32.mrb[86].mxu1 }
0x206d   :  { %v3867_v17 = vpop.f32.mrb[87].mxu1 }
0x206e   :  { %v3254_v9 = vadd.f32 %v3865_v15, %v3048_v16  ;;  %v3868_v25 = vadd.f32 %v3867_v17, %v3866_v24 }
0x2070   :  { %4417 = vtanh.f32 %v3254_v9  ;;  %v3255_v1 = vadd.f32 %v3868_v25, %v3051_v39 }
0x2072   :  { %4419 = vtanh.f32 %v3255_v1 }
0x207a   :  { %v4418_v47 = vpop.eup %4417 }
0x207b   :  { %v3262_v38 = vmul.f32 %v4418_v47, %v3260_v46 }
0x207c   :  { %v4420_v29 = vpop.eup %4419 }
0x207d   :  { %v3263_v30 = vmul.f32 %v4420_v29, %v3261_v34  ;;  %v3264_v31 = vadd.f32 %v3262_v38, %v3258_v22 }
0x207f   :  { %v3265_v41 = vadd.f32 %v3263_v30, %v3259_v2  ;;  %v3266_v42 = vmax.f32 %v3264_v31, 0.0 }
0x2081   :  { %v3267_v32 = vmax.f32 %v3265_v41, 0.0 }
0x2083   :  { %v3268_v49 = vpack.c.bf16 %v3267_v32, %v3266_v42 }
0x2085   :  { %4106 = vmatmul.mubr.bf16.gmra.mrb[100].mxu1 %v3268_v49 }
0x208a   :  { %v4095_v4 = vpop.f32.mrb[88].mxu1 }
0x208b   :  { %v3392_v53 = vadd.f32 %v4095_v4, %v3620_v40  ;;  %v3383_v0 = vpop.f32.mrb[89].mxu1 }
0x208c   :  { %v3384_v33 = vadd.f32 %v3620_v40, %v3383_v0  ;;  %v4096_v37 = vpop.f32.mrb[90].mxu1 }
0x208d   :  { %3448 = vst [vmem:[%s6063_s8 + $0x10] sm:$0xff] %v3392_v53  ;;  %v3395_v3 = vadd.f32 %v4096_v37, %v3620_v40  ;;  %v3386_v26 = vpop.f32.mrb[91].mxu1 }
0x208e   :  { %3446 = vst [vmem:[%s6063_s8] sm:$0xff] %v3384_v33  ;;  %v3387_v27 = vadd.f32 %v3620_v40, %v3386_v26 }
0x208f   :  { %3449 = vst [vmem:[%s6063_s8 + $0x18] sm:$0xff] %v3395_v3 }
0x2090   :  { %3447 = vst [vmem:[%s6063_s8 + $0x8] sm:$0xff] %v3387_v27 }
0x2092   :  { %v4099_v35 = vpop.f32.mrb[92].mxu1 }
0x2093   :  { %v3408_v55 = vadd.f32 %v4099_v35, %v3620_v40  ;;  %v3399_v58 = vpop.f32.mrb[93].mxu1 }
0x2094   :  { %v3400_v54 = vadd.f32 %v3620_v40, %v3399_v58  ;;  %v4100_v19 = vpop.f32.mrb[94].mxu1 }
0x2095   :  { %3452 = vst [vmem:[%s6063_s8 + $0x30] sm:$0xff] %v3408_v55  ;;  %v3411_v63 = vadd.f32 %v4100_v19, %v3620_v40  ;;  %v3402_v18 = vpop.f32.mrb[95].mxu1 }
0x2096   :  { %3450 = vst [vmem:[%s6063_s8 + $0x20] sm:$0xff] %v3400_v54  ;;  %v3403_v28 = vadd.f32 %v3620_v40, %v3402_v18 }
0x2097   :  { %3453 = vst [vmem:[%s6063_s8 + $0x38] sm:$0xff] %v3411_v63 }
0x2098   :  { %3451 = vst [vmem:[%s6063_s8 + $0x28] sm:$0xff] %v3403_v28 }
0x209a   :  { %v4103_v7 = vpop.f32.mrb[96].mxu1 }
0x209b   :  { %v3424_v61 = vadd.f32 %v4103_v7, %v3620_v40  ;;  %v3415_v51 = vpop.f32.mrb[97].mxu1 }
0x209c   :  { %v3416_v59 = vadd.f32 %v3620_v40, %v3415_v51  ;;  %v4104_v50 = vpop.f32.mrb[98].mxu1 }
0x209d   :  { %3456 = vst [vmem:[%s6063_s8 + $0x50] sm:$0xff] %v3424_v61  ;;  %v3427_v52 = vadd.f32 %v4104_v50, %v3620_v40  ;;  %v3418_v60 = vpop.f32.mrb[99].mxu1 }
0x209e   :  { %3454 = vst [vmem:[%s6063_s8 + $0x40] sm:$0xff] %v3416_v59  ;;  %v3419_v48 = vadd.f32 %v3620_v40, %v3418_v60 }
0x209f   :  { %3457 = vst [vmem:[%s6063_s8 + $0x58] sm:$0xff] %v3427_v52 }
0x20a0   :  { %3455 = vst [vmem:[%s6063_s8 + $0x48] sm:$0xff] %v3419_v48 }
0x2158   :  { %v4107_v62 = vpop.f32.mrb[100].mxu1 }
0x2159   :  { %v3440_v6 = vadd.f32 %v4107_v62, %v3620_v40  ;;  %v3431_v8 = vpop.f32.mrb[101].mxu1 }
0x215a   :  { %v3432_v10 = vadd.f32 %v3620_v40, %v3431_v8  ;;  %v4108_v11 = vpop.f32.mrb[102].mxu1 }
0x215b   :  { %3460 = vst [vmem:[%s6063_s8 + $0x70] sm:$0xff] %v3440_v6  ;;  %v3443_v13 = vadd.f32 %v4108_v11, %v3620_v40  ;;  %v3434_v45 = vpop.f32.mrb[103].mxu1 }
0x215c   :  { %3458 = vst [vmem:[%s6063_s8 + $0x60] sm:$0xff] %v3432_v10  ;;  %v3435_v5 = vadd.f32 %v3620_v40, %v3434_v45 }
0x215d   :  { %3461 = vst [vmem:[%s6063_s8 + $0x78] sm:$0xff] %v3443_v13 }
0x215e   :  { %3459 = vst [vmem:[%s6063_s8 + $0x68] sm:$0xff] %v3435_v5 }

</bundles_post_ra>
